<compile_context>
chip_gen: v7x
topology: tpu7x:2x2x1
jax: 0.10.0
libtpu: 0.0.40
codegen_flags: <defaults>
</compile_context>

<pallas_src>
import jax
import jax.numpy as jnp
from jax.experimental import pallas as pl
from jax.experimental.pallas import tpu as pltpu

EMBED_DIM = 50
NOISE_DIM = 100
IMG_SHAPE = (1, 28, 28)
IMG_FLAT = 1 * 28 * 28          # 784
IMG_PAD = 896                   # 7 * 128 -> lane-dense output stores
H1, H2, H3 = 256, 512, 1024

DEFAULT_BATCH_TILE = 512        # ~12 MB total VMEM at TB=512 incl. weights


def _generator_kernel(noise_ref, lblc_ref,
                      w1n_ref, b1_ref,
                      w2_ref, b2_ref,
                      w3_ref, b3_ref,
                      w4_ref, b4_ref,
                      o_ref):
    # Cast to bf16 only at the MXU feed; accumulate in f32.
    noise = noise_ref[...].astype(jnp.bfloat16)                     # (TB, 100)

    # Linear(150 -> 256): noise @ W1[:100] + (Embedding @ W1[100:])[labels] + b1
    h1 = (jnp.dot(noise, w1n_ref[...], preferred_element_type=jnp.float32)
          + lblc_ref[...].astype(jnp.float32) + b1_ref[...])
    h1 = jnp.maximum(h1, 0.2 * h1)                                  # LeakyReLU

    # Linear(256 -> 512) + LeakyReLU(0.2)
    h2 = jnp.dot(h1.astype(jnp.bfloat16), w2_ref[...],
                 preferred_element_type=jnp.float32) + b2_ref[...]
    h2 = jnp.maximum(h2, 0.2 * h2)

    # Linear(512 -> 1024) + LeakyReLU(0.2)
    h3 = jnp.dot(h2.astype(jnp.bfloat16), w3_ref[...],
                 preferred_element_type=jnp.float32) + b3_ref[...]
    h3 = jnp.maximum(h3, 0.2 * h3)

    # Linear(1024 -> 896 padded) + Tanh (tanh -> EUP); padded cols are inert.
    h4 = jnp.dot(h3.astype(jnp.bfloat16), w4_ref[...],
                 preferred_element_type=jnp.float32) + b4_ref[...]
    o_ref[...] = jnp.tanh(h4).astype(o_ref.dtype)


def _round_up(x: int, m: int) -> int:
    return ((x + m - 1) // m) * m


def _pick_batch_tile(B: int, batch_tile: int) -> int:
    """TB is always a multiple of 8 (sublane aligned). For B >= 256 the batch
    is split into >=2 grid steps so the 'parallel' axis can shard across both
    TensorCores on v7x."""
    if B >= 256:
        tb = min(batch_tile, _round_up(pl.cdiv(B, 2), 8))
    else:
        tb = _round_up(B, 8)
    return max(tb, 8)


def generator_forward(noise, labels, params, *, batch_tile=DEFAULT_BATCH_TILE):
    """noise: (B, 100) f32, labels: (B,) int32 -> img (B, 1, 28, 28) f32."""
    B = noise.shape[0]
    # Folded label path: gather the precomputed (10, 256) first-layer
    # contribution table (bf16 keeps the input stream light).
    lblc = jnp.take(params["lbl_table"], labels, axis=0).astype(jnp.bfloat16)

    TB = _pick_batch_tile(B, batch_tile)
    num_tiles = pl.cdiv(B, TB)
    Bp = num_tiles * TB
    if Bp != B:
        pad = Bp - B
        noise_p = jnp.pad(noise, ((0, pad), (0, 0)))
        lblc_p = jnp.pad(lblc, ((0, pad), (0, 0)))
    else:
        noise_p, lblc_p = noise, lblc

    def x_spec(cols):
        return pl.BlockSpec((TB, cols), lambda i: (i, 0))

    def w_spec(shape):
        # Constant index_map -> block stays VMEM-resident across grid steps;
        # Buffered(1) avoids allocating a useless second buffer for it.
        return pl.BlockSpec(shape, lambda i: (0, 0),
                            pipeline_mode=pl.Buffered(1))

    out = pl.pallas_call(
        _generator_kernel,
        out_shape=jax.ShapeDtypeStruct((Bp, IMG_PAD), jnp.bfloat16),
        grid=(num_tiles,),
        in_specs=[
            x_spec(NOISE_DIM), x_spec(H1),
            w_spec((NOISE_DIM, H1)), w_spec((1, H1)),
            w_spec((H1, H2)), w_spec((1, H2)),
            w_spec((H2, H3)), w_spec((1, H3)),
            w_spec((H3, IMG_PAD)), w_spec((1, IMG_PAD)),
        ],
        out_specs=pl.BlockSpec((TB, IMG_PAD), lambda i: (i, 0)),
        compiler_params=pltpu.CompilerParams(
            dimension_semantics=("parallel",),
            vmem_limit_bytes=48 * 1024 * 1024),
    )(noise_p, lblc_p,
      params["w1n"], params["b1"],
      params["w2"], params["b2"],
      params["w3"], params["b3"],
      params["w4p"], params["b4p"])

    img = out[:B, :IMG_FLAT].astype(jnp.float32)
    return img.reshape(B, *IMG_SHAPE)


def init_params(key):
    """Mirror PyTorch defaults: Embedding ~ N(0,1); Linear weight/bias ~
       U(-1/sqrt(fan_in), 1/sqrt(fan_in)). Kernel weights stored bf16
       (HBM-traffic win); biases kept f32."""
    k_emb, k_w1, k_b1, k_w2, k_b2, k_w3, k_b3, k_w4, k_b4 = jax.random.split(key, 9)

    def lin(kw, kb, fan_in, fan_out):
        bound = 1.0 / jnp.sqrt(fan_in)
        w = jax.random.uniform(kw, (fan_in, fan_out), jnp.float32, -bound, bound)
        b = jax.random.uniform(kb, (1, fan_out), jnp.float32, -bound, bound)
        return w, b

    w1, b1 = lin(k_w1, k_b1, NOISE_DIM + EMBED_DIM, H1)     # (150, 256)
    w2, b2 = lin(k_w2, k_b2, H1, H2)
    w3, b3 = lin(k_w3, k_b3, H2, H3)
    w4, b4 = lin(k_w4, k_b4, H3, IMG_FLAT)
    emb = jax.random.normal(k_emb, (10, EMBED_DIM), jnp.float32)

    # Last layer zero-padded to 896 lanes (pad region sliced off in wrapper).
    w4p = jnp.pad(w4, ((0, 0), (0, IMG_PAD - IMG_FLAT)))
    b4p = jnp.pad(b4, ((0, 0), (0, IMG_PAD - IMG_FLAT)))

    # Fold the label-embedding path: (10, 50) @ (50, 256) -> (10, 256), once.
    lbl_table = jnp.dot(emb, w1[NOISE_DIM:].astype(jnp.bfloat16),
                        preferred_element_type=jnp.float32)

    return {
        # kernel inputs
        "w1n": w1[:NOISE_DIM].astype(jnp.bfloat16), "b1": b1,
        "lbl_table": lbl_table,
        "w2": w2.astype(jnp.bfloat16), "b2": b2,
        "w3": w3.astype(jnp.bfloat16), "b3": b3,
        "w4p": w4p.astype(jnp.bfloat16), "b4p": b4p,
        # reference-only (unpadded / concat form)
        "emb": emb,
        "w1_full": w1.astype(jnp.bfloat16),
        "w4": w4.astype(jnp.bfloat16), "b4": b4,
    }


def _reference_forward(noise, labels, params):
    """Pure-JAX reference following the PyTorch concat structure, using the
       same bf16 weights / f32 accumulation as the kernel."""
    lbl = jnp.take(params["emb"], labels, axis=0)
    x = jnp.concatenate([noise, lbl], axis=1)

    def dot(a, w):
        return jnp.dot(a.astype(jnp.bfloat16), w,
                       preferred_element_type=jnp.float32)

    h1 = dot(x, params["w1_full"]) + params["b1"]
    h1 = jnp.where(h1 > 0, h1, 0.2 * h1)
    h2 = dot(h1, params["w2"]) + params["b2"]
    h2 = jnp.where(h2 > 0, h2, 0.2 * h2)
    h3 = dot(h2, params["w3"]) + params["b3"]
    h3 = jnp.where(h3 > 0, h3, 0.2 * h3)
    h4 = dot(h3, params["w4"]) + params["b4"]
    return jnp.tanh(h4).reshape(-1, *IMG_SHAPE)


if __name__ == "__main__":
    key = jax.random.PRNGKey(0)
    k_noise, k_lbl, k_par = jax.random.split(key, 3)

    B = 8
    noise = jax.random.normal(k_noise, (B, NOISE_DIM), jnp.float32)
    labels = jax.random.randint(k_lbl, (B,), 0, 10, jnp.int32)
    params = init_params(k_par)

    img = generator_forward(noise, labels, params)
    img = jax.block_until_ready(img)

    ref = _reference_forward(noise, labels, params)
    assert img.shape == (B,) + IMG_SHAPE
    # bf16 MXU inputs / bf16 output store with f32 accumulation -> loosened
    # tolerance vs the reference.
    assert jnp.allclose(img, ref, atol=2e-2, rtol=2e-2)
    assert jnp.all(jnp.isfinite(img))

    print("KERNEL_OK")
</pallas_src>

<mosaic_0001>
module attributes {stable_mosaic.version = 11 : i64} {
  func.func @_generator_kernel(%arg0: i32, %arg1: memref<8x100xf32, #tpu.memory_space<vmem>>, %arg2: memref<8x256xbf16, #tpu.memory_space<vmem>>, %arg3: memref<100x256xbf16, #tpu.memory_space<vmem>>, %arg4: memref<1x256xf32, #tpu.memory_space<vmem>>, %arg5: memref<256x512xbf16, #tpu.memory_space<vmem>>, %arg6: memref<1x512xf32, #tpu.memory_space<vmem>>, %arg7: memref<512x1024xbf16, #tpu.memory_space<vmem>>, %arg8: memref<1x1024xf32, #tpu.memory_space<vmem>>, %arg9: memref<1024x896xbf16, #tpu.memory_space<vmem>>, %arg10: memref<1x896xf32, #tpu.memory_space<vmem>>, %arg11: memref<8x896xbf16, #tpu.memory_space<vmem>>) attributes {dimension_semantics = [#tpu.dimension_semantics<parallel>], iteration_bounds = array<i64: 1>, scalar_prefetch = 0 : i64, scratch_operands = 0 : i64, tpu.core_type = #tpu.core_type<tc>, window_params = [{transform_indices = @transform_0, window_bounds = array<i64: 8, 100>}, {transform_indices = @transform_1, window_bounds = array<i64: 8, 256>}, {pipeline_mode = #tpu.pipeline_mode<synchronous>, transform_indices = @transform_2, window_bounds = array<i64: 100, 256>}, {pipeline_mode = #tpu.pipeline_mode<synchronous>, transform_indices = @transform_3, window_bounds = array<i64: 1, 256>}, {pipeline_mode = #tpu.pipeline_mode<synchronous>, transform_indices = @transform_4, window_bounds = array<i64: 256, 512>}, {pipeline_mode = #tpu.pipeline_mode<synchronous>, transform_indices = @transform_5, window_bounds = array<i64: 1, 512>}, {pipeline_mode = #tpu.pipeline_mode<synchronous>, transform_indices = @transform_6, window_bounds = array<i64: 512, 1024>}, {pipeline_mode = #tpu.pipeline_mode<synchronous>, transform_indices = @transform_7, window_bounds = array<i64: 1, 1024>}, {pipeline_mode = #tpu.pipeline_mode<synchronous>, transform_indices = @transform_8, window_bounds = array<i64: 1024, 896>}, {pipeline_mode = #tpu.pipeline_mode<synchronous>, transform_indices = @transform_9, window_bounds = array<i64: 1, 896>}, {transform_indices = @transform_10, window_bounds = array<i64: 8, 896>}]} {
    %c0 = arith.constant 0 : index
    %c0_0 = arith.constant 0 : index
    %0 = vector.load %arg1[%c0, %c0_0] : memref<8x100xf32, #tpu.memory_space<vmem>>, vector<8x100xf32>
    %1 = arith.truncf %0 : vector<8x100xf32> to vector<8x100xbf16>
    %c0_1 = arith.constant 0 : index
    %c0_2 = arith.constant 0 : index
    %2 = vector.load %arg3[%c0_1, %c0_2] : memref<100x256xbf16, #tpu.memory_space<vmem>>, vector<100x256xbf16>
    %cst = arith.constant dense<0.000000e+00> : vector<8x256xf32>
    %3 = tpu.matmul %1, %2, %cst {dimension_numbers = #tpu.dot_dimension_numbers<[1], [0], [0], [1], [0, 0, 1, 1], [], []>} : vector<8x100xbf16>, vector<100x256xbf16>, vector<8x256xf32> -> vector<8x256xf32>
    %c0_3 = arith.constant 0 : index
    %c0_4 = arith.constant 0 : index
    %4 = vector.load %arg2[%c0_3, %c0_4] : memref<8x256xbf16, #tpu.memory_space<vmem>>, vector<8x256xbf16>
    %5 = arith.extf %4 : vector<8x256xbf16> to vector<8x256xf32>
    %6 = arith.addf %3, %5 : vector<8x256xf32>
    %c0_5 = arith.constant 0 : index
    %c0_6 = arith.constant 0 : index
    %7 = vector.load %arg4[%c0_5, %c0_6] : memref<1x256xf32, #tpu.memory_space<vmem>>, vector<1x256xf32>
    %8 = vector.broadcast %7 : vector<1x256xf32> to vector<8x256xf32>
    %9 = arith.addf %6, %8 : vector<8x256xf32>
    %cst_7 = arith.constant 2.000000e-01 : f32
    %10 = vector.broadcast %cst_7 : f32 to vector<8x256xf32>
    %11 = arith.mulf %10, %9 : vector<8x256xf32>
    %12 = arith.maximumf %9, %11 : vector<8x256xf32>
    %13 = arith.truncf %12 : vector<8x256xf32> to vector<8x256xbf16>
    %c0_8 = arith.constant 0 : index
    %c0_9 = arith.constant 0 : index
    %14 = vector.load %arg5[%c0_8, %c0_9] : memref<256x512xbf16, #tpu.memory_space<vmem>>, vector<256x512xbf16>
    %cst_10 = arith.constant dense<0.000000e+00> : vector<8x512xf32>
    %15 = tpu.matmul %13, %14, %cst_10 {dimension_numbers = #tpu.dot_dimension_numbers<[1], [0], [0], [1], [0, 0, 1, 1], [], []>} : vector<8x256xbf16>, vector<256x512xbf16>, vector<8x512xf32> -> vector<8x512xf32>
    %c0_11 = arith.constant 0 : index
    %c0_12 = arith.constant 0 : index
    %16 = vector.load %arg6[%c0_11, %c0_12] : memref<1x512xf32, #tpu.memory_space<vmem>>, vector<1x512xf32>
    %17 = vector.broadcast %16 : vector<1x512xf32> to vector<8x512xf32>
    %18 = arith.addf %15, %17 : vector<8x512xf32>
    %cst_13 = arith.constant 2.000000e-01 : f32
    %19 = vector.broadcast %cst_13 : f32 to vector<8x512xf32>
    %20 = arith.mulf %19, %18 : vector<8x512xf32>
    %21 = arith.maximumf %18, %20 : vector<8x512xf32>
    %22 = arith.truncf %21 : vector<8x512xf32> to vector<8x512xbf16>
    %c0_14 = arith.constant 0 : index
    %c0_15 = arith.constant 0 : index
    %23 = vector.load %arg7[%c0_14, %c0_15] : memref<512x1024xbf16, #tpu.memory_space<vmem>>, vector<512x1024xbf16>
    %cst_16 = arith.constant dense<0.000000e+00> : vector<8x1024xf32>
    %24 = tpu.matmul %22, %23, %cst_16 {dimension_numbers = #tpu.dot_dimension_numbers<[1], [0], [0], [1], [0, 0, 1, 1], [], []>} : vector<8x512xbf16>, vector<512x1024xbf16>, vector<8x1024xf32> -> vector<8x1024xf32>
    %c0_17 = arith.constant 0 : index
    %c0_18 = arith.constant 0 : index
    %25 = vector.load %arg8[%c0_17, %c0_18] : memref<1x1024xf32, #tpu.memory_space<vmem>>, vector<1x1024xf32>
    %26 = vector.broadcast %25 : vector<1x1024xf32> to vector<8x1024xf32>
    %27 = arith.addf %24, %26 : vector<8x1024xf32>
    %cst_19 = arith.constant 2.000000e-01 : f32
    %28 = vector.broadcast %cst_19 : f32 to vector<8x1024xf32>
    %29 = arith.mulf %28, %27 : vector<8x1024xf32>
    %30 = arith.maximumf %27, %29 : vector<8x1024xf32>
    %31 = arith.truncf %30 : vector<8x1024xf32> to vector<8x1024xbf16>
    %c0_20 = arith.constant 0 : index
    %c0_21 = arith.constant 0 : index
    %32 = vector.load %arg9[%c0_20, %c0_21] : memref<1024x896xbf16, #tpu.memory_space<vmem>>, vector<1024x896xbf16>
    %cst_22 = arith.constant dense<0.000000e+00> : vector<8x896xf32>
    %33 = tpu.matmul %31, %32, %cst_22 {dimension_numbers = #tpu.dot_dimension_numbers<[1], [0], [0], [1], [0, 0, 1, 1], [], []>} : vector<8x1024xbf16>, vector<1024x896xbf16>, vector<8x896xf32> -> vector<8x896xf32>
    %c0_23 = arith.constant 0 : index
    %c0_24 = arith.constant 0 : index
    %34 = vector.load %arg10[%c0_23, %c0_24] : memref<1x896xf32, #tpu.memory_space<vmem>>, vector<1x896xf32>
    %35 = vector.broadcast %34 : vector<1x896xf32> to vector<8x896xf32>
    %36 = arith.addf %33, %35 : vector<8x896xf32>
    %37 = math.tanh %36 : vector<8x896xf32>
    %38 = arith.truncf %37 : vector<8x896xf32> to vector<8x896xbf16>
    %c0_25 = arith.constant 0 : index
    %c0_26 = arith.constant 0 : index
    %39 = vector.load %arg11[%c0_25, %c0_26] : memref<8x896xbf16, #tpu.memory_space<vmem>>, vector<8x896xbf16>
    tpu.vector_store %arg11[%c0_25, %c0_26], %38 {strides = array<i32>} : memref<8x896xbf16, #tpu.memory_space<vmem>>, vector<8x896xbf16>,
    return
  }
  func.func @transform_0(%arg0: i32) -> (i32, i32) {
    %c0_i32 = arith.constant 0 : i32
    %c0_i32_0 = arith.constant 0 : i32
    return %arg0, %c0_i32 : i32, i32
  }
  func.func @transform_1(%arg0: i32) -> (i32, i32) {
    %c0_i32 = arith.constant 0 : i32
    %c0_i32_0 = arith.constant 0 : i32
    return %arg0, %c0_i32 : i32, i32
  }
  func.func @transform_2(%arg0: i32) -> (i32, i32) {
    %c0_i32 = arith.constant 0 : i32
    %c0_i32_0 = arith.constant 0 : i32
    %c0_i32_1 = arith.constant 0 : i32
    return %c0_i32, %c0_i32_0 : i32, i32
  }
  func.func @transform_3(%arg0: i32) -> (i32, i32) {
    %c0_i32 = arith.constant 0 : i32
    %c0_i32_0 = arith.constant 0 : i32
    %c0_i32_1 = arith.constant 0 : i32
    return %c0_i32, %c0_i32_0 : i32, i32
  }
  func.func @transform_4(%arg0: i32) -> (i32, i32) {
    %c0_i32 = arith.constant 0 : i32
    %c0_i32_0 = arith.constant 0 : i32
    %c0_i32_1 = arith.constant 0 : i32
    return %c0_i32, %c0_i32_0 : i32, i32
  }
  func.func @transform_5(%arg0: i32) -> (i32, i32) {
    %c0_i32 = arith.constant 0 : i32
    %c0_i32_0 = arith.constant 0 : i32
    %c0_i32_1 = arith.constant 0 : i32
    return %c0_i32, %c0_i32_0 : i32, i32
  }
  func.func @transform_6(%arg0: i32) -> (i32, i32) {
    %c0_i32 = arith.constant 0 : i32
    %c0_i32_0 = arith.constant 0 : i32
    %c0_i32_1 = arith.constant 0 : i32
    return %c0_i32, %c0_i32_0 : i32, i32
  }
  func.func @transform_7(%arg0: i32) -> (i32, i32) {
    %c0_i32 = arith.constant 0 : i32
    %c0_i32_0 = arith.constant 0 : i32
    %c0_i32_1 = arith.constant 0 : i32
    return %c0_i32, %c0_i32_0 : i32, i32
  }
  func.func @transform_8(%arg0: i32) -> (i32, i32) {
    %c0_i32 = arith.constant 0 : i32
    %c0_i32_0 = arith.constant 0 : i32
    %c0_i32_1 = arith.constant 0 : i32
    return %c0_i32, %c0_i32_0 : i32, i32
  }
  func.func @transform_9(%arg0: i32) -> (i32, i32) {
    %c0_i32 = arith.constant 0 : i32
    %c0_i32_0 = arith.constant 0 : i32
    %c0_i32_1 = arith.constant 0 : i32
    return %c0_i32, %c0_i32_0 : i32, i32
  }
  func.func @transform_10(%arg0: i32) -> (i32, i32) {
    %c0_i32 = arith.constant 0 : i32
    %c0_i32_0 = arith.constant 0 : i32
    return %arg0, %c0_i32 : i32, i32
  }
}

</mosaic_0001>

<bundles_post_ra>
// kernel: tpu_custom_call.1
= control target key start
LH: loop header
LB: loop body
LE: loop exit
PB: predicated region body
PF: predicated region fallthrough
CT: control target
= control target key end

     0   :  { %15 = vsyncpa [#allocation3], 0  ;;  %s8690_s0 = inlined_call_operand.hbm [shape: f32[8,100], index: 0, kind: input, shape index: {}]   ;;  %s8691_s1 = inlined_call_operand.hbm [shape: bf16[8,256], index: 1, kind: input, shape index: {}]   ;;  %s8692_s2 = inlined_call_operand.hbm [shape: bf16[100,256], index: 2, kind: input, shape index: {}]   ;;  %s8693_s3 = inlined_call_operand.hbm [shape: f32[1,256], index: 3, kind: input, shape index: {}]   ;;  %s8694_s4 = inlined_call_operand.hbm [shape: bf16[256,512], index: 4, kind: input, shape index: {}]   ;;  %s8695_s5 = inlined_call_operand.hbm [shape: f32[1,512], index: 5, kind: input, shape index: {}]   ;;  %s8696_s6 = inlined_call_operand.hbm [shape: bf16[512,1024], index: 6, kind: input, shape index: {}]   ;;  %s8697_s7 = inlined_call_operand.hbm [shape: f32[1,1024], index: 7, kind: input, shape index: {}]   ;;  %s8698_s8 = inlined_call_operand.hbm [shape: bf16[1024,896], index: 8, kind: input, shape index: {}]   ;;  %s8699_s9 = inlined_call_operand.hbm [shape: f32[1,896], index: 9, kind: input, shape index: {}]   ;;  %s8700_s10 = inlined_call_operand.hbm [shape: bf16[8,896], index: 10, kind: output, shape index: {}]  }
   0x1   :  { %16 = vsyncpa [#allocation6], 0 }
   0x2   :  { %17 = vsyncpa [#allocation9], 0 }
   0x3   :  { %18 = vsyncpa [#allocation12], 0 }
   0x4   :  { %19 = vsyncpa [#allocation15], 0 }
   0x5   :  { %20 = vsyncpa [#allocation18], 0 }
   0x6   :  { %21 = vsyncpa [#allocation4], 0  ;;  %s8303_s13 = smov [#allocation5]   ;;  %s8304_s15 = smov [#allocation8]  }
   0x7   :  { %s38_s14 = sshll.u32 %s8303_s13, 4  ;;  %s60_s16 = sshll.u32 %s8304_s15, 4  ;;  %s39_s14 = int_to_ptr.vmem [resolvable:$true] %s38_s14  ;;  %s61_s16 = int_to_ptr.vmem [resolvable:$true] %s60_s16 }
   0x8   :  { %s8047_s19 = scalar_lea.hbm %s8691_s1, 128 }
   0x9   :  { %p8048_p0 = scmp.ne.s32.totalorder %s8691_s1, %s8047_s19  ;;  %p8051_p1 = scmp.lt.u32.totalorder %s8047_s19, %s8691_s1 }
   0xb   :  { %p8053_p2 = pnand %p8051_p1, %p8048_p0 }
   0xd   :  { %8056 = shalt.err (!%p8053_p2)
}
   0xe   :  { %s8057_s24 = scalar_lea.vmem %s39_s14, 128  ;;  %p8062_p4 = scmp.lt.s32.totalorder %s39_s14, %s39_s14 }
   0xf   :  { %p8058_p3 = scmp.ne.s32.totalorder %s39_s14, %s8057_s24  ;;  %p8063_p5 = scmp.lt.s32.totalorder %s8057_s24, %s8057_s24 }
  0x11   :  { %p8064_p6 = por %p8063_p5, %p8062_p4 }
  0x13   :  { %p8065_p7 = pnand %p8064_p6, %p8058_p3 }
  0x15   :  { %8068 = shalt.err (!%p8065_p7)
}
  0x16   :  { %41 = dma.hbm_to_vmem [thread:$0]  %s8691_s1, 128, %s39_s14, [#allocation6]  }
  0x17   :  { %s8069_s29 = scalar_lea.hbm %s8693_s3, 32 }
  0x18   :  { %p8070_p8 = scmp.ne.s32.totalorder %s8693_s3, %s8069_s29  ;;  %p8073_p9 = scmp.lt.u32.totalorder %s8069_s29, %s8693_s3 }
  0x1a   :  { %p8075_p10 = pnand %p8073_p9, %p8070_p8 }
  0x1c   :  { %8078 = shalt.err (!%p8075_p10)
}
  0x1d   :  { %s8079_s15 = scalar_lea.vmem %s61_s16, 32  ;;  %p8084_p12 = scmp.lt.s32.totalorder %s61_s16, %s61_s16 }
  0x1e   :  { %p8080_p11 = scmp.ne.s32.totalorder %s61_s16, %s8079_s15  ;;  %p8085_p13 = scmp.lt.s32.totalorder %s8079_s15, %s8079_s15 }
  0x20   :  { %p8086_p0 = por %p8085_p13, %p8084_p12 }
  0x22   :  { %p8087_p1 = pnand %p8086_p0, %p8080_p11 }
  0x24   :  { %8090 = shalt.err (!%p8087_p1)
}
  0x25   :  { %63 = dma.hbm_to_vmem [thread:$0]  %s8693_s3, 32, %s61_s16, [#allocation9]  }
  0x26   :  { %s8305_s17 = smov [#allocation11]   ;;  %s8306_s19 = smov [#allocation14]  }
  0x27   :  { %s82_s18 = sshll.u32 %s8305_s17, 4  ;;  %s104_s20 = sshll.u32 %s8306_s19, 4  ;;  %s83_s18 = int_to_ptr.vmem [resolvable:$true] %s82_s18  ;;  %s105_s20 = int_to_ptr.vmem [resolvable:$true] %s104_s20 }
  0x28   :  { %s8091_s23 = scalar_lea.hbm %s8695_s5, 64 }
  0x29   :  { %p8092_p2 = scmp.ne.s32.totalorder %s8695_s5, %s8091_s23  ;;  %p8095_p3 = scmp.lt.u32.totalorder %s8091_s23, %s8695_s5 }
  0x2b   :  { %p8097_p4 = pnand %p8095_p3, %p8092_p2 }
  0x2d   :  { %8100 = shalt.err (!%p8097_p4)
}
  0x2e   :  { %s8101_s3 = scalar_lea.vmem %s83_s18, 64  ;;  %p8106_p6 = scmp.lt.s32.totalorder %s83_s18, %s83_s18 }
  0x2f   :  { %p8102_p5 = scmp.ne.s32.totalorder %s83_s18, %s8101_s3  ;;  %p8107_p7 = scmp.lt.s32.totalorder %s8101_s3, %s8101_s3 }
  0x31   :  { %p8108_p8 = por %p8107_p7, %p8106_p6 }
  0x33   :  { %p8109_p9 = pnand %p8108_p8, %p8102_p5 }
  0x35   :  { %8112 = shalt.err (!%p8109_p9)
}
  0x36   :  { %85 = dma.hbm_to_vmem [thread:$0]  %s8695_s5, 64, %s83_s18, [#allocation12]  }
  0x37   :  { %s8113_s11 = scalar_lea.hbm %s8697_s7, 128 }
  0x38   :  { %p8114_p10 = scmp.ne.s32.totalorder %s8697_s7, %s8113_s11  ;;  %p8117_p11 = scmp.lt.u32.totalorder %s8113_s11, %s8697_s7 }
  0x3a   :  { %p8119_p12 = pnand %p8117_p11, %p8114_p10 }
  0x3c   :  { %8122 = shalt.err (!%p8119_p12)
}
  0x3d   :  { %s8123_s14 = scalar_lea.vmem %s105_s20, 128  ;;  %p8128_p0 = scmp.lt.s32.totalorder %s105_s20, %s105_s20 }
  0x3e   :  { %p8124_p13 = scmp.ne.s32.totalorder %s105_s20, %s8123_s14  ;;  %p8129_p1 = scmp.lt.s32.totalorder %s8123_s14, %s8123_s14 }
  0x40   :  { %p8130_p2 = por %p8129_p1, %p8128_p0 }
  0x42   :  { %p8131_p3 = pnand %p8130_p2, %p8124_p13 }
  0x44   :  { %8134 = shalt.err (!%p8131_p3)
}
  0x45   :  { %107 = dma.hbm_to_vmem [thread:$0]  %s8697_s7, 128, %s105_s20, [#allocation15]  }
  0x46   :  { %s8307_s18 = smov [#allocation2]   ;;  %s8308_s21 = smov [#allocation7]  }
  0x47   :  { %s28_s19 = sshll.u32 %s8307_s18, 4  ;;  %s47_s22 = sshll.u32 %s8308_s21, 4  ;;  %s29_s19 = int_to_ptr.vmem [resolvable:$true] %s28_s19  ;;  %s8426_s22 = int_to_ptr.vmem [resolvable:$true] %s47_s22 }
  0x48   :  { %s8135_s25 = scalar_lea.hbm %s8690_s0, 128 }
  0x49   :  { %p8136_p4 = scmp.ne.s32.totalorder %s8690_s0, %s8135_s25  ;;  %p8139_p5 = scmp.lt.u32.totalorder %s8135_s25, %s8690_s0 }
  0x4b   :  { %p8141_p6 = pnand %p8139_p5, %p8136_p4 }
  0x4d   :  { %8144 = shalt.err (!%p8141_p6)
}
  0x4e   :  { %s8145_s7 = scalar_lea.vmem %s29_s19, 128  ;;  %p8150_p8 = scmp.lt.s32.totalorder %s29_s19, %s29_s19 }
  0x4f   :  { %p8146_p7 = scmp.ne.s32.totalorder %s29_s19, %s8145_s7  ;;  %p8151_p9 = scmp.lt.s32.totalorder %s8145_s7, %s8145_s7 }
  0x51   :  { %p8152_p10 = por %p8151_p9, %p8150_p8 }
  0x53   :  { %p8153_p11 = pnand %p8152_p10, %p8146_p7 }
  0x55   :  { %8156 = shalt.err (!%p8153_p11)
}
  0x56   :  { %31 = dma.hbm_to_vmem [thread:$0]  %s8690_s0, 128, %s29_s19, [#allocation3]  }
  0x57   :  { %s8157_s11 = scalar_lea.hbm %s8692_s2, 1664 }
  0x58   :  { %p8158_p12 = scmp.ne.s32.totalorder %s8692_s2, %s8157_s11  ;;  %p8161_p13 = scmp.lt.u32.totalorder %s8157_s11, %s8692_s2 }
  0x5a   :  { %p8163_p0 = pnand %p8161_p13, %p8158_p12 }
  0x5c   :  { %8166 = shalt.err (!%p8163_p0)
}
  0x5d   :  { %s8167_s14 = scalar_lea.vmem %s8426_s22, 1664  ;;  %p8172_p2 = scmp.lt.s32.totalorder %s8426_s22, %s8426_s22 }
  0x5e   :  { %p8168_p1 = scmp.ne.s32.totalorder %s8426_s22, %s8167_s14  ;;  %p8173_p3 = scmp.lt.s32.totalorder %s8167_s14, %s8167_s14 }
  0x60   :  { %p8174_p4 = por %p8173_p3, %p8172_p2 }
  0x62   :  { %p8175_p5 = pnand %p8174_p4, %p8168_p1 }
  0x64   :  { %8178 = shalt.err (!%p8175_p5)
}
  0x65   :  { %s8309_s0 = smov 128   ;;  %s8310_s5 = smov 8  }
  0x66   :  { %53 = dma.hbm_to_vmem [thread:$0]  %s8692_s2, 1664, %s8426_s22, [#allocation6], %s8309_s0, %s8309_s0, %s8310_s5  }
  0x67   :  { %s8311_s19 = smov [#allocation10]   ;;  %s8179_s25 = scalar_lea.hbm %s8694_s4, 8192 }
  0x68   :  { %s69_s21 = sshll.u32 %s8311_s19, 4  ;;  %p8180_p6 = scmp.ne.s32.totalorder %s8694_s4, %s8179_s25  ;;  %s70_s21 = int_to_ptr.vmem [resolvable:$true] %s69_s21 }
  0x69   :  { %p8183_p7 = scmp.lt.u32.totalorder %s8179_s25, %s8694_s4 }
  0x6b   :  { %p8185_p8 = pnand %p8183_p7, %p8180_p6 }
  0x6d   :  { %8188 = shalt.err (!%p8185_p8)
}
  0x6e   :  { %s8189_s7 = scalar_lea.vmem %s70_s21, 8192  ;;  %p8194_p10 = scmp.lt.s32.totalorder %s70_s21, %s70_s21 }
  0x6f   :  { %p8190_p9 = scmp.ne.s32.totalorder %s70_s21, %s8189_s7  ;;  %p8195_p11 = scmp.lt.s32.totalorder %s8189_s7, %s8189_s7 }
  0x71   :  { %p8196_p12 = por %p8195_p11, %p8194_p10 }
  0x73   :  { %p8197_p13 = pnand %p8196_p12, %p8190_p9 }
  0x75   :  { %8200 = shalt.err (!%p8197_p13)
}
  0x76   :  { %s8312_s2 = smov 256   ;;  %s8313_s22 = smov 16  }
  0x77   :  { %75 = dma.hbm_to_vmem [thread:$0]  %s8694_s4, 8192, %s70_s21, [#allocation9], %s8312_s2, %s8312_s2, %s8313_s22  }
  0x78   :  { %s8314_s29 = smov [#allocation13]   ;;  %s8201_s13 = scalar_lea.hbm %s8696_s6, 32768 }
  0x79   :  { %s91_s30 = sshll.u32 %s8314_s29, 4  ;;  %p8202_p0 = scmp.ne.s32.totalorder %s8696_s6, %s8201_s13  ;;  %s92_s30 = int_to_ptr.vmem [resolvable:$true] %s91_s30 }
  0x7a   :  { %p8205_p1 = scmp.lt.u32.totalorder %s8201_s13, %s8696_s6 }
  0x7c   :  { %p8207_p2 = pnand %p8205_p1, %p8202_p0 }
  0x7e   :  { %8210 = shalt.err (!%p8207_p2)
}
  0x7f   :  { %s8211_s5 = scalar_lea.vmem %s92_s30, 32768  ;;  %p8216_p4 = scmp.lt.s32.totalorder %s92_s30, %s92_s30 }
  0x80   :  { %p8212_p3 = scmp.ne.s32.totalorder %s92_s30, %s8211_s5  ;;  %p8217_p5 = scmp.lt.s32.totalorder %s8211_s5, %s8211_s5 }
  0x82   :  { %p8218_p6 = por %p8217_p5, %p8216_p4 }
  0x84   :  { %p8219_p7 = pnand %p8218_p6, %p8212_p3 }
  0x86   :  { %8222 = shalt.err (!%p8219_p7)
}
  0x87   :  { %s8315_s4 = smov 512   ;;  %s8316_s17 = smov 32  }
  0x88   :  { %97 = dma.hbm_to_vmem [thread:$0]  %s8696_s6, 32768, %s92_s30, [#allocation12], %s8315_s4, %s8315_s4, %s8316_s17  }
  0x89   :  { %s8317_s21 = smov [#allocation16]   ;;  %s8223_s26 = scalar_lea.hbm %s8698_s8, 57344 }
  0x8a   :  { %s113_s23 = sshll.u32 %s8317_s21, 4  ;;  %p8224_p8 = scmp.ne.s32.totalorder %s8698_s8, %s8223_s26  ;;  %s114_s23 = int_to_ptr.vmem [resolvable:$true] %s113_s23 }
  0x8b   :  { %p8227_p9 = scmp.lt.u32.totalorder %s8223_s26, %s8698_s8 }
  0x8d   :  { %p8229_p10 = pnand %p8227_p9, %p8224_p8 }
  0x8f   :  { %8232 = shalt.err (!%p8229_p10)
}
  0x90   :  { %s8233_s2 = scalar_lea.vmem %s114_s23, 57344  ;;  %p8238_p12 = scmp.lt.s32.totalorder %s114_s23, %s114_s23 }
  0x91   :  { %p8234_p11 = scmp.ne.s32.totalorder %s114_s23, %s8233_s2  ;;  %p8239_p13 = scmp.lt.s32.totalorder %s8233_s2, %s8233_s2 }
  0x93   :  { %p8240_p0 = por %p8239_p13, %p8238_p12 }
  0x95   :  { %p8241_p1 = pnand %p8240_p0, %p8234_p11 }
  0x97   :  { %8244 = shalt.err (!%p8241_p1)
}
  0x98   :  { %s8318_s6 = smov 448   ;;  %s8319_s22 = smov 28  }
  0x99   :  { %119 = dma.hbm_to_vmem [thread:$0]  %s8698_s8, 57344, %s114_s23, [#allocation15], %s8318_s6, %s8318_s6, %s8319_s22  }
  0x9a   :  { %s8320_s29 = smov [#allocation17]   ;;  %s8245_s13 = scalar_lea.hbm %s8699_s9, 112 }
  0x9b   :  { %s126_s30 = sshll.u32 %s8320_s29, 4  ;;  %p8246_p2 = scmp.ne.s32.totalorder %s8699_s9, %s8245_s13  ;;  %s127_s30 = int_to_ptr.vmem [resolvable:$true] %s126_s30 }
  0x9c   :  { %p8249_p3 = scmp.lt.u32.totalorder %s8245_s13, %s8699_s9 }
  0x9e   :  { %p8251_p4 = pnand %p8249_p3, %p8246_p2 }
  0xa0   :  { %8254 = shalt.err (!%p8251_p4)
}
  0xa1   :  { %s8255_s5 = scalar_lea.vmem %s127_s30, 112  ;;  %s8259_s8 = scalar_lea.vmem %s127_s30, 128 }
  0xa2   :  { %p8256_p5 = scmp.ne.s32.totalorder %s127_s30, %s8255_s5  ;;  %p8260_p6 = scmp.lt.s32.totalorder %s127_s30, %s127_s30 }
  0xa3   :  { %p8261_p7 = scmp.lt.s32.totalorder %s8259_s8, %s8255_s5 }
  0xa5   :  { %p8262_p8 = por %p8261_p7, %p8260_p6 }
  0xa7   :  { %p8263_p9 = pnand %p8262_p8, %p8256_p5 }
  0xa9   :  { %8266 = shalt.err (!%p8263_p9)
}
  0xaa   :  { %129 = dma.hbm_to_vmem [thread:$0]  %s8699_s9, 112, %s127_s30, [#allocation18]  }
  0xab   :  { %8289 = dma.done.wait [#allocation3], 128  }
  0xac   :  { %8290 = vsyncadd [#allocation3], 4294967168 }
  0xad   :  { %8291 = dma.done.wait [#allocation6], 1792  }
  0xae   :  { %8292 = vsyncadd [#allocation6], 4294965504 }
  0xaf   :  { %8293 = dma.done.wait [#allocation9], 8224  }
  0xb0   :  { %8294 = vsyncadd [#allocation9], 4294959072 }
  0xb1   :  { %8295 = dma.done.wait [#allocation12], 32832  }
  0xb2   :  { %8296 = vsyncadd [#allocation12], 4294934464 }
  0xb3   :  { %8297 = dma.done.wait [#allocation15], 57472  }
  0xb4   :  { %8298 = vsyncadd [#allocation15], 4294909824 }
  0xb5   :  { %8299 = dma.done.wait [#allocation18], 112  }
  0xb6   :  { %8300 = vsyncadd [#allocation18], 4294967184  ;;  %v8321_v0 = vmov 0   ;;  %v7277_v1 = vld [vmem:[#allocation7 + $0x4] ss:$8 sps:$4 sm:$0xff]   ;;  %vm248_vm0 = vcmask 1041408  }
  0xb7   :  { %287 = vmatprep.mubr.bf16.mxu0 %v8321_v0  ;;  %v7279_v2 = vld [vmem:[#allocation7] ss:$8 sps:$4 sm:$0xff]   ;;  %255 = vmatprep.subr.bf16.mxu0 %v7277_v1  ;;  %v7280_v3 = vld [vmem:[#allocation7 + $0x14] ss:$8 sps:$4 sm:$0xff]   ;;  %v7282_v4 = vld [vmem:[#allocation7 + $0x10] ss:$8 sps:$4 sm:$0xff]  }
  0xb8   :  { %256 = vmatpush1.bf16.msra.mxu0 %v7279_v2  ;;  %v7283_v5 = vld [vmem:[#allocation7 + $0x24] ss:$8 sps:$4 sm:$0xff]   ;;  %v7285_v6 = vld [vmem:[#allocation7 + $0x20] ss:$8 sps:$4 sm:$0xff]   ;;  %v7286_v7 = vld [vmem:[#allocation7 + $0x34] ss:$8 sps:$4 sm:$0xff]  }
  0xb9   :  { %257 = vmatprep.subr.bf16.mxu0 %v7280_v3  ;;  %v7288_v8 = vld [vmem:[#allocation7 + $0x30] ss:$8 sps:$4 sm:$0xff]   ;;  %v7289_v9 = vld [vmem:[#allocation7 + $0x44] ss:$8 sps:$4 sm:$0xff]   ;;  %v7291_v10 = vld [vmem:[#allocation7 + $0x40] ss:$8 sps:$4 sm:$0xff]  }
  0xba   :  { %v7292_v11 = vld [vmem:[#allocation7 + $0x54] ss:$8 sps:$4 sm:$0xff]   ;;  %v175_v12 = vld [vmem:[#allocation7 + $0x60] sm:$0x33]  ;;  %v7294_v13 = vld [vmem:[#allocation7 + $0x50] ss:$8 sps:$4 sm:$0xff]  }
  0xbb   :  { %v6324_v14 = vcombine.high %v175_v12, %v175_v12  ;;  %v6323_v15 = vcombine.low %v175_v12, %v175_v12  ;;  %v161_v16 = vld [vmem:[#allocation2] sm:$0xff]  ;;  %v7297_v19 = vld [vmem:[#allocation10] ss:$16 sps:$4 sm:$0xff]   ;;  %vm244_vm1 = vcmask 818176   ;;  %s8322_s9 = smov [#allocation19]  }
  0xbc   :  { %258 = vmatpush1.bf16.msra.mxu0 %v7282_v4  ;;  %v7299_v18 = vld [vmem:[#allocation10 + $0x4] ss:$16 sps:$4 sm:$0xff]   ;;  %v162_v20 = vpack.c.bf16 %v161_v16, %v161_v16  ;;  %v7300_v22 = vld [vmem:[#allocation10 + $0x20] ss:$16 sps:$4 sm:$0xff]   ;;  %v7347_v51 = vld [vmem:[#allocation10 + $0xc] ss:$16 sps:$4 sm:$0xff]  }
  0xbd   :  { %259 = vmatprep.subr.bf16.mxu0 %v7283_v5  ;;  %v250_v17 = vsel %vm248_vm0, %v6323_v15, 0  ;;  %v7302_v21 = vld [vmem:[#allocation10 + $0x24] ss:$16 sps:$4 sm:$0xff]   ;;  %v7303_v24 = vld [vmem:[#allocation10 + $0x40] ss:$16 sps:$4 sm:$0xff]   ;;  %s6297_s18 = sshll.u32 %s8322_s9, 4  ;;  %s6298_s18 = int_to_ptr.vmem [resolvable:$true] %s6297_s18 }
  0xbe   :  { %v7305_v23 = vld [vmem:[#allocation10 + $0x44] ss:$16 sps:$4 sm:$0xff]   ;;  %v7306_v26 = vld [vmem:[#allocation10 + $0x60] ss:$16 sps:$4 sm:$0xff]   ;;  %s8267_s19 = scalar_lea.vmem %s6298_s18, 448  ;;  %p8272_p11 = scmp.lt.s32.totalorder %s6298_s18, %s6298_s18 }
  0xbf   :  { %v7308_v25 = vld [vmem:[#allocation10 + $0x64] ss:$16 sps:$4 sm:$0xff]   ;;  %v7309_v28 = vld [vmem:[#allocation10 + $0x80] ss:$16 sps:$4 sm:$0xff]   ;;  %p8268_p10 = scmp.ne.s32.totalorder %s6298_s18, %s8267_s19  ;;  %p8273_p12 = scmp.lt.s32.totalorder %s8267_s19, %s8267_s19 }
  0xc0   :  { %260 = vmatpush1.bf16.msra.mxu0 %v7285_v6  ;;  %v7311_v27 = vld [vmem:[#allocation10 + $0x84] ss:$16 sps:$4 sm:$0xff]   ;;  %v7312_v30 = vld [vmem:[#allocation10 + $0xa0] ss:$16 sps:$4 sm:$0xff]  }
  0xc1   :  { %261 = vmatprep.subr.bf16.mxu0 %v7286_v7  ;;  %v7314_v29 = vld [vmem:[#allocation10 + $0xa4] ss:$16 sps:$4 sm:$0xff]   ;;  %v7315_v32 = vld [vmem:[#allocation10 + $0xc0] ss:$16 sps:$4 sm:$0xff]   ;;  %p8274_p13 = por %p8273_p12, %p8272_p11 }
  0xc2   :  { %v7317_v31 = vld [vmem:[#allocation10 + $0xc4] ss:$16 sps:$4 sm:$0xff]   ;;  %v7318_v34 = vld [vmem:[#allocation10 + $0xe0] ss:$16 sps:$4 sm:$0xff]  }
  0xc3   :  { %v7320_v33 = vld [vmem:[#allocation10 + $0xe4] ss:$16 sps:$4 sm:$0xff]   ;;  %v7321_v36 = vld [vmem:[#allocation10 + $0x100] ss:$16 sps:$4 sm:$0xff]   ;;  %p8275_p0 = pnand %p8274_p13, %p8268_p10 }
  0xc4   :  { %262 = vmatpush1.bf16.msra.mxu0 %v7288_v8  ;;  %v7323_v35 = vld [vmem:[#allocation10 + $0x104] ss:$16 sps:$4 sm:$0xff]   ;;  %v7324_v38 = vld [vmem:[#allocation10 + $0x120] ss:$16 sps:$4 sm:$0xff]  }
  0xc5   :  { %263 = vmatprep.subr.bf16.mxu0 %v7289_v9  ;;  %v7326_v37 = vld [vmem:[#allocation10 + $0x124] ss:$16 sps:$4 sm:$0xff]   ;;  %v7327_v40 = vld [vmem:[#allocation10 + $0x140] ss:$16 sps:$4 sm:$0xff]  }
  0xc6   :  { %v7329_v39 = vld [vmem:[#allocation10 + $0x144] ss:$16 sps:$4 sm:$0xff]   ;;  %v7330_v42 = vld [vmem:[#allocation10 + $0x160] ss:$16 sps:$4 sm:$0xff]  }
  0xc7   :  { %v7332_v41 = vld [vmem:[#allocation10 + $0x164] ss:$16 sps:$4 sm:$0xff]   ;;  %v7333_v44 = vld [vmem:[#allocation10 + $0x180] ss:$16 sps:$4 sm:$0xff]  }
  0xc8   :  { %264 = vmatpush1.bf16.msra.mxu0 %v7291_v10  ;;  %v7335_v43 = vld [vmem:[#allocation10 + $0x184] ss:$16 sps:$4 sm:$0xff]   ;;  %v7336_v46 = vld [vmem:[#allocation10 + $0x1a0] ss:$16 sps:$4 sm:$0xff]  }
  0xc9   :  { %265 = vmatprep.subr.bf16.mxu0 %v7292_v11  ;;  %v7338_v45 = vld [vmem:[#allocation10 + $0x1a4] ss:$16 sps:$4 sm:$0xff]   ;;  %v7339_v48 = vld [vmem:[#allocation10 + $0x1c0] ss:$16 sps:$4 sm:$0xff]  }
  0xca   :  { %v7341_v47 = vld [vmem:[#allocation10 + $0x1c4] ss:$16 sps:$4 sm:$0xff]   ;;  %v7342_v50 = vld [vmem:[#allocation10 + $0x1e0] ss:$16 sps:$4 sm:$0xff]  }
  0xcb   :  { %v7344_v49 = vld [vmem:[#allocation10 + $0x1e4] ss:$16 sps:$4 sm:$0xff]  }
  0xcc   :  { %266 = vmatpush1.bf16.msra.mxu0 %v7294_v13  ;;  %v816_v52 = vld [vmem:[#allocation13] sm:$0xff] }
  0xcd   :  { %6325 = vmatprep.subr.msk.bf16.mxu0 %vm248_vm0, %v6324_v14  ;;  %v820_v53 = vld [vmem:[#allocation13 + $0x20] sm:$0xff] }
  0xce   :  { %v6392_v54 = vcombine.high %v816_v52, %v820_v53  ;;  %v6391_v55 = vcombine.low %v816_v52, %v820_v53  ;;  %v824_v56 = vld [vmem:[#allocation13 + $0x40] sm:$0xff] }
  0xcf   :  { %v828_v57 = vld [vmem:[#allocation13 + $0x60] sm:$0xff] }
  0xd0   :  { %268 = vmatpush1.bf16.msra.mxu0 %v250_v17  ;;  %v6400_v58 = vcombine.high %v824_v56, %v828_v57  ;;  %2394 = vmatprep.subr.bf16.mxu1 %v6392_v54  ;;  %v6399_v59 = vcombine.low %v824_v56, %v828_v57  ;;  %v832_v60 = vld [vmem:[#allocation13 + $0x80] sm:$0xff] }
  0xd1   :  { %722 = vmatprep.subr.bf16.mxu0 %v7299_v18  ;;  %2395 = vmatpush1.bf16.msra.mxu1 %v6391_v55  ;;  %v836_v61 = vld [vmem:[#allocation13 + $0xa0] sm:$0xff] }
  0xd2   :  { %2396 = vmatprep.subr.bf16.mxu1 %v6400_v58  ;;  %v6408_v62 = vcombine.high %v832_v60, %v836_v61  ;;  %v6407_v63 = vcombine.low %v832_v60, %v836_v61  ;;  %v840_v0 = vld [vmem:[#allocation13 + $0xc0] sm:$0xff] }
  0xd3   :  { %6326 = vmatmul.mubr.msk.bf16.vlgmr.msra.gmra.mrb[0].mxu0 %vm244_vm1, %v162_v20  ;;  %v844_v1 = vld [vmem:[#allocation13 + $0xe0] sm:$0xff] }
  0xd4   :  { %723 = vmatpush1.bf16.msra.mxu0 %v7297_v19  ;;  %v6416_v2 = vcombine.high %v840_v0, %v844_v1  ;;  %v6415_v3 = vcombine.low %v840_v0, %v844_v1  ;;  %v848_v4 = vld [vmem:[#allocation13 + $0x100] sm:$0xff] }
  0xd5   :  { %724 = vmatprep.subr.bf16.mxu0 %v7302_v21  ;;  %2397 = vmatpush1.bf16.msra.mxu1 %v6399_v59  ;;  %v852_v5 = vld [vmem:[#allocation13 + $0x120] sm:$0xff] }
  0xd6   :  { %2398 = vmatprep.subr.bf16.mxu1 %v6408_v62  ;;  %v6424_v6 = vcombine.high %v848_v4, %v852_v5  ;;  %v6423_v7 = vcombine.low %v848_v4, %v852_v5  ;;  %v856_v8 = vld [vmem:[#allocation13 + $0x140] sm:$0xff]  ;;  %v7350_v5 = vld [vmem:[#allocation10 + $0x2c] ss:$16 sps:$4 sm:$0xff]  }
  0xd7   :  { %v860_v9 = vld [vmem:[#allocation13 + $0x160] sm:$0xff] }
  0xd8   :  { %725 = vmatpush1.bf16.msra.mxu0 %v7300_v22  ;;  %v6432_v10 = vcombine.high %v856_v8, %v860_v9  ;;  %v6431_v11 = vcombine.low %v856_v8, %v860_v9  ;;  %v864_v12 = vld [vmem:[#allocation13 + $0x180] sm:$0xff]  ;;  %v7356_v9 = vld [vmem:[#allocation10 + $0x6c] ss:$16 sps:$4 sm:$0xff]  }
  0xd9   :  { %726 = vmatprep.subr.bf16.mxu0 %v7305_v23  ;;  %2399 = vmatpush1.bf16.msra.mxu1 %v6407_v63  ;;  %v868_v13 = vld [vmem:[#allocation13 + $0x1a0] sm:$0xff] }
  0xda   :  { %2400 = vmatprep.subr.bf16.mxu1 %v6416_v2  ;;  %v6440_v14 = vcombine.high %v864_v12, %v868_v13  ;;  %v6439_v15 = vcombine.low %v864_v12, %v868_v13  ;;  %v872_v16 = vld [vmem:[#allocation13 + $0x1c0] sm:$0xff]  ;;  %v7362_v13 = vld [vmem:[#allocation10 + $0xac] ss:$16 sps:$4 sm:$0xff]  }
  0xdb   :  { %v876_v17 = vld [vmem:[#allocation13 + $0x1e0] sm:$0xff] }
  0xdc   :  { %727 = vmatpush1.bf16.msra.mxu0 %v7303_v24  ;;  %v6448_v18 = vcombine.high %v872_v16, %v876_v17  ;;  %v6447_v19 = vcombine.low %v872_v16, %v876_v17  ;;  %v880_v20 = vld [vmem:[#allocation13 + $0x200] sm:$0xff]  ;;  %v7368_v17 = vld [vmem:[#allocation10 + $0xec] ss:$16 sps:$4 sm:$0xff]  }
  0xdd   :  { %728 = vmatprep.subr.bf16.mxu0 %v7308_v25  ;;  %2401 = vmatpush1.bf16.msra.mxu1 %v6415_v3  ;;  %v884_v21 = vld [vmem:[#allocation13 + $0x220] sm:$0xff] }
  0xde   :  { %2402 = vmatprep.subr.bf16.mxu1 %v6424_v6  ;;  %v6456_v22 = vcombine.high %v880_v20, %v884_v21  ;;  %v6455_v23 = vcombine.low %v880_v20, %v884_v21  ;;  %v888_v24 = vld [vmem:[#allocation13 + $0x240] sm:$0xff]  ;;  %v7374_v21 = vld [vmem:[#allocation10 + $0x12c] ss:$16 sps:$4 sm:$0xff]  }
  0xdf   :  { %v892_v25 = vld [vmem:[#allocation13 + $0x260] sm:$0xff] }
  0xe0   :  { %729 = vmatpush1.bf16.msra.mxu0 %v7306_v26  ;;  %v6464_v26 = vcombine.high %v888_v24, %v892_v25  ;;  %v7345_v3 = vld [vmem:[#allocation10 + $0x8] ss:$16 sps:$4 sm:$0xff]  }
  0xe1   :  { %730 = vmatprep.subr.bf16.mxu0 %v7311_v27  ;;  %2403 = vmatpush1.bf16.msra.mxu1 %v6423_v7  ;;  %v6463_v27 = vcombine.low %v888_v24, %v892_v25  ;;  %v7348_v6 = vld [vmem:[#allocation10 + $0x28] ss:$16 sps:$4 sm:$0xff]   ;;  %v7353_v7 = vld [vmem:[#allocation10 + $0x4c] ss:$16 sps:$4 sm:$0xff]  }
  0xe2   :  { %2404 = vmatprep.subr.bf16.mxu1 %v6432_v10  ;;  %v7351_v8 = vld [vmem:[#allocation10 + $0x48] ss:$16 sps:$4 sm:$0xff]   ;;  %v7380_v25 = vld [vmem:[#allocation10 + $0x16c] ss:$16 sps:$4 sm:$0xff]  }
  0xe3   :  { %v7354_v10 = vld [vmem:[#allocation10 + $0x68] ss:$16 sps:$4 sm:$0xff]  }
  0xe4   :  { %731 = vmatpush1.bf16.msra.mxu0 %v7309_v28  ;;  %v896_v28 = vld [vmem:[#allocation13 + $0x280] sm:$0xff] }
  0xe5   :  { %732 = vmatprep.subr.bf16.mxu0 %v7314_v29  ;;  %2405 = vmatpush1.bf16.msra.mxu1 %v6431_v11  ;;  %v900_v29 = vld [vmem:[#allocation13 + $0x2a0] sm:$0xff]  ;;  %v7359_v11 = vld [vmem:[#allocation10 + $0x8c] ss:$16 sps:$4 sm:$0xff]  }
  0xe6   :  { %2406 = vmatprep.subr.bf16.mxu1 %v6440_v14  ;;  %v7357_v12 = vld [vmem:[#allocation10 + $0x88] ss:$16 sps:$4 sm:$0xff]  }
  0xe7   :  { %v7360_v14 = vld [vmem:[#allocation10 + $0xa8] ss:$16 sps:$4 sm:$0xff]  }
  0xe8   :  { %733 = vmatpush1.bf16.msra.mxu0 %v7312_v30  ;;  %v298_v30 = vlaneseq  ;;  %v7363_v16 = vld [vmem:[#allocation10 + $0xc8] ss:$16 sps:$4 sm:$0xff]  }
  0xe9   :  { %734 = vmatprep.subr.bf16.mxu0 %v7317_v31  ;;  %2407 = vmatpush1.bf16.msra.mxu1 %v6439_v15  ;;  %v6472_v31 = vcombine.high %v896_v28, %v900_v29  ;;  %v7365_v15 = vld [vmem:[#allocation10 + $0xcc] ss:$16 sps:$4 sm:$0xff]   ;;  %v7369_v20 = vld [vmem:[#allocation10 + $0x108] ss:$16 sps:$4 sm:$0xff]  }
  0xea   :  { %2408 = vmatprep.subr.bf16.mxu1 %v6448_v18  ;;  %v7366_v18 = vld [vmem:[#allocation10 + $0xe8] ss:$16 sps:$4 sm:$0xff]  }
  0xeb   :  { %v7375_v24 = vld [vmem:[#allocation10 + $0x148] ss:$16 sps:$4 sm:$0xff]  }
  0xec   :  { %735 = vmatpush1.bf16.msra.mxu0 %v7315_v32  ;;  %v6471_v32 = vcombine.low %v896_v28, %v900_v29  ;;  %v7381_v28 = vld [vmem:[#allocation10 + $0x188] ss:$16 sps:$4 sm:$0xff]   ;;  %v7386_v29 = vld [vmem:[#allocation10 + $0x1ac] ss:$16 sps:$4 sm:$0xff]  }
  0xed   :  { %736 = vmatprep.subr.bf16.mxu0 %v7320_v33  ;;  %2409 = vmatpush1.bf16.msra.mxu1 %v6447_v19  ;;  %v904_v33 = vld [vmem:[#allocation13 + $0x2c0] sm:$0xff]  ;;  %v7371_v19 = vld [vmem:[#allocation10 + $0x10c] ss:$16 sps:$4 sm:$0xff]  }
  0xee   :  { %2410 = vmatprep.subr.bf16.mxu1 %v6456_v22  ;;  %v7372_v22 = vld [vmem:[#allocation10 + $0x128] ss:$16 sps:$4 sm:$0xff]  }
  0xf0   :  { %737 = vmatpush1.bf16.msra.mxu0 %v7318_v34  ;;  %v908_v34 = vld [vmem:[#allocation13 + $0x2e0] sm:$0xff] }
  0xf1   :  { %738 = vmatprep.subr.bf16.mxu0 %v7323_v35  ;;  %2411 = vmatpush1.bf16.msra.mxu1 %v6455_v23  ;;  %v8505_v35 = vshrl.u32 %v298_v30, 7  ;;  %v7377_v23 = vld [vmem:[#allocation10 + $0x14c] ss:$16 sps:$4 sm:$0xff]   ;;  %v7384_v30 = vld [vmem:[#allocation10 + $0x1a8] ss:$16 sps:$4 sm:$0xff]  }
  0xf2   :  { %2412 = vmatprep.subr.bf16.mxu1 %v6464_v26  ;;  %v7378_v26 = vld [vmem:[#allocation10 + $0x168] ss:$16 sps:$4 sm:$0xff]  }
  0xf4   :  { %739 = vmatpush1.bf16.msra.mxu0 %v7321_v36  ;;  %v6480_v36 = vcombine.high %v904_v33, %v908_v34 }
  0xf5   :  { %740 = vmatprep.subr.bf16.mxu0 %v7326_v37  ;;  %2413 = vmatpush1.bf16.msra.mxu1 %v6463_v27  ;;  %v6479_v37 = vcombine.low %v904_v33, %v908_v34  ;;  %v7383_v27 = vld [vmem:[#allocation10 + $0x18c] ss:$16 sps:$4 sm:$0xff]  }
  0xf6   :  { %2414 = vmatprep.subr.bf16.mxu1 %v6472_v31  ;;  %v7389_v31 = vld [vmem:[#allocation10 + $0x1cc] ss:$16 sps:$4 sm:$0xff]  }
  0xf7   :  { %v7392_v33 = vld [vmem:[#allocation10 + $0x1ec] ss:$16 sps:$4 sm:$0xff]  }
  0xf8   :  { %741 = vmatpush1.bf16.msra.mxu0 %v7324_v38  ;;  %v176_v38 = vld [vmem:[#allocation5] sm:$0xff] }
  0xf9   :  { %742 = vmatprep.subr.bf16.mxu0 %v7329_v39  ;;  %2415 = vmatpush1.bf16.msra.mxu1 %v6471_v32  ;;  %v912_v39 = vld [vmem:[#allocation13 + $0x300] sm:$0xff]  ;;  %v817_v34 = vld [vmem:[#allocation13 + $0x8] sm:$0xff] }
  0xfa   :  { %2416 = vmatprep.subr.bf16.mxu1 %v6480_v36  ;;  %v7387_v32 = vld [vmem:[#allocation10 + $0x1c8] ss:$16 sps:$4 sm:$0xff]   ;;  %v821_v36 = vld [vmem:[#allocation13 + $0x28] sm:$0xff] }
  0xfc   :  { %743 = vmatpush1.bf16.msra.mxu0 %v7327_v40  ;;  %v916_v40 = vld [vmem:[#allocation13 + $0x320] sm:$0xff] }
  0xfd   :  { %744 = vmatprep.subr.bf16.mxu0 %v7332_v41  ;;  %v296_v41 = vld [vmem:[#allocation8] sm:$0x3]  ;;  %2417 = vmatpush1.bf16.msra.mxu1 %v6479_v37  ;;  %v7390_v37 = vld [vmem:[#allocation10 + $0x1e8] ss:$16 sps:$4 sm:$0xff]  }
 0x100   :  { %745 = vmatpush1.bf16.msra.mxu0 %v7330_v42  ;;  %v8508_v42 = vsub.s32 0, %v8505_v35 }
 0x101   :  { %746 = vmatprep.subr.bf16.mxu0 %v7335_v43  ;;  %v6488_v43 = vcombine.high %v912_v39, %v916_v40 }
 0x103   :  { %2418 = vmatprep.subr.bf16.mxu1 %v6488_v43 }
 0x104   :  { %747 = vmatpush1.bf16.msra.mxu0 %v7333_v44  ;;  %v8511_v44 = vsub.s32 1, %v8505_v35 }
 0x105   :  { %748 = vmatprep.subr.bf16.mxu0 %v7338_v45  ;;  %v177_v45 = vunpack.c.l.bf16 %v176_v38 }
 0x106   :  { %v305_v53 = vrot.slane %v296_v41, %v8511_v44 }
 0x108   :  { %749 = vmatpush1.bf16.msra.mxu0 %v7336_v46  ;;  %v6487_v46 = vcombine.low %v912_v39, %v916_v40  ;;  %v825_v39 = vld [vmem:[#allocation13 + $0x48] sm:$0xff] }
 0x109   :  { %750 = vmatprep.subr.bf16.mxu0 %v7341_v47  ;;  %v178_v47 = vunpack.c.h.bf16 %v176_v38  ;;  %v6394_v38 = vcombine.high %v817_v34, %v821_v36  ;;  %v829_v40 = vld [vmem:[#allocation13 + $0x68] sm:$0xff] }
 0x10a   :  { %2419 = vmatpush1.bf16.msra.mxu1 %v6487_v46  ;;  %v6402_v43 = vcombine.high %v825_v39, %v829_v40  ;;  %v837_v46 = vld [vmem:[#allocation13 + $0xa8] sm:$0xff] }
 0x10c   :  { %751 = vmatpush1.bf16.msra.mxu0 %v7339_v48  ;;  %v920_v48 = vld [vmem:[#allocation13 + $0x340] sm:$0xff] }
 0x10d   :  { %752 = vmatprep.subr.bf16.mxu0 %v7344_v49  ;;  %v924_v49 = vld [vmem:[#allocation13 + $0x360] sm:$0xff] }
 0x10e   :  { %v6495_v56 = vcombine.low %v920_v48, %v924_v49 }
 0x110   :  { %753 = vmatpush1.bf16.msra.mxu0 %v7342_v50  ;;  %v301_v50 = vrot.slane %v296_v41, %v8508_v42  ;;  %v6393_v41 = vcombine.low %v817_v34, %v821_v36 }
 0x111   :  { %763 = vmatprep.subr.bf16.mxu0 %v7347_v51  ;;  %v6496_v51 = vcombine.high %v920_v48, %v924_v49  ;;  %v841_v49 = vld [vmem:[#allocation13 + $0xc8] sm:$0xff] }
 0x113   :  { %2420 = vmatprep.subr.bf16.mxu1 %v6496_v51 }
 0x114   :  { %2421 = vmatpush1.bf16.msra.mxu1 %v6495_v56 }
 0x1a6   :  { %v289_v52 = vpop.f32.mrb[0].mxu0 }
 0x1a7   :  { %v290_v54 = vadd.f32 %v289_v52, %v177_v45  ;;  %v291_v55 = vpop.f32.mrb[1].mxu0  ;;  %v833_v45 = vld [vmem:[#allocation13 + $0x88] sm:$0xff] }
 0x1a8   :  { %v292_v57 = vadd.f32 %v291_v55, %v178_v47  ;;  %v293_v58 = vpop.f32.mrb[2].mxu0  ;;  %v6401_v47 = vcombine.low %v825_v39, %v829_v40  ;;  %v6410_v48 = vcombine.high %v833_v45, %v837_v46  ;;  %v6409_v51 = vcombine.low %v833_v45, %v837_v46 }
 0x1a9   :  { %v308_v59 = vadd.f32 %v301_v50, %v290_v54  ;;  %v294_v60 = vpop.f32.mrb[3].mxu0  ;;  %v845_v50 = vld [vmem:[#allocation13 + $0xe8] sm:$0xff] }
 0x1aa   :  { %v309_v61 = vadd.f32 %v305_v53, %v292_v57  ;;  %v6418_v52 = vcombine.high %v841_v49, %v845_v50  ;;  %v849_v53 = vld [vmem:[#allocation13 + $0x108] sm:$0xff]  ;;  %v6417_v55 = vcombine.low %v841_v49, %v845_v50 }
 0x1ab   :  { %v310_v62 = vmul.f32 0.2, %v308_v59  ;;  %v853_v54 = vld [vmem:[#allocation13 + $0x128] sm:$0xff] }
 0x1ac   :  { %v311_v63 = vmul.f32 0.2, %v309_v61  ;;  %v6426_v56 = vcombine.high %v849_v53, %v853_v54  ;;  %v857_v57 = vld [vmem:[#allocation13 + $0x148] sm:$0xff] }
 0x1ad   :  { %v312_v0 = vmax.f32 %v308_v59, %v310_v62  ;;  %v861_v58 = vld [vmem:[#allocation13 + $0x168] sm:$0xff]  ;;  %v6425_v59 = vcombine.low %v849_v53, %v853_v54 }
 0x1ae   :  { %v313_v1 = vmax.f32 %v309_v61, %v311_v63  ;;  %v6434_v60 = vcombine.high %v857_v57, %v861_v58  ;;  %v865_v61 = vld [vmem:[#allocation13 + $0x188] sm:$0xff]  ;;  %v6433_v63 = vcombine.low %v857_v57, %v861_v58  ;;  %v8535_v57 = vld [vmem:[#allocation11] sm:$0xf] }
 0x1af   :  { %v8515_v4 = vpack.c.bf16 %v312_v0, %v312_v0  ;;  %v869_v62 = vld [vmem:[#allocation13 + $0x1a8] sm:$0xff]  ;;  %v385_v58 = vrot.slane %v8535_v57, %v8508_v42 }
 0x1b0   :  { %v315_v2 = vpack.c.bf16 %v313_v1, %v313_v1  ;;  %v6442_v0 = vcombine.high %v865_v61, %v869_v62  ;;  %v873_v1 = vld [vmem:[#allocation13 + $0x1c8] sm:$0xff] }
 0x1b2   :  { %754 = vmatprep.mubr.bf16.mxu0 %v315_v2 }
 0x1b3   :  { %755 = vmatmul.mubr.bf16.vlgmr.msra.gmra.mrb[4].mxu0 %v8515_v4 }
 0x1b4   :  { %764 = vmatpush1.bf16.msra.mxu0 %v7345_v3  ;;  %795 = vmatprep.mubr.bf16.mxu0 %v315_v2  ;;  %v877_v2 = vld [vmem:[#allocation13 + $0x1e8] sm:$0xff]  ;;  %v928_v3 = vld [vmem:[#allocation13 + $0x380] sm:$0xff] }
 0x1b5   :  { %765 = vmatprep.subr.bf16.mxu0 %v7350_v5 }
 0x1b8   :  { %766 = vmatpush1.bf16.msra.mxu0 %v7348_v6  ;;  %v6441_v6 = vcombine.low %v865_v61, %v869_v62 }
 0x1b9   :  { %767 = vmatprep.subr.bf16.mxu0 %v7353_v7 }
 0x1bc   :  { %768 = vmatpush1.bf16.msra.mxu0 %v7351_v8  ;;  %v6450_v8 = vcombine.high %v873_v1, %v877_v2 }
 0x1bd   :  { %769 = vmatprep.subr.bf16.mxu0 %v7356_v9  ;;  %v881_v9 = vld [vmem:[#allocation13 + $0x208] sm:$0xff] }
 0x1c0   :  { %770 = vmatpush1.bf16.msra.mxu0 %v7354_v10  ;;  %v885_v10 = vld [vmem:[#allocation13 + $0x228] sm:$0xff] }
 0x1c1   :  { %771 = vmatprep.subr.bf16.mxu0 %v7359_v11  ;;  %v936_v11 = vld [vmem:[#allocation13 + $0x3c0] sm:$0xff] }
 0x1c4   :  { %772 = vmatpush1.bf16.msra.mxu0 %v7357_v12  ;;  %v940_v12 = vld [vmem:[#allocation13 + $0x3e0] sm:$0xff] }
 0x1c5   :  { %773 = vmatprep.subr.bf16.mxu0 %v7362_v13  ;;  %v6512_v13 = vcombine.high %v936_v11, %v940_v12 }
 0x1c8   :  { %774 = vmatpush1.bf16.msra.mxu0 %v7360_v14  ;;  %v6449_v14 = vcombine.low %v873_v1, %v877_v2 }
 0x1c9   :  { %775 = vmatprep.subr.bf16.mxu0 %v7365_v15  ;;  %v6511_v15 = vcombine.low %v936_v11, %v940_v12 }
 0x1cc   :  { %776 = vmatpush1.bf16.msra.mxu0 %v7363_v16  ;;  %v6458_v16 = vcombine.high %v881_v9, %v885_v10 }
 0x1cd   :  { %777 = vmatprep.subr.bf16.mxu0 %v7368_v17  ;;  %v889_v17 = vld [vmem:[#allocation13 + $0x248] sm:$0xff] }
 0x1d0   :  { %778 = vmatpush1.bf16.msra.mxu0 %v7366_v18  ;;  %v893_v18 = vld [vmem:[#allocation13 + $0x268] sm:$0xff] }
 0x1d1   :  { %779 = vmatprep.subr.bf16.mxu0 %v7371_v19  ;;  %v8519_v19 = vld [vmem:[#allocation13 + $0x400] sm:$0xff] }
 0x1d4   :  { %780 = vmatpush1.bf16.msra.mxu0 %v7369_v20  ;;  %v8521_v20 = vld [vmem:[#allocation13 + $0x420] sm:$0xff] }
 0x1d5   :  { %781 = vmatprep.subr.bf16.mxu0 %v7374_v21  ;;  %v8523_v21 = vld [vmem:[#allocation13 + $0x408] sm:$0xff] }
 0x1d8   :  { %782 = vmatpush1.bf16.msra.mxu0 %v7372_v22  ;;  %v6520_v22 = vcombine.high %v8519_v19, %v8521_v20 }
 0x1d9   :  { %783 = vmatprep.subr.bf16.mxu0 %v7377_v23  ;;  %v8527_v23 = vld [vmem:[#allocation13 + $0x428] sm:$0xff] }
 0x1dc   :  { %784 = vmatpush1.bf16.msra.mxu0 %v7375_v24  ;;  %v6457_v24 = vcombine.low %v881_v9, %v885_v10  ;;  %v957_v9 = vld [vmem:[#allocation13 + $0x468] sm:$0xff] }
 0x1dd   :  { %785 = vmatprep.subr.bf16.mxu0 %v7380_v25  ;;  %v6519_v25 = vcombine.low %v8519_v19, %v8521_v20 }
 0x1e0   :  { %786 = vmatpush1.bf16.msra.mxu0 %v7378_v26  ;;  %v6521_v26 = vcombine.low %v8523_v21, %v8527_v23 }
 0x1e1   :  { %787 = vmatprep.subr.bf16.mxu0 %v7383_v27  ;;  %v6466_v27 = vcombine.high %v889_v17, %v893_v18 }
 0x1e4   :  { %788 = vmatpush1.bf16.msra.mxu0 %v7381_v28  ;;  %v897_v28 = vld [vmem:[#allocation13 + $0x288] sm:$0xff] }
 0x1e5   :  { %789 = vmatprep.subr.bf16.mxu0 %v7386_v29  ;;  %v901_v29 = vld [vmem:[#allocation13 + $0x2a8] sm:$0xff] }
 0x1e6   :  { %v6473_v34 = vcombine.low %v897_v28, %v901_v29 }
 0x1e8   :  { %790 = vmatpush1.bf16.msra.mxu0 %v7384_v30  ;;  %v6465_v30 = vcombine.low %v889_v17, %v893_v18  ;;  %v965_v17 = vld [vmem:[#allocation13 + $0x4a8] sm:$0xff] }
 0x1e9   :  { %791 = vmatprep.subr.bf16.mxu0 %v7389_v31  ;;  %v6474_v31 = vcombine.high %v897_v28, %v901_v29  ;;  %v968_v28 = vld [vmem:[#allocation13 + $0x4c0] sm:$0xff] }
 0x1ea   :  { %v972_v29 = vld [vmem:[#allocation13 + $0x4e0] sm:$0xff] }
 0x1eb   :  { %v6544_v19 = vcombine.high %v968_v28, %v972_v29 }
 0x1ec   :  { %792 = vmatpush1.bf16.msra.mxu0 %v7387_v32  ;;  %v905_v32 = vld [vmem:[#allocation13 + $0x2c8] sm:$0xff] }
 0x1ed   :  { %793 = vmatprep.subr.bf16.mxu0 %v7392_v33  ;;  %v909_v33 = vld [vmem:[#allocation13 + $0x2e8] sm:$0xff] }
 0x1ee   :  { %v6482_v36 = vcombine.high %v905_v32, %v909_v33  ;;  %v6481_v39 = vcombine.low %v905_v32, %v909_v33 }
 0x1f0   :  { %794 = vmatpush1.bf16.msra.mxu0 %v7390_v37  ;;  %v913_v37 = vld [vmem:[#allocation13 + $0x308] sm:$0xff] }
 0x1f1   :  { %2476 = vmatprep.subr.bf16.mxu0 %v6394_v38  ;;  %v917_v38 = vld [vmem:[#allocation13 + $0x328] sm:$0xff] }
 0x1f2   :  { %v6490_v40 = vcombine.high %v913_v37, %v917_v38  ;;  %v6489_v45 = vcombine.low %v913_v37, %v917_v38 }
 0x1f3   :  { %796 = vmatmul.mubr.bf16.vlgmr.msra.gmra.mrb[8].mxu0 %v8515_v4  ;;  %v932_v4 = vld [vmem:[#allocation13 + $0x3a0] sm:$0xff] }
 0x1f4   :  { %2477 = vmatpush1.bf16.msra.mxu0 %v6393_v41  ;;  %v6504_v5 = vcombine.high %v928_v3, %v932_v4  ;;  %v6503_v7 = vcombine.low %v928_v3, %v932_v4  ;;  %v921_v41 = vld [vmem:[#allocation13 + $0x348] sm:$0xff] }
 0x1f5   :  { %2478 = vmatprep.subr.bf16.mxu0 %v6402_v43  ;;  %v925_v43 = vld [vmem:[#allocation13 + $0x368] sm:$0xff] }
 0x1f6   :  { %2422 = vmatprep.subr.bf16.mxu1 %v6504_v5  ;;  %v6498_v46 = vcombine.high %v921_v41, %v925_v43  ;;  %v6497_v49 = vcombine.low %v921_v41, %v925_v43  ;;  %v952_v5 = vld [vmem:[#allocation13 + $0x440] sm:$0xff]  ;;  %v985_v41 = vld [vmem:[#allocation13 + $0x548] sm:$0xff] }
 0x1f7   :  { %2423 = vmatpush1.bf16.msra.mxu1 %v6503_v7  ;;  %v956_v7 = vld [vmem:[#allocation13 + $0x460] sm:$0xff]  ;;  %v989_v43 = vld [vmem:[#allocation13 + $0x568] sm:$0xff] }
 0x1f8   :  { %2479 = vmatpush1.bf16.msra.mxu0 %v6401_v47  ;;  %2424 = vmatprep.subr.bf16.mxu1 %v6512_v13  ;;  %v929_v47 = vld [vmem:[#allocation13 + $0x388] sm:$0xff]  ;;  %v6528_v12 = vcombine.high %v952_v5, %v956_v7  ;;  %v6527_v18 = vcombine.low %v952_v5, %v956_v7 }
 0x1f9   :  { %2480 = vmatprep.subr.bf16.mxu0 %v6410_v48  ;;  %v933_v48 = vld [vmem:[#allocation13 + $0x3a8] sm:$0xff] }
 0x1fa   :  { %v6506_v50 = vcombine.high %v929_v47, %v933_v48  ;;  %v6505_v53 = vcombine.low %v929_v47, %v933_v48  ;;  %v6562_v48 = vcombine.high %v985_v41, %v989_v43  ;;  %v1013_v5 = vld [vmem:[#allocation13 + $0x628] sm:$0xff] }
 0x1fb   :  { %2425 = vmatpush1.bf16.msra.mxu1 %v6511_v15  ;;  %v964_v15 = vld [vmem:[#allocation13 + $0x4a0] sm:$0xff] }
 0x1fc   :  { %2481 = vmatpush1.bf16.msra.mxu0 %v6409_v51  ;;  %2435 = vmatprep.subr.bf16.mxu1 %v6520_v22  ;;  %v937_v51 = vld [vmem:[#allocation13 + $0x3c8] sm:$0xff] }
 0x1fd   :  { %2482 = vmatprep.subr.bf16.mxu0 %v6418_v52  ;;  %v941_v52 = vld [vmem:[#allocation13 + $0x3e8] sm:$0xff] }
 0x1fe   :  { %v6514_v54 = vcombine.high %v937_v51, %v941_v52 }
 0x200   :  { %2483 = vmatpush1.bf16.msra.mxu0 %v6417_v55  ;;  %v6513_v55 = vcombine.low %v937_v51, %v941_v52  ;;  %v993_v51 = vld [vmem:[#allocation13 + $0x588] sm:$0xff] }
 0x201   :  { %2484 = vmatprep.subr.bf16.mxu0 %v6426_v56  ;;  %v6522_v56 = vcombine.high %v8523_v21, %v8527_v23  ;;  %v976_v21 = vld [vmem:[#allocation13 + $0x500] sm:$0xff]  ;;  %v997_v52 = vld [vmem:[#allocation13 + $0x5a8] sm:$0xff] }
 0x202   :  { %v980_v23 = vld [vmem:[#allocation13 + $0x520] sm:$0xff] }
 0x203   :  { %v6552_v37 = vcombine.high %v976_v21, %v980_v23 }
 0x204   :  { %2485 = vmatpush1.bf16.msra.mxu0 %v6425_v59  ;;  %v389_v59 = vrot.slane %v8535_v57, %v8511_v44 }
 0x205   :  { %2486 = vmatprep.subr.bf16.mxu0 %v6434_v60 }
 0x208   :  { %2487 = vmatpush1.bf16.msra.mxu0 %v6433_v63 }
 0x209   :  { %2488 = vmatprep.subr.bf16.mxu0 %v6442_v0 }
 0x20c   :  { %2489 = vmatpush1.bf16.msra.mxu0 %v6441_v6 }
 0x20d   :  { %2490 = vmatprep.subr.bf16.mxu0 %v6450_v8  ;;  %v953_v8 = vld [vmem:[#allocation13 + $0x448] sm:$0xff] }
 0x20e   :  { %v6530_v13 = vcombine.high %v953_v8, %v957_v9  ;;  %v6529_v22 = vcombine.low %v953_v8, %v957_v9 }
 0x210   :  { %2491 = vmatpush1.bf16.msra.mxu0 %v6449_v14  ;;  %v960_v14 = vld [vmem:[#allocation13 + $0x480] sm:$0xff] }
 0x211   :  { %2492 = vmatprep.subr.bf16.mxu0 %v6458_v16  ;;  %v961_v16 = vld [vmem:[#allocation13 + $0x488] sm:$0xff]  ;;  %v6535_v32 = vcombine.low %v960_v14, %v964_v15 }
 0x212   :  { %v6537_v33 = vcombine.low %v961_v16, %v965_v17 }
 0x214   :  { %2493 = vmatpush1.bf16.msra.mxu0 %v6457_v24  ;;  %v6536_v24 = vcombine.high %v960_v14, %v964_v15  ;;  %v1017_v14 = vld [vmem:[#allocation13 + $0x648] sm:$0xff] }
 0x215   :  { %2494 = vmatprep.subr.bf16.mxu0 %v6466_v27  ;;  %v6538_v27 = vcombine.high %v961_v16, %v965_v17  ;;  %v1021_v15 = vld [vmem:[#allocation13 + $0x668] sm:$0xff] }
 0x218   :  { %2495 = vmatpush1.bf16.msra.mxu0 %v6465_v30  ;;  %v969_v30 = vld [vmem:[#allocation13 + $0x4c8] sm:$0xff] }
 0x219   :  { %2496 = vmatprep.subr.bf16.mxu0 %v6474_v31  ;;  %v973_v31 = vld [vmem:[#allocation13 + $0x4e8] sm:$0xff] }
 0x21a   :  { %v6546_v20 = vcombine.high %v969_v30, %v973_v31 }
 0x21c   :  { %2497 = vmatpush1.bf16.msra.mxu0 %v6473_v34  ;;  %v6543_v34 = vcombine.low %v968_v28, %v972_v29  ;;  %v1025_v28 = vld [vmem:[#allocation13 + $0x688] sm:$0xff] }
 0x21d   :  { %2498 = vmatprep.subr.bf16.mxu0 %v6482_v36  ;;  %v6545_v36 = vcombine.low %v969_v30, %v973_v31  ;;  %v1029_v29 = vld [vmem:[#allocation13 + $0x6a8] sm:$0xff]  ;;  %v6593_v31 = vcombine.low %v1017_v14, %v1021_v15 }
 0x220   :  { %2499 = vmatpush1.bf16.msra.mxu0 %v6481_v39  ;;  %v984_v39 = vld [vmem:[#allocation13 + $0x540] sm:$0xff] }
 0x221   :  { %2500 = vmatprep.subr.bf16.mxu0 %v6490_v40  ;;  %v988_v40 = vld [vmem:[#allocation13 + $0x560] sm:$0xff] }
 0x222   :  { %v6560_v47 = vcombine.high %v984_v39, %v988_v40 }
 0x224   :  { %2501 = vmatpush1.bf16.msra.mxu0 %v6489_v45  ;;  %v6551_v45 = vcombine.low %v976_v21, %v980_v23  ;;  %v1033_v21 = vld [vmem:[#allocation13 + $0x6c8] sm:$0xff] }
 0x225   :  { %2502 = vmatprep.subr.bf16.mxu0 %v6498_v46  ;;  %v1037_v23 = vld [vmem:[#allocation13 + $0x6e8] sm:$0xff] }
 0x228   :  { %2503 = vmatpush1.bf16.msra.mxu0 %v6497_v49  ;;  %v992_v49 = vld [vmem:[#allocation13 + $0x580] sm:$0xff] }
 0x229   :  { %2504 = vmatprep.subr.bf16.mxu0 %v6506_v50  ;;  %v996_v50 = vld [vmem:[#allocation13 + $0x5a0] sm:$0xff] }
 0x22c   :  { %2505 = vmatpush1.bf16.msra.mxu0 %v6505_v53  ;;  %v6559_v53 = vcombine.low %v984_v39, %v988_v40  ;;  %v1041_v39 = vld [vmem:[#allocation13 + $0x708] sm:$0xff] }
 0x22d   :  { %2506 = vmatprep.subr.bf16.mxu0 %v6514_v54  ;;  %v6561_v54 = vcombine.low %v985_v41, %v989_v43  ;;  %v1045_v40 = vld [vmem:[#allocation13 + $0x728] sm:$0xff]  ;;  %v6609_v43 = vcombine.low %v1033_v21, %v1037_v23 }
 0x230   :  { %2507 = vmatpush1.bf16.msra.mxu0 %v6513_v55  ;;  %v6568_v55 = vcombine.high %v992_v49, %v996_v50 }
 0x231   :  { %2517 = vmatprep.subr.bf16.mxu0 %v6522_v56  ;;  %v6570_v56 = vcombine.high %v993_v51, %v997_v52 }
 0x286   :  { %v756_v60 = vpop.f32.mrb[4].mxu0 }
 0x287   :  { %v757_v61 = vadd.f32 %v756_v60, %v385_v58  ;;  %v758_v62 = vpop.f32.mrb[5].mxu0  ;;  %v1000_v58 = vld [vmem:[#allocation13 + $0x5c0] sm:$0xff]  ;;  %v1001_v60 = vld [vmem:[#allocation13 + $0x5c8] sm:$0xff] }
 0x288   :  { %v759_v63 = vadd.f32 %v758_v62, %v389_v59  ;;  %v760_v0 = vpop.f32.mrb[6].mxu0  ;;  %v1004_v59 = vld [vmem:[#allocation13 + $0x5e0] sm:$0xff]  ;;  %v6567_v62 = vcombine.low %v992_v49, %v996_v50  ;;  %v1049_v49 = vld [vmem:[#allocation13 + $0x748] sm:$0xff] }
 0x289   :  { %v804_v1 = vmul.f32 0.2, %v757_v61  ;;  %v761_v2 = vpop.f32.mrb[7].mxu0  ;;  %v6576_v0 = vcombine.high %v1000_v58, %v1004_v59  ;;  %v1053_v50 = vld [vmem:[#allocation13 + $0x768] sm:$0xff] }
 0x28a   :  { %v805_v3 = vmul.f32 0.2, %v759_v63  ;;  %v1008_v2 = vld [vmem:[#allocation13 + $0x600] sm:$0xff] }
 0x28b   :  { %v808_v4 = vmax.f32 %v757_v61, %v804_v1  ;;  %v1005_v61 = vld [vmem:[#allocation13 + $0x5e8] sm:$0xff] }
 0x28c   :  { %v809_v6 = vmax.f32 %v759_v63, %v805_v3  ;;  %v6569_v63 = vcombine.low %v993_v51, %v997_v52  ;;  %v6578_v1 = vcombine.high %v1001_v60, %v1005_v61  ;;  %v1012_v3 = vld [vmem:[#allocation13 + $0x620] sm:$0xff]  ;;  %v6577_v7 = vcombine.low %v1001_v60, %v1005_v61  ;;  %v1057_v60 = vld [vmem:[#allocation13 + $0x788] sm:$0xff] }
 0x28d   :  { %v8543_v11 = vpack.c.bf16 %v808_v4, %v808_v4  ;;  %v1009_v4 = vld [vmem:[#allocation13 + $0x608] sm:$0xff]  ;;  %v6584_v8 = vcombine.high %v1008_v2, %v1012_v3  ;;  %v6583_v16 = vcombine.low %v1008_v2, %v1012_v3  ;;  %v6617_v52 = vcombine.low %v1041_v39, %v1045_v40  ;;  %v1064_v3 = vld [vmem:[#allocation13 + $0x7c0] sm:$0xff] }
 0x28e   :  { %v8541_v10 = vpack.c.bf16 %v809_v6, %v809_v6  ;;  %v6575_v6 = vcombine.low %v1000_v58, %v1004_v59  ;;  %v6586_v9 = vcombine.high %v1009_v4, %v1013_v5  ;;  %v6585_v17 = vcombine.low %v1009_v4, %v1013_v5  ;;  %v1060_v59 = vld [vmem:[#allocation13 + $0x7a0] sm:$0xff]  ;;  %v1061_v61 = vld [vmem:[#allocation13 + $0x7a8] sm:$0xff] }
 0x28f   :  { %v8559_v58 = vsub.s32 3, %v8505_v35  ;;  %v6634_v2 = vcombine.high %v1057_v60, %v1061_v61  ;;  %v1068_v5 = vld [vmem:[#allocation13 + $0x7e0] sm:$0xff] }
 0x290   :  { %2426 = vmatprep.mubr.bf16.mxu1 %v8541_v10  ;;  %2508 = vmatprep.mubr.bf16.mxu0 %v8541_v10 }
 0x291   :  { %2427 = vmatmul.mubr.bf16.vlgmr.msra.gmra.mrb[0].mxu1 %v8543_v11  ;;  %2509 = vmatmul.mubr.bf16.vlgmr.msra.gmra.mrb[12].mxu0 %v8543_v11  ;;  %v397_v4 = vrot.slane %v8535_v57, %v8559_v58 }
 0x292   :  { %2436 = vmatpush1.bf16.msra.mxu1 %v6519_v25  ;;  %2518 = vmatpush1.bf16.msra.mxu0 %v6521_v26  ;;  %v977_v25 = vld [vmem:[#allocation13 + $0x508] sm:$0xff] }
 0x293   :  { %2437 = vmatprep.subr.bf16.mxu1 %v6528_v12  ;;  %2519 = vmatprep.subr.bf16.mxu0 %v6530_v13  ;;  %v981_v26 = vld [vmem:[#allocation13 + $0x528] sm:$0xff]  ;;  %v1016_v12 = vld [vmem:[#allocation13 + $0x640] sm:$0xff] }
 0x294   :  { %v6554_v38 = vcombine.high %v977_v25, %v981_v26  ;;  %v6553_v46 = vcombine.low %v977_v25, %v981_v26  ;;  %v1020_v13 = vld [vmem:[#allocation13 + $0x660] sm:$0xff]  ;;  %v6601_v26 = vcombine.low %v1025_v28, %v1029_v29 }
 0x295   :  { %v6591_v30 = vcombine.low %v1016_v12, %v1020_v13 }
 0x296   :  { %2438 = vmatpush1.bf16.msra.mxu1 %v6527_v18  ;;  %2520 = vmatpush1.bf16.msra.mxu0 %v6529_v22  ;;  %v6592_v18 = vcombine.high %v1016_v12, %v1020_v13  ;;  %v6594_v22 = vcombine.high %v1017_v14, %v1021_v15  ;;  %v6633_v12 = vcombine.low %v1057_v60, %v1061_v61 }
 0x297   :  { %2439 = vmatprep.subr.bf16.mxu1 %v6536_v24  ;;  %2521 = vmatprep.subr.bf16.mxu0 %v6538_v27  ;;  %v1024_v24 = vld [vmem:[#allocation13 + $0x680] sm:$0xff]  ;;  %v6640_v15 = vcombine.high %v1064_v3, %v1068_v5 }
 0x298   :  { %v1028_v27 = vld [vmem:[#allocation13 + $0x6a0] sm:$0xff] }
 0x299   :  { %v6599_v25 = vcombine.low %v1024_v24, %v1028_v27 }
 0x29a   :  { %2440 = vmatpush1.bf16.msra.mxu1 %v6535_v32  ;;  %2522 = vmatpush1.bf16.msra.mxu0 %v6537_v33  ;;  %v6600_v32 = vcombine.high %v1024_v24, %v1028_v27  ;;  %v6602_v33 = vcombine.high %v1025_v28, %v1029_v29  ;;  %v822_v24 = vld [vmem:[#allocation13 + $0x30] sm:$0xff]  ;;  %v819_v27 = vld [vmem:[#allocation13 + $0x18] sm:$0xff] }
 0x29b   :  { %2441 = vmatprep.subr.bf16.mxu1 %v6544_v19  ;;  %2523 = vmatprep.subr.bf16.mxu0 %v6546_v20  ;;  %v1032_v19 = vld [vmem:[#allocation13 + $0x6c0] sm:$0xff] }
 0x29c   :  { %v1036_v20 = vld [vmem:[#allocation13 + $0x6e0] sm:$0xff] }
 0x29d   :  { %v6607_v41 = vcombine.low %v1032_v19, %v1036_v20 }
 0x29e   :  { %2442 = vmatpush1.bf16.msra.mxu1 %v6543_v34  ;;  %2524 = vmatpush1.bf16.msra.mxu0 %v6545_v36  ;;  %v6608_v34 = vcombine.high %v1032_v19, %v1036_v20  ;;  %v6610_v36 = vcombine.high %v1033_v21, %v1037_v23  ;;  %v826_v23 = vld [vmem:[#allocation13 + $0x50] sm:$0xff] }
 0x29f   :  { %2443 = vmatprep.subr.bf16.mxu1 %v6552_v37  ;;  %2525 = vmatprep.subr.bf16.mxu0 %v6554_v38  ;;  %v1040_v37 = vld [vmem:[#allocation13 + $0x700] sm:$0xff] }
 0x2a0   :  { %v1044_v38 = vld [vmem:[#allocation13 + $0x720] sm:$0xff] }
 0x2a1   :  { %v6615_v51 = vcombine.low %v1040_v37, %v1044_v38 }
 0x2a2   :  { %2444 = vmatpush1.bf16.msra.mxu1 %v6551_v45  ;;  %2526 = vmatpush1.bf16.msra.mxu0 %v6553_v46  ;;  %v6616_v45 = vcombine.high %v1040_v37, %v1044_v38  ;;  %v6618_v46 = vcombine.high %v1041_v39, %v1045_v40 }
 0x2a3   :  { %2445 = vmatprep.subr.bf16.mxu1 %v6560_v47  ;;  %2527 = vmatprep.subr.bf16.mxu0 %v6562_v48  ;;  %v1048_v47 = vld [vmem:[#allocation13 + $0x740] sm:$0xff] }
 0x2a4   :  { %v1052_v48 = vld [vmem:[#allocation13 + $0x760] sm:$0xff] }
 0x2a6   :  { %2446 = vmatpush1.bf16.msra.mxu1 %v6559_v53  ;;  %2528 = vmatpush1.bf16.msra.mxu0 %v6561_v54  ;;  %v6624_v53 = vcombine.high %v1048_v47, %v1052_v48  ;;  %v6626_v54 = vcombine.high %v1049_v49, %v1053_v50 }
 0x2a7   :  { %2447 = vmatprep.subr.bf16.mxu1 %v6568_v55  ;;  %2529 = vmatprep.subr.bf16.mxu0 %v6570_v56  ;;  %v8556_v55 = vsub.s32 2, %v8505_v35  ;;  %v1056_v56 = vld [vmem:[#allocation13 + $0x780] sm:$0xff] }
 0x2aa   :  { %2448 = vmatpush1.bf16.msra.mxu1 %v6567_v62  ;;  %2530 = vmatpush1.bf16.msra.mxu0 %v6569_v63  ;;  %v6623_v62 = vcombine.low %v1048_v47, %v1052_v48  ;;  %v6625_v63 = vcombine.low %v1049_v49, %v1053_v50  ;;  %v839_v47 = vld [vmem:[#allocation13 + $0xb8] sm:$0xff] }
 0x2ab   :  { %2449 = vmatprep.subr.bf16.mxu1 %v6576_v0  ;;  %2531 = vmatprep.subr.bf16.mxu0 %v6578_v1  ;;  %v393_v0 = vrot.slane %v8535_v57, %v8556_v55  ;;  %v6632_v1 = vcombine.high %v1056_v56, %v1060_v59  ;;  %v823_v57 = vld [vmem:[#allocation13 + $0x38] sm:$0xff] }
 0x2ac   :  { %v6398_v20 = vcombine.high %v819_v27, %v823_v57  ;;  %v6397_v39 = vcombine.low %v819_v27, %v823_v57 }
 0x2ae   :  { %2450 = vmatpush1.bf16.msra.mxu1 %v6575_v6  ;;  %2532 = vmatpush1.bf16.msra.mxu0 %v6577_v7  ;;  %v1065_v6 = vld [vmem:[#allocation13 + $0x7c8] sm:$0xff] }
 0x2af   :  { %2451 = vmatprep.subr.bf16.mxu1 %v6584_v8  ;;  %2533 = vmatprep.subr.bf16.mxu0 %v6586_v9  ;;  %v1069_v7 = vld [vmem:[#allocation13 + $0x7e8] sm:$0xff]  ;;  %v6631_v9 = vcombine.low %v1056_v56, %v1060_v59  ;;  %v847_v56 = vld [vmem:[#allocation13 + $0xf8] sm:$0xff] }
 0x2b2   :  { %2452 = vmatpush1.bf16.msra.mxu1 %v6583_v16  ;;  %2534 = vmatpush1.bf16.msra.mxu0 %v6585_v17  ;;  %v6642_v16 = vcombine.high %v1065_v6, %v1069_v7  ;;  %v818_v17 = vld [vmem:[#allocation13 + $0x10] sm:$0xff] }
 0x2b3   :  { %2453 = vmatprep.subr.bf16.mxu1 %v6592_v18  ;;  %2535 = vmatprep.subr.bf16.mxu0 %v6594_v22  ;;  %v6396_v19 = vcombine.high %v818_v17, %v822_v24  ;;  %v6395_v37 = vcombine.low %v818_v17, %v822_v24  ;;  %v870_v17 = vld [vmem:[#allocation13 + $0x1b0] sm:$0xff] }
 0x2b6   :  { %2454 = vmatpush1.bf16.msra.mxu1 %v6591_v30  ;;  %2536 = vmatpush1.bf16.msra.mxu0 %v6593_v31  ;;  %v6639_v31 = vcombine.low %v1064_v3, %v1068_v5 }
 0x2b7   :  { %2455 = vmatprep.subr.bf16.mxu1 %v6600_v32  ;;  %2537 = vmatprep.subr.bf16.mxu0 %v6602_v33  ;;  %v6641_v32 = vcombine.low %v1065_v6, %v1069_v7  ;;  %v858_v6 = vld [vmem:[#allocation13 + $0x150] sm:$0xff] }
 0x2b8   :  { %v862_v7 = vld [vmem:[#allocation13 + $0x170] sm:$0xff] }
 0x2b9   :  { %v6435_v24 = vcombine.low %v858_v6, %v862_v7 }
 0x2ba   :  { %2456 = vmatpush1.bf16.msra.mxu1 %v6599_v25  ;;  %2538 = vmatpush1.bf16.msra.mxu0 %v6601_v26  ;;  %v830_v25 = vld [vmem:[#allocation13 + $0x70] sm:$0xff]  ;;  %v827_v26 = vld [vmem:[#allocation13 + $0x58] sm:$0xff] }
 0x2bb   :  { %2457 = vmatprep.subr.bf16.mxu1 %v6608_v34  ;;  %2539 = vmatprep.subr.bf16.mxu0 %v6610_v36  ;;  %v831_v34 = vld [vmem:[#allocation13 + $0x78] sm:$0xff]  ;;  %v6404_v40 = vcombine.high %v826_v23, %v830_v25  ;;  %v6403_v48 = vcombine.low %v826_v23, %v830_v25  ;;  %v882_v23 = vld [vmem:[#allocation13 + $0x210] sm:$0xff] }
 0x2bc   :  { %v6405_v49 = vcombine.low %v827_v26, %v831_v34  ;;  %v886_v25 = vld [vmem:[#allocation13 + $0x230] sm:$0xff] }
 0x2be   :  { %2458 = vmatpush1.bf16.msra.mxu1 %v6607_v41  ;;  %2540 = vmatpush1.bf16.msra.mxu0 %v6609_v43  ;;  %v6406_v41 = vcombine.high %v827_v26, %v831_v34  ;;  %v834_v43 = vld [vmem:[#allocation13 + $0x90] sm:$0xff]  ;;  %v883_v26 = vld [vmem:[#allocation13 + $0x218] sm:$0xff] }
 0x2bf   :  { %2459 = vmatprep.subr.bf16.mxu1 %v6616_v45  ;;  %2541 = vmatprep.subr.bf16.mxu0 %v6618_v46  ;;  %v838_v45 = vld [vmem:[#allocation13 + $0xb0] sm:$0xff]  ;;  %v835_v46 = vld [vmem:[#allocation13 + $0x98] sm:$0xff] }
 0x2c0   :  { %v6412_v50 = vcombine.high %v834_v43, %v838_v45  ;;  %v6411_v59 = vcombine.low %v834_v43, %v838_v45  ;;  %v6413_v60 = vcombine.low %v835_v46, %v839_v47  ;;  %v887_v34 = vld [vmem:[#allocation13 + $0x238] sm:$0xff]  ;;  %v890_v43 = vld [vmem:[#allocation13 + $0x250] sm:$0xff] }
 0x2c1   :  { %v894_v45 = vld [vmem:[#allocation13 + $0x270] sm:$0xff] }
 0x2c2   :  { %2460 = vmatpush1.bf16.msra.mxu1 %v6615_v51  ;;  %2542 = vmatpush1.bf16.msra.mxu0 %v6617_v52  ;;  %v6414_v51 = vcombine.high %v835_v46, %v839_v47  ;;  %v842_v52 = vld [vmem:[#allocation13 + $0xd0] sm:$0xff]  ;;  %v891_v46 = vld [vmem:[#allocation13 + $0x258] sm:$0xff] }
 0x2c3   :  { %2461 = vmatprep.subr.bf16.mxu1 %v6624_v53  ;;  %2543 = vmatprep.subr.bf16.mxu0 %v6626_v54  ;;  %v846_v53 = vld [vmem:[#allocation13 + $0xf0] sm:$0xff]  ;;  %v843_v54 = vld [vmem:[#allocation13 + $0xd8] sm:$0xff] }
 0x2c4   :  { %v6420_v61 = vcombine.high %v842_v52, %v846_v53  ;;  %v6421_v3 = vcombine.low %v843_v54, %v847_v56  ;;  %v895_v47 = vld [vmem:[#allocation13 + $0x278] sm:$0xff] }
 0x2c6   :  { %v797_v8 = vpop.f32.mrb[8].mxu0  ;;  %2462 = vmatpush1.bf16.msra.mxu1 %v6623_v62  ;;  %2544 = vmatpush1.bf16.msra.mxu0 %v6625_v63  ;;  %v6422_v62 = vcombine.high %v843_v54, %v847_v56  ;;  %v850_v63 = vld [vmem:[#allocation13 + $0x110] sm:$0xff]  ;;  %v899_v54 = vld [vmem:[#allocation13 + $0x298] sm:$0xff] }
 0x2c7   :  { %v798_v13 = vadd.f32 %v797_v8, %v393_v0  ;;  %v799_v14 = vpop.f32.mrb[9].mxu0  ;;  %2463 = vmatprep.subr.bf16.mxu1 %v6632_v1  ;;  %2545 = vmatprep.subr.bf16.mxu0 %v6634_v2  ;;  %v854_v0 = vld [vmem:[#allocation13 + $0x130] sm:$0xff]  ;;  %v855_v1 = vld [vmem:[#allocation13 + $0x138] sm:$0xff]  ;;  %v6419_v2 = vcombine.low %v842_v52, %v846_v53 }
 0x2c8   :  { %v800_v18 = vadd.f32 %v799_v14, %v397_v4  ;;  %v801_v22 = vpop.f32.mrb[10].mxu0  ;;  %v6428_v4 = vcombine.high %v850_v63, %v854_v0  ;;  %v859_v8 = vld [vmem:[#allocation13 + $0x158] sm:$0xff]  ;;  %v6436_v14 = vcombine.high %v858_v6, %v862_v7  ;;  %v898_v52 = vld [vmem:[#allocation13 + $0x290] sm:$0xff] }
 0x2c9   :  { %v806_v28 = vmul.f32 0.2, %v798_v13  ;;  %v802_v29 = vpop.f32.mrb[11].mxu0  ;;  %v871_v22 = vld [vmem:[#allocation13 + $0x1b8] sm:$0xff]  ;;  %v902_v53 = vld [vmem:[#allocation13 + $0x2b0] sm:$0xff] }
 0x2ca   :  { %v807_v30 = vmul.f32 0.2, %v800_v18  ;;  %2464 = vmatpush1.bf16.msra.mxu1 %v6631_v9  ;;  %2546 = vmatpush1.bf16.msra.mxu0 %v6633_v12  ;;  %v863_v9 = vld [vmem:[#allocation13 + $0x178] sm:$0xff]  ;;  %v6427_v12 = vcombine.low %v850_v63, %v854_v0  ;;  %v874_v29 = vld [vmem:[#allocation13 + $0x1d0] sm:$0xff] }
 0x2cb   :  { %v810_v33 = vmax.f32 %v798_v13, %v806_v28  ;;  %2465 = vmatprep.subr.bf16.mxu1 %v6640_v15  ;;  %2547 = vmatprep.subr.bf16.mxu0 %v6642_v16  ;;  %v6438_v15 = vcombine.high %v859_v8, %v863_v9  ;;  %v866_v16 = vld [vmem:[#allocation13 + $0x190] sm:$0xff]  ;;  %v6437_v27 = vcombine.low %v859_v8, %v863_v9  ;;  %v903_v56 = vld [vmem:[#allocation13 + $0x2b8] sm:$0xff] }
 0x2cc   :  { %v811_v21 = vmax.f32 %v800_v18, %v807_v30  ;;  %v867_v18 = vld [vmem:[#allocation13 + $0x198] sm:$0xff]  ;;  %v6444_v57 = vcombine.high %v866_v16, %v870_v17  ;;  %v878_v30 = vld [vmem:[#allocation13 + $0x1f0] sm:$0xff] }
 0x2cd   :  { %v8567_v38 = vpack.c.bf16 %v810_v33, %v810_v33  ;;  %v6446_v28 = vcombine.high %v867_v18, %v871_v22  ;;  %v6443_v33 = vcombine.low %v866_v16, %v870_v17  ;;  %v906_v63 = vld [vmem:[#allocation13 + $0x2d0] sm:$0xff]  ;;  %v915_v8 = vld [vmem:[#allocation13 + $0x318] sm:$0xff] }
 0x2ce   :  { %v8565_v36 = vpack.c.bf16 %v811_v21, %v811_v21  ;;  %2466 = vmatpush1.bf16.msra.mxu1 %v6639_v31  ;;  %2548 = vmatpush1.bf16.msra.mxu0 %v6641_v32  ;;  %v875_v31 = vld [vmem:[#allocation13 + $0x1d8] sm:$0xff]  ;;  %v910_v0 = vld [vmem:[#allocation13 + $0x2f0] sm:$0xff] }
 0x2cf   :  { %2558 = vmatprep.subr.bf16.mxu1 %v6396_v19  ;;  %2640 = vmatprep.subr.bf16.mxu0 %v6398_v20  ;;  %v879_v32 = vld [vmem:[#allocation13 + $0x1f8] sm:$0xff]  ;;  %v6445_v19 = vcombine.low %v867_v18, %v871_v22  ;;  %v6452_v20 = vcombine.high %v874_v29, %v878_v30  ;;  %v914_v6 = vld [vmem:[#allocation13 + $0x310] sm:$0xff] }
 0x2d0   :  { %2467 = vmatprep.mubr.bf16.mxu1 %v8565_v36  ;;  %2549 = vmatprep.mubr.bf16.mxu0 %v8565_v36  ;;  %v6454_v21 = vcombine.high %v875_v31, %v879_v32  ;;  %v918_v7 = vld [vmem:[#allocation13 + $0x330] sm:$0xff]  ;;  %v919_v9 = vld [vmem:[#allocation13 + $0x338] sm:$0xff] }
 0x2d1   :  { %2468 = vmatmul.mubr.bf16.vlgmr.msra.gmra.mrb[0].mxu1 %v8567_v38  ;;  %2550 = vmatmul.mubr.bf16.vlgmr.msra.gmra.mrb[12].mxu0 %v8567_v38  ;;  %v922_v16 = vld [vmem:[#allocation13 + $0x350] sm:$0xff]  ;;  %v923_v18 = vld [vmem:[#allocation13 + $0x358] sm:$0xff] }
 0x2d2   :  { %2559 = vmatpush1.bf16.msra.mxu1 %v6395_v37  ;;  %2590 = vmatprep.mubr.bf16.mxu1 %v8541_v10  ;;  %v6451_v37 = vcombine.low %v874_v29, %v878_v30  ;;  %v926_v17 = vld [vmem:[#allocation13 + $0x370] sm:$0xff]  ;;  %v927_v22 = vld [vmem:[#allocation13 + $0x378] sm:$0xff] }
 0x2d3   :  { %2641 = vmatpush1.bf16.msra.mxu0 %v6397_v39  ;;  %2672 = vmatprep.mubr.bf16.mxu0 %v8541_v10  ;;  %v851_v10 = vld [vmem:[#allocation13 + $0x118] sm:$0xff]  ;;  %v6453_v39 = vcombine.low %v875_v31, %v879_v32  ;;  %v930_v29 = vld [vmem:[#allocation13 + $0x390] sm:$0xff] }
 0x2d4   :  { %2560 = vmatprep.subr.bf16.mxu1 %v6404_v40  ;;  %2642 = vmatprep.subr.bf16.mxu0 %v6406_v41  ;;  %v6430_v5 = vcombine.high %v851_v10, %v855_v1  ;;  %v6429_v13 = vcombine.low %v851_v10, %v855_v1  ;;  %v6460_v40 = vcombine.high %v882_v23, %v886_v25  ;;  %v907_v10 = vld [vmem:[#allocation13 + $0x2d8] sm:$0xff]  ;;  %v934_v30 = vld [vmem:[#allocation13 + $0x3b0] sm:$0xff] }
 0x2d5   :  { %v6462_v41 = vcombine.high %v883_v26, %v887_v34  ;;  %v911_v1 = vld [vmem:[#allocation13 + $0x2f8] sm:$0xff] }
 0x2d6   :  { %2561 = vmatpush1.bf16.msra.mxu1 %v6403_v48  ;;  %v6459_v48 = vcombine.low %v882_v23, %v886_v25  ;;  %v931_v31 = vld [vmem:[#allocation13 + $0x398] sm:$0xff]  ;;  %v938_v23 = vld [vmem:[#allocation13 + $0x3d0] sm:$0xff] }
 0x2d7   :  { %2643 = vmatpush1.bf16.msra.mxu0 %v6405_v49  ;;  %2562 = vmatprep.subr.bf16.mxu1 %v6412_v50  ;;  %v6461_v49 = vcombine.low %v883_v26, %v887_v34  ;;  %v6468_v50 = vcombine.high %v890_v43, %v894_v45  ;;  %v935_v32 = vld [vmem:[#allocation13 + $0x3b8] sm:$0xff]  ;;  %v942_v25 = vld [vmem:[#allocation13 + $0x3f0] sm:$0xff] }
 0x2d8   :  { %2644 = vmatprep.subr.bf16.mxu0 %v6414_v51  ;;  %v6470_v51 = vcombine.high %v891_v46, %v895_v47  ;;  %v939_v26 = vld [vmem:[#allocation13 + $0x3d8] sm:$0xff] }
 0x2d9   :  { %v943_v34 = vld [vmem:[#allocation13 + $0x3f8] sm:$0xff] }
 0x2da   :  { %2563 = vmatpush1.bf16.msra.mxu1 %v6411_v59  ;;  %v6467_v59 = vcombine.low %v890_v43, %v894_v45  ;;  %v946_v43 = vld [vmem:[#allocation13 + $0x410] sm:$0xff] }
 0x2db   :  { %2645 = vmatpush1.bf16.msra.mxu0 %v6413_v60  ;;  %2564 = vmatprep.subr.bf16.mxu1 %v6420_v61  ;;  %v6469_v60 = vcombine.low %v891_v46, %v895_v47  ;;  %v6476_v61 = vcombine.high %v898_v52, %v902_v53  ;;  %v950_v45 = vld [vmem:[#allocation13 + $0x430] sm:$0xff]  ;;  %v947_v46 = vld [vmem:[#allocation13 + $0x418] sm:$0xff] }
 0x2dc   :  { %2646 = vmatprep.subr.bf16.mxu0 %v6422_v62  ;;  %v6478_v62 = vcombine.high %v899_v54, %v903_v56  ;;  %v951_v47 = vld [vmem:[#allocation13 + $0x438] sm:$0xff] }
 0x2de   :  { %2565 = vmatpush1.bf16.msra.mxu1 %v6419_v2  ;;  %v6475_v2 = vcombine.low %v898_v52, %v902_v53  ;;  %v954_v52 = vld [vmem:[#allocation13 + $0x450] sm:$0xff] }
 0x2df   :  { %2647 = vmatpush1.bf16.msra.mxu0 %v6421_v3  ;;  %2566 = vmatprep.subr.bf16.mxu1 %v6428_v4  ;;  %v6477_v3 = vcombine.low %v899_v54, %v903_v56  ;;  %v6484_v4 = vcombine.high %v906_v63, %v910_v0  ;;  %v958_v53 = vld [vmem:[#allocation13 + $0x470] sm:$0xff]  ;;  %v6523_v54 = vcombine.low %v946_v43, %v950_v45  ;;  %v955_v56 = vld [vmem:[#allocation13 + $0x458] sm:$0xff] }
 0x2e0   :  { %2648 = vmatprep.subr.bf16.mxu0 %v6430_v5  ;;  %v6486_v5 = vcombine.high %v907_v10, %v911_v1 }
 0x2e2   :  { %2567 = vmatpush1.bf16.msra.mxu1 %v6427_v12  ;;  %v6483_v12 = vcombine.low %v906_v63, %v910_v0  ;;  %v966_v63 = vld [vmem:[#allocation13 + $0x4b0] sm:$0xff] }
 0x2e3   :  { %2649 = vmatpush1.bf16.msra.mxu0 %v6429_v13  ;;  %2568 = vmatprep.subr.bf16.mxu1 %v6436_v14  ;;  %v6485_v13 = vcombine.low %v907_v10, %v911_v1  ;;  %v6492_v14 = vcombine.high %v914_v6, %v918_v7  ;;  %v963_v10 = vld [vmem:[#allocation13 + $0x498] sm:$0xff] }
 0x2e4   :  { %2650 = vmatprep.subr.bf16.mxu0 %v6438_v15  ;;  %v6494_v15 = vcombine.high %v915_v8, %v919_v9  ;;  %v967_v1 = vld [vmem:[#allocation13 + $0x4b8] sm:$0xff] }
 0x2e6   :  { %2569 = vmatpush1.bf16.msra.mxu1 %v6435_v24  ;;  %v6491_v24 = vcombine.low %v914_v6, %v918_v7  ;;  %v970_v6 = vld [vmem:[#allocation13 + $0x4d0] sm:$0xff] }
 0x2e7   :  { %2651 = vmatpush1.bf16.msra.mxu0 %v6437_v27  ;;  %2570 = vmatprep.subr.bf16.mxu1 %v6444_v57  ;;  %v6493_v27 = vcombine.low %v915_v8, %v919_v9  ;;  %v6500_v57 = vcombine.high %v922_v16, %v926_v17  ;;  %v974_v7 = vld [vmem:[#allocation13 + $0x4f0] sm:$0xff]  ;;  %v971_v8 = vld [vmem:[#allocation13 + $0x4d8] sm:$0xff] }
 0x2e8   :  { %2652 = vmatprep.subr.bf16.mxu0 %v6446_v28  ;;  %v6502_v28 = vcombine.high %v923_v18, %v927_v22  ;;  %v975_v9 = vld [vmem:[#allocation13 + $0x4f8] sm:$0xff] }
 0x2ea   :  { %2571 = vmatpush1.bf16.msra.mxu1 %v6443_v33  ;;  %v6499_v33 = vcombine.low %v922_v16, %v926_v17  ;;  %v982_v16 = vld [vmem:[#allocation13 + $0x530] sm:$0xff]  ;;  %v979_v17 = vld [vmem:[#allocation13 + $0x518] sm:$0xff] }
 0x2eb   :  { %2653 = vmatpush1.bf16.msra.mxu0 %v6445_v19  ;;  %2572 = vmatprep.subr.bf16.mxu1 %v6452_v20  ;;  %v6501_v19 = vcombine.low %v923_v18, %v927_v22  ;;  %v6508_v20 = vcombine.high %v930_v29, %v934_v30  ;;  %v983_v18 = vld [vmem:[#allocation13 + $0x538] sm:$0xff]  ;;  %v6549_v22 = vcombine.low %v971_v8, %v975_v9 }
 0x2ec   :  { %2654 = vmatprep.subr.bf16.mxu0 %v6454_v21  ;;  %v6510_v21 = vcombine.high %v931_v31, %v935_v32 }
 0x2ee   :  { %2573 = vmatpush1.bf16.msra.mxu1 %v6451_v37  ;;  %v6507_v37 = vcombine.low %v930_v29, %v934_v30  ;;  %v987_v29 = vld [vmem:[#allocation13 + $0x558] sm:$0xff] }
 0x2ef   :  { %2655 = vmatpush1.bf16.msra.mxu0 %v6453_v39  ;;  %2574 = vmatprep.subr.bf16.mxu1 %v6460_v40  ;;  %v6509_v39 = vcombine.low %v931_v31, %v935_v32  ;;  %v6516_v40 = vcombine.high %v938_v23, %v942_v25  ;;  %v991_v30 = vld [vmem:[#allocation13 + $0x578] sm:$0xff]  ;;  %v6557_v32 = vcombine.low %v979_v17, %v983_v18 }
 0x2f0   :  { %2656 = vmatprep.subr.bf16.mxu0 %v6462_v41  ;;  %v6518_v41 = vcombine.high %v939_v26, %v943_v34 }
 0x2f2   :  { %2575 = vmatpush1.bf16.msra.mxu1 %v6459_v48  ;;  %v6515_v48 = vcombine.low %v938_v23, %v942_v25  ;;  %v995_v23 = vld [vmem:[#allocation13 + $0x598] sm:$0xff] }
 0x2f3   :  { %2657 = vmatpush1.bf16.msra.mxu0 %v6461_v49  ;;  %2576 = vmatprep.subr.bf16.mxu1 %v6468_v50  ;;  %v6517_v49 = vcombine.low %v939_v26, %v943_v34  ;;  %v6524_v50 = vcombine.high %v946_v43, %v950_v45  ;;  %v999_v25 = vld [vmem:[#allocation13 + $0x5b8] sm:$0xff]  ;;  %v6565_v34 = vcombine.low %v987_v29, %v991_v30 }
 0x2f4   :  { %2658 = vmatprep.subr.bf16.mxu0 %v6470_v51  ;;  %v6526_v51 = vcombine.high %v947_v46, %v951_v47  ;;  %v1003_v43 = vld [vmem:[#allocation13 + $0x5d8] sm:$0xff] }
 0x2f5   :  { %v1007_v45 = vld [vmem:[#allocation13 + $0x5f8] sm:$0xff] }
 0x2f6   :  { %2577 = vmatpush1.bf16.msra.mxu1 %v6467_v59  ;;  %v959_v59 = vld [vmem:[#allocation13 + $0x478] sm:$0xff] }
 0x2f7   :  { %2659 = vmatpush1.bf16.msra.mxu0 %v6469_v60  ;;  %2578 = vmatprep.subr.bf16.mxu1 %v6476_v61  ;;  %v6525_v60 = vcombine.low %v947_v46, %v951_v47  ;;  %v6532_v61 = vcombine.high %v954_v52, %v958_v53  ;;  %v6534_v0 = vcombine.high %v955_v56, %v959_v59 }
 0x2f8   :  { %2660 = vmatprep.subr.bf16.mxu0 %v6478_v62  ;;  %v962_v62 = vld [vmem:[#allocation13 + $0x490] sm:$0xff]  ;;  %v6573_v47 = vcombine.low %v995_v23, %v999_v25 }
 0x2fa   :  { %2579 = vmatpush1.bf16.msra.mxu1 %v6475_v2  ;;  %v6531_v2 = vcombine.low %v954_v52, %v958_v53  ;;  %v1011_v52 = vld [vmem:[#allocation13 + $0x618] sm:$0xff] }
 0x2fb   :  { %2661 = vmatpush1.bf16.msra.mxu0 %v6477_v3  ;;  %2580 = vmatprep.subr.bf16.mxu1 %v6484_v4  ;;  %v6533_v3 = vcombine.low %v955_v56, %v959_v59  ;;  %v6540_v4 = vcombine.high %v962_v62, %v966_v63  ;;  %v1015_v53 = vld [vmem:[#allocation13 + $0x638] sm:$0xff]  ;;  %v6581_v56 = vcombine.low %v1003_v43, %v1007_v45 }
 0x2fc   :  { %2662 = vmatprep.subr.bf16.mxu0 %v6486_v5  ;;  %v6542_v5 = vcombine.high %v963_v10, %v967_v1 }
 0x2fe   :  { %2581 = vmatpush1.bf16.msra.mxu1 %v6483_v12  ;;  %v6539_v12 = vcombine.low %v962_v62, %v966_v63  ;;  %v1022_v62 = vld [vmem:[#allocation13 + $0x670] sm:$0xff]  ;;  %v1019_v63 = vld [vmem:[#allocation13 + $0x658] sm:$0xff] }
 0x2ff   :  { %2663 = vmatpush1.bf16.msra.mxu0 %v6485_v13  ;;  %2582 = vmatprep.subr.bf16.mxu1 %v6492_v14  ;;  %v6548_v13 = vcombine.high %v970_v6, %v974_v7  ;;  %v6550_v14 = vcombine.high %v971_v8, %v975_v9 }
 0x300   :  { %2664 = vmatprep.subr.bf16.mxu0 %v6494_v15  ;;  %v978_v15 = vld [vmem:[#allocation13 + $0x510] sm:$0xff] }
 0x301   :  { %v6555_v31 = vcombine.low %v978_v15, %v982_v16 }
 0x302   :  { %2583 = vmatpush1.bf16.msra.mxu1 %v6491_v24  ;;  %v6556_v24 = vcombine.high %v978_v15, %v982_v16  ;;  %v1035_v15 = vld [vmem:[#allocation13 + $0x6d8] sm:$0xff] }
 0x303   :  { %2665 = vmatpush1.bf16.msra.mxu0 %v6493_v27  ;;  %2584 = vmatprep.subr.bf16.mxu1 %v6500_v57  ;;  %v6558_v27 = vcombine.high %v979_v17, %v983_v18  ;;  %v986_v57 = vld [vmem:[#allocation13 + $0x550] sm:$0xff]  ;;  %v1039_v16 = vld [vmem:[#allocation13 + $0x6f8] sm:$0xff] }
 0x304   :  { %2666 = vmatprep.subr.bf16.mxu0 %v6502_v28  ;;  %v990_v28 = vld [vmem:[#allocation13 + $0x570] sm:$0xff] }
 0x305   :  { %v6563_v26 = vcombine.low %v986_v57, %v990_v28 }
 0x306   :  { %2585 = vmatpush1.bf16.msra.mxu1 %v6499_v33  ;;  %v6564_v33 = vcombine.high %v986_v57, %v990_v28  ;;  %v1043_v57 = vld [vmem:[#allocation13 + $0x718] sm:$0xff] }
 0x307   :  { %2667 = vmatpush1.bf16.msra.mxu0 %v6501_v19  ;;  %2586 = vmatprep.subr.bf16.mxu1 %v6508_v20  ;;  %v6566_v19 = vcombine.high %v987_v29, %v991_v30  ;;  %v994_v20 = vld [vmem:[#allocation13 + $0x590] sm:$0xff]  ;;  %v1047_v28 = vld [vmem:[#allocation13 + $0x738] sm:$0xff]  ;;  %v6613_v30 = vcombine.low %v1035_v15, %v1039_v16 }
 0x308   :  { %2668 = vmatprep.subr.bf16.mxu0 %v6510_v21  ;;  %v998_v21 = vld [vmem:[#allocation13 + $0x5b0] sm:$0xff] }
 0x309   :  { %v6571_v46 = vcombine.low %v994_v20, %v998_v21 }
 0x30a   :  { %2587 = vmatpush1.bf16.msra.mxu1 %v6507_v37  ;;  %v6572_v37 = vcombine.high %v994_v20, %v998_v21  ;;  %v1051_v20 = vld [vmem:[#allocation13 + $0x758] sm:$0xff] }
 0x30b   :  { %2669 = vmatpush1.bf16.msra.mxu0 %v6509_v39  ;;  %2588 = vmatprep.subr.bf16.mxu1 %v6516_v40  ;;  %v6574_v39 = vcombine.high %v995_v23, %v999_v25  ;;  %v1002_v40 = vld [vmem:[#allocation13 + $0x5d0] sm:$0xff]  ;;  %v1055_v21 = vld [vmem:[#allocation13 + $0x778] sm:$0xff]  ;;  %v6621_v25 = vcombine.low %v1043_v57, %v1047_v28 }
 0x30c   :  { %2670 = vmatprep.subr.bf16.mxu0 %v6518_v41  ;;  %v1006_v41 = vld [vmem:[#allocation13 + $0x5f0] sm:$0xff] }
 0x30e   :  { %2589 = vmatpush1.bf16.msra.mxu1 %v6515_v48  ;;  %v6580_v48 = vcombine.high %v1002_v40, %v1006_v41 }
 0x30f   :  { %2671 = vmatpush1.bf16.msra.mxu0 %v6517_v49  ;;  %2599 = vmatprep.subr.bf16.mxu1 %v6524_v50  ;;  %v6582_v49 = vcombine.high %v1003_v43, %v1007_v45  ;;  %v1010_v50 = vld [vmem:[#allocation13 + $0x610] sm:$0xff]  ;;  %v6629_v45 = vcombine.low %v1051_v20, %v1055_v21 }
 0x310   :  { %2681 = vmatprep.subr.bf16.mxu0 %v6526_v51  ;;  %v1014_v51 = vld [vmem:[#allocation13 + $0x630] sm:$0xff] }
 0x311   :  { %2591 = vmatmul.mubr.bf16.vlgmr.msra.gmra.mrb[4].mxu1 %v8543_v11  ;;  %v6588_v59 = vcombine.high %v1010_v50, %v1014_v51 }
 0x312   :  { %2673 = vmatmul.mubr.bf16.vlgmr.msra.gmra.mrb[16].mxu0 %v8543_v11  ;;  %2600 = vmatpush1.bf16.msra.mxu1 %v6523_v54  ;;  %v6541_v11 = vcombine.low %v963_v10, %v967_v1  ;;  %v6579_v54 = vcombine.low %v1002_v40, %v1006_v41  ;;  %v6587_v10 = vcombine.low %v1010_v50, %v1014_v51  ;;  %v1059_v40 = vld [vmem:[#allocation13 + $0x798] sm:$0xff] }
 0x313   :  { %2631 = vmatprep.mubr.bf16.mxu1 %v8565_v36  ;;  %2682 = vmatpush1.bf16.msra.mxu0 %v6525_v60  ;;  %v6590_v60 = vcombine.high %v1011_v52, %v1015_v53  ;;  %v6589_v1 = vcombine.low %v1011_v52, %v1015_v53  ;;  %v1063_v41 = vld [vmem:[#allocation13 + $0x7b8] sm:$0xff] }
 0x314   :  { %2713 = vmatprep.mubr.bf16.mxu0 %v8565_v36  ;;  %2601 = vmatprep.subr.bf16.mxu1 %v6532_v61  ;;  %v6547_v36 = vcombine.low %v970_v6, %v974_v7  ;;  %v1018_v61 = vld [vmem:[#allocation13 + $0x650] sm:$0xff]  ;;  %v1027_v6 = vld [vmem:[#allocation13 + $0x698] sm:$0xff]  ;;  %v6637_v53 = vcombine.low %v1059_v40, %v1063_v41 }
 0x315   :  { %2683 = vmatprep.subr.bf16.mxu0 %v6534_v0  ;;  %v1023_v0 = vld [vmem:[#allocation13 + $0x678] sm:$0xff]  ;;  %v6595_v8 = vcombine.low %v1018_v61, %v1022_v62 }
 0x316   :  { %2602 = vmatpush1.bf16.msra.mxu1 %v6531_v2  ;;  %v6596_v2 = vcombine.high %v1018_v61, %v1022_v62  ;;  %v1031_v7 = vld [vmem:[#allocation13 + $0x6b8] sm:$0xff]  ;;  %v6597_v9 = vcombine.low %v1019_v63, %v1023_v0  ;;  %v7395_v61 = vld [vmem:[#allocation16 + $0x4] ss:$28 sps:$4 sm:$0xff]   ;;  %v7398_v62 = vld [vmem:[#allocation16 + $0xc] ss:$28 sps:$4 sm:$0xff]  }
 0x317   :  { %2684 = vmatpush1.bf16.msra.mxu0 %v6533_v3  ;;  %2603 = vmatprep.subr.bf16.mxu1 %v6540_v4  ;;  %v6598_v3 = vcombine.high %v1019_v63, %v1023_v0  ;;  %v1026_v4 = vld [vmem:[#allocation13 + $0x690] sm:$0xff]  ;;  %v6605_v18 = vcombine.low %v1027_v6, %v1031_v7  ;;  %v1067_v50 = vld [vmem:[#allocation13 + $0x7d8] sm:$0xff]  ;;  %v7393_v63 = vld [vmem:[#allocation16] ss:$28 sps:$4 sm:$0xff]  }
 0x318   :  { %2685 = vmatprep.subr.bf16.mxu0 %v6542_v5  ;;  %v1030_v5 = vld [vmem:[#allocation13 + $0x6b0] sm:$0xff]  ;;  %v1071_v51 = vld [vmem:[#allocation13 + $0x7f8] sm:$0xff] }
 0x319   :  { %v6603_v17 = vcombine.low %v1026_v4, %v1030_v5  ;;  %v7396_v0 = vld [vmem:[#allocation16 + $0x8] ss:$28 sps:$4 sm:$0xff]  }
 0x31a   :  { %2604 = vmatpush1.bf16.msra.mxu1 %v6539_v12  ;;  %v6604_v12 = vcombine.high %v1026_v4, %v1030_v5  ;;  %v7407_v4 = vld [vmem:[#allocation16 + $0x74] ss:$28 sps:$4 sm:$0xff]   ;;  %v7410_v5 = vld [vmem:[#allocation16 + $0x7c] ss:$28 sps:$4 sm:$0xff]  }
 0x31b   :  { %2686 = vmatpush1.bf16.msra.mxu0 %v6541_v11  ;;  %2605 = vmatprep.subr.bf16.mxu1 %v6548_v13  ;;  %v6606_v11 = vcombine.high %v1027_v6, %v1031_v7  ;;  %v1034_v13 = vld [vmem:[#allocation13 + $0x6d0] sm:$0xff]  ;;  %v7408_v7 = vld [vmem:[#allocation16 + $0x78] ss:$28 sps:$4 sm:$0xff]  }
 0x31c   :  { %2687 = vmatprep.subr.bf16.mxu0 %v6550_v14  ;;  %v1038_v14 = vld [vmem:[#allocation13 + $0x6f0] sm:$0xff] }
 0x31d   :  { %v6611_v29 = vcombine.low %v1034_v13, %v1038_v14  ;;  %v7405_v6 = vld [vmem:[#allocation16 + $0x70] ss:$28 sps:$4 sm:$0xff]  }
 0x31e   :  { %2606 = vmatpush1.bf16.msra.mxu1 %v6547_v36  ;;  %v6612_v36 = vcombine.high %v1034_v13, %v1038_v14  ;;  %v7422_v13 = vld [vmem:[#allocation16 + $0xec] ss:$28 sps:$4 sm:$0xff]   ;;  %v7417_v14 = vld [vmem:[#allocation16 + $0xe0] ss:$28 sps:$4 sm:$0xff]  }
 0x31f   :  { %2688 = vmatpush1.bf16.msra.mxu0 %v6549_v22  ;;  %2607 = vmatprep.subr.bf16.mxu1 %v6556_v24  ;;  %v6614_v22 = vcombine.high %v1035_v15, %v1039_v16  ;;  %v1042_v24 = vld [vmem:[#allocation13 + $0x710] sm:$0xff]  ;;  %v7425_v16 = vld [vmem:[#allocation16 + $0x11c] ss:$28 sps:$4 sm:$0xff]  }
 0x320   :  { %2689 = vmatprep.subr.bf16.mxu0 %v6558_v27  ;;  %v1046_v27 = vld [vmem:[#allocation13 + $0x730] sm:$0xff] }
 0x321   :  { %v6619_v23 = vcombine.low %v1042_v24, %v1046_v27  ;;  %v7420_v15 = vld [vmem:[#allocation16 + $0xe8] ss:$28 sps:$4 sm:$0xff]  }
 0x322   :  { %2608 = vmatpush1.bf16.msra.mxu1 %v6555_v31  ;;  %v6620_v31 = vcombine.high %v1042_v24, %v1046_v27  ;;  %v7434_v24 = vld [vmem:[#allocation16 + $0x15c] ss:$28 sps:$4 sm:$0xff]   ;;  %v7429_v27 = vld [vmem:[#allocation16 + $0x150] ss:$28 sps:$4 sm:$0xff]  }
 0x323   :  { %2690 = vmatpush1.bf16.msra.mxu0 %v6557_v32  ;;  %2609 = vmatprep.subr.bf16.mxu1 %v6564_v33  ;;  %v6622_v32 = vcombine.high %v1043_v57, %v1047_v28  ;;  %v1050_v33 = vld [vmem:[#allocation13 + $0x750] sm:$0xff]  ;;  %v7432_v57 = vld [vmem:[#allocation16 + $0x158] ss:$28 sps:$4 sm:$0xff]  }
 0x324   :  { %2691 = vmatprep.subr.bf16.mxu0 %v6566_v19  ;;  %v1054_v19 = vld [vmem:[#allocation13 + $0x770] sm:$0xff] }
 0x325   :  { %v6627_v43 = vcombine.low %v1050_v33, %v1054_v19  ;;  %v7437_v28 = vld [vmem:[#allocation16 + $0x18c] ss:$28 sps:$4 sm:$0xff]  }
 0x326   :  { %2610 = vmatpush1.bf16.msra.mxu1 %v6563_v26  ;;  %v6628_v26 = vcombine.high %v1050_v33, %v1054_v19  ;;  %v7446_v33 = vld [vmem:[#allocation16 + $0x1cc] ss:$28 sps:$4 sm:$0xff]   ;;  %v7441_v19 = vld [vmem:[#allocation16 + $0x1c0] ss:$28 sps:$4 sm:$0xff]  }
 0x327   :  { %2692 = vmatpush1.bf16.msra.mxu0 %v6565_v34  ;;  %2611 = vmatprep.subr.bf16.mxu1 %v6572_v37  ;;  %v6630_v34 = vcombine.high %v1051_v20, %v1055_v21  ;;  %v1058_v37 = vld [vmem:[#allocation13 + $0x790] sm:$0xff]  ;;  %v7449_v21 = vld [vmem:[#allocation16 + $0x1fc] ss:$28 sps:$4 sm:$0xff]  }
 0x328   :  { %2693 = vmatprep.subr.bf16.mxu0 %v6574_v39  ;;  %v1062_v39 = vld [vmem:[#allocation13 + $0x7b0] sm:$0xff] }
 0x329   :  { %v6635_v52 = vcombine.low %v1058_v37, %v1062_v39  ;;  %v7444_v20 = vld [vmem:[#allocation16 + $0x1c8] ss:$28 sps:$4 sm:$0xff]  }
 0x32a   :  { %2612 = vmatpush1.bf16.msra.mxu1 %v6571_v46  ;;  %v6636_v46 = vcombine.high %v1058_v37, %v1062_v39  ;;  %v7458_v37 = vld [vmem:[#allocation16 + $0x23c] ss:$28 sps:$4 sm:$0xff]   ;;  %v7453_v39 = vld [vmem:[#allocation16 + $0x230] ss:$28 sps:$4 sm:$0xff]  }
 0x32b   :  { %2694 = vmatpush1.bf16.msra.mxu0 %v6573_v47  ;;  %2613 = vmatprep.subr.bf16.mxu1 %v6580_v48  ;;  %v6638_v47 = vcombine.high %v1059_v40, %v1063_v41  ;;  %v1066_v48 = vld [vmem:[#allocation13 + $0x7d0] sm:$0xff]  ;;  %v7456_v40 = vld [vmem:[#allocation16 + $0x238] ss:$28 sps:$4 sm:$0xff]  }
 0x32c   :  { %2695 = vmatprep.subr.bf16.mxu0 %v6582_v49  ;;  %v1070_v49 = vld [vmem:[#allocation13 + $0x7f0] sm:$0xff] }
 0x32d   :  { %v7461_v41 = vld [vmem:[#allocation16 + $0x26c] ss:$28 sps:$4 sm:$0xff]  }
 0x32e   :  { %2614 = vmatpush1.bf16.msra.mxu1 %v6579_v54  ;;  %v6644_v54 = vcombine.high %v1066_v48, %v1070_v49 }
 0x32f   :  { %2696 = vmatpush1.bf16.msra.mxu0 %v6581_v56  ;;  %2615 = vmatprep.subr.bf16.mxu1 %v6588_v59  ;;  %v6646_v56 = vcombine.high %v1067_v50, %v1071_v51  ;;  %v6643_v59 = vcombine.low %v1066_v48, %v1070_v49  ;;  %v7470_v48 = vld [vmem:[#allocation16 + $0x2ac] ss:$28 sps:$4 sm:$0xff]   ;;  %v7465_v49 = vld [vmem:[#allocation16 + $0x2a0] ss:$28 sps:$4 sm:$0xff]  }
 0x330   :  { %2697 = vmatprep.subr.bf16.mxu0 %v6590_v60  ;;  %v6645_v60 = vcombine.low %v1067_v50, %v1071_v51  ;;  %v7468_v50 = vld [vmem:[#allocation16 + $0x2a8] ss:$28 sps:$4 sm:$0xff]   ;;  %v7473_v51 = vld [vmem:[#allocation16 + $0x2dc] ss:$28 sps:$4 sm:$0xff]  }
 0x332   :  { %2616 = vmatpush1.bf16.msra.mxu1 %v6587_v10  ;;  %v7401_v10 = vld [vmem:[#allocation16 + $0x3c] ss:$28 sps:$4 sm:$0xff]  }
 0x333   :  { %2698 = vmatpush1.bf16.msra.mxu0 %v6589_v1  ;;  %2617 = vmatprep.subr.bf16.mxu1 %v6596_v2  ;;  %v7404_v1 = vld [vmem:[#allocation16 + $0x44] ss:$28 sps:$4 sm:$0xff]   ;;  %v7399_v2 = vld [vmem:[#allocation16 + $0x38] ss:$28 sps:$4 sm:$0xff]  }
 0x334   :  { %2699 = vmatprep.subr.bf16.mxu0 %v6598_v3  ;;  %v7402_v3 = vld [vmem:[#allocation16 + $0x40] ss:$28 sps:$4 sm:$0xff]  }
 0x336   :  { %2618 = vmatpush1.bf16.msra.mxu1 %v6595_v8  ;;  %v7413_v8 = vld [vmem:[#allocation16 + $0xac] ss:$28 sps:$4 sm:$0xff]  }
 0x337   :  { %2700 = vmatpush1.bf16.msra.mxu0 %v6597_v9  ;;  %2619 = vmatprep.subr.bf16.mxu1 %v6604_v12  ;;  %v7416_v9 = vld [vmem:[#allocation16 + $0xb4] ss:$28 sps:$4 sm:$0xff]   ;;  %v7411_v12 = vld [vmem:[#allocation16 + $0xa8] ss:$28 sps:$4 sm:$0xff]  }
 0x338   :  { %2701 = vmatprep.subr.bf16.mxu0 %v6606_v11  ;;  %v7419_v11 = vld [vmem:[#allocation16 + $0xe4] ss:$28 sps:$4 sm:$0xff]  }
 0x33a   :  { %2620 = vmatpush1.bf16.msra.mxu1 %v6603_v17  ;;  %v7428_v17 = vld [vmem:[#allocation16 + $0x124] ss:$28 sps:$4 sm:$0xff]  }
 0x33b   :  { %2702 = vmatpush1.bf16.msra.mxu0 %v6605_v18  ;;  %2621 = vmatprep.subr.bf16.mxu1 %v6612_v36  ;;  %v7423_v18 = vld [vmem:[#allocation16 + $0x118] ss:$28 sps:$4 sm:$0xff]   ;;  %v7426_v36 = vld [vmem:[#allocation16 + $0x120] ss:$28 sps:$4 sm:$0xff]  }
 0x33c   :  { %2703 = vmatprep.subr.bf16.mxu0 %v6614_v22  ;;  %v7431_v22 = vld [vmem:[#allocation16 + $0x154] ss:$28 sps:$4 sm:$0xff]  }
 0x33e   :  { %2622 = vmatpush1.bf16.msra.mxu1 %v6611_v29  ;;  %v7440_v29 = vld [vmem:[#allocation16 + $0x194] ss:$28 sps:$4 sm:$0xff]  }
 0x33f   :  { %2704 = vmatpush1.bf16.msra.mxu0 %v6613_v30  ;;  %2623 = vmatprep.subr.bf16.mxu1 %v6620_v31  ;;  %v7435_v30 = vld [vmem:[#allocation16 + $0x188] ss:$28 sps:$4 sm:$0xff]   ;;  %v7438_v31 = vld [vmem:[#allocation16 + $0x190] ss:$28 sps:$4 sm:$0xff]  }
 0x340   :  { %2705 = vmatprep.subr.bf16.mxu0 %v6622_v32  ;;  %v7443_v32 = vld [vmem:[#allocation16 + $0x1c4] ss:$28 sps:$4 sm:$0xff]  }
 0x342   :  { %2624 = vmatpush1.bf16.msra.mxu1 %v6619_v23  ;;  %v7452_v23 = vld [vmem:[#allocation16 + $0x204] ss:$28 sps:$4 sm:$0xff]  }
 0x343   :  { %2706 = vmatpush1.bf16.msra.mxu0 %v6621_v25  ;;  %2625 = vmatprep.subr.bf16.mxu1 %v6628_v26  ;;  %v7447_v25 = vld [vmem:[#allocation16 + $0x1f8] ss:$28 sps:$4 sm:$0xff]   ;;  %v7450_v26 = vld [vmem:[#allocation16 + $0x200] ss:$28 sps:$4 sm:$0xff]  }
 0x344   :  { %2707 = vmatprep.subr.bf16.mxu0 %v6630_v34  ;;  %v7455_v34 = vld [vmem:[#allocation16 + $0x234] ss:$28 sps:$4 sm:$0xff]  }
 0x346   :  { %2626 = vmatpush1.bf16.msra.mxu1 %v6627_v43  ;;  %v7464_v43 = vld [vmem:[#allocation16 + $0x274] ss:$28 sps:$4 sm:$0xff]  }
 0x347   :  { %2708 = vmatpush1.bf16.msra.mxu0 %v6629_v45  ;;  %2627 = vmatprep.subr.bf16.mxu1 %v6636_v46  ;;  %v7459_v45 = vld [vmem:[#allocation16 + $0x268] ss:$28 sps:$4 sm:$0xff]   ;;  %v7462_v46 = vld [vmem:[#allocation16 + $0x270] ss:$28 sps:$4 sm:$0xff]  }
 0x348   :  { %2709 = vmatprep.subr.bf16.mxu0 %v6638_v47  ;;  %v7467_v47 = vld [vmem:[#allocation16 + $0x2a4] ss:$28 sps:$4 sm:$0xff]  }
 0x34a   :  { %2628 = vmatpush1.bf16.msra.mxu1 %v6635_v52  ;;  %v7476_v52 = vld [vmem:[#allocation16 + $0x2e4] ss:$28 sps:$4 sm:$0xff]  }
 0x34b   :  { %2710 = vmatpush1.bf16.msra.mxu0 %v6637_v53  ;;  %2629 = vmatprep.subr.bf16.mxu1 %v6644_v54  ;;  %v7471_v53 = vld [vmem:[#allocation16 + $0x2d8] ss:$28 sps:$4 sm:$0xff]   ;;  %v7474_v54 = vld [vmem:[#allocation16 + $0x2e0] ss:$28 sps:$4 sm:$0xff]  }
 0x34c   :  { %2711 = vmatprep.subr.bf16.mxu0 %v6646_v56  ;;  %v7479_v56 = vld [vmem:[#allocation16 + $0x314] ss:$28 sps:$4 sm:$0xff]  }
 0x34e   :  { %2630 = vmatpush1.bf16.msra.mxu1 %v6643_v59  ;;  %v7482_v59 = vld [vmem:[#allocation16 + $0x31c] ss:$28 sps:$4 sm:$0xff]  }
 0x34f   :  { %2712 = vmatpush1.bf16.msra.mxu0 %v6645_v60  ;;  %5599 = vmatprep.subr.bf16.mxu1 %v7395_v61  ;;  %v7477_v60 = vld [vmem:[#allocation16 + $0x310] ss:$28 sps:$4 sm:$0xff]   ;;  %v7480_v61 = vld [vmem:[#allocation16 + $0x318] ss:$28 sps:$4 sm:$0xff]  }
 0x350   :  { %5763 = vmatprep.subr.bf16.mxu0 %v7398_v62  ;;  %v7485_v62 = vld [vmem:[#allocation16 + $0x34c] ss:$28 sps:$4 sm:$0xff]  }
 0x351   :  { %2632 = vmatmul.mubr.bf16.vlgmr.msra.gmra.mrb[4].mxu1 %v8567_v38 }
 0x352   :  { %2714 = vmatmul.mubr.bf16.vlgmr.msra.gmra.mrb[16].mxu0 %v8567_v38  ;;  %5600 = vmatpush1.bf16.msra.mxu1 %v7393_v63  ;;  %v7414_v38 = vld [vmem:[#allocation16 + $0xb0] ss:$28 sps:$4 sm:$0xff]  }
 0x353   :  { %5764 = vmatpush1.bf16.msra.mxu0 %v7396_v0  ;;  %5601 = vmatprep.subr.bf16.mxu1 %v7401_v10  ;;  %v7488_v63 = vld [vmem:[#allocation16 + $0x354] ss:$28 sps:$4 sm:$0xff]   ;;  %v7483_v0 = vld [vmem:[#allocation16 + $0x348] ss:$28 sps:$4 sm:$0xff]  }
 0x354   :  { %5765 = vmatprep.subr.bf16.mxu0 %v7404_v1  ;;  %v7486_v10 = vld [vmem:[#allocation16 + $0x350] ss:$28 sps:$4 sm:$0xff]   ;;  %v7491_v1 = vld [vmem:[#allocation16 + $0x384] ss:$28 sps:$4 sm:$0xff]  }
 0x356   :  { %5602 = vmatpush1.bf16.msra.mxu1 %v7399_v2  ;;  %v7494_v2 = vld [vmem:[#allocation16 + $0x38c] ss:$28 sps:$4 sm:$0xff]  }
 0x357   :  { %5766 = vmatpush1.bf16.msra.mxu0 %v7402_v3  ;;  %5603 = vmatprep.subr.bf16.mxu1 %v7407_v4  ;;  %v8581_v3 = vld [vmem:[#allocation14] sm:$0xff] }
 0x358   :  { %5767 = vmatprep.subr.bf16.mxu0 %v7410_v5  ;;  %v1077_v4 = vrot.slane %v8581_v3, %v8508_v42  ;;  %v1081_v5 = vrot.slane %v8581_v3, %v8511_v44 }
 0x35a   :  { %5604 = vmatpush1.bf16.msra.mxu1 %v7405_v6  ;;  %v1089_v6 = vrot.slane %v8581_v3, %v8559_v58 }
 0x35b   :  { %5768 = vmatpush1.bf16.msra.mxu0 %v7408_v7  ;;  %5605 = vmatprep.subr.bf16.mxu1 %v7413_v8 }
 0x35c   :  { %5769 = vmatprep.subr.bf16.mxu0 %v7416_v9 }
 0x35e   :  { %5606 = vmatpush1.bf16.msra.mxu1 %v7411_v12 }
 0x35f   :  { %5770 = vmatpush1.bf16.msra.mxu0 %v7414_v38  ;;  %5607 = vmatprep.subr.bf16.mxu1 %v7419_v11 }
 0x360   :  { %5771 = vmatprep.subr.bf16.mxu0 %v7422_v13 }
 0x362   :  { %5608 = vmatpush1.bf16.msra.mxu1 %v7417_v14 }
 0x363   :  { %5772 = vmatpush1.bf16.msra.mxu0 %v7420_v15  ;;  %5609 = vmatprep.subr.bf16.mxu1 %v7425_v16 }
 0x364   :  { %5773 = vmatprep.subr.bf16.mxu0 %v7428_v17 }
 0x366   :  { %5610 = vmatpush1.bf16.msra.mxu1 %v7423_v18 }
 0x367   :  { %5774 = vmatpush1.bf16.msra.mxu0 %v7426_v36  ;;  %5611 = vmatprep.subr.bf16.mxu1 %v7431_v22 }
 0x368   :  { %5775 = vmatprep.subr.bf16.mxu0 %v7434_v24 }
 0x36a   :  { %5612 = vmatpush1.bf16.msra.mxu1 %v7429_v27 }
 0x36b   :  { %5776 = vmatpush1.bf16.msra.mxu0 %v7432_v57  ;;  %5613 = vmatprep.subr.bf16.mxu1 %v7437_v28 }
 0x36c   :  { %5777 = vmatprep.subr.bf16.mxu0 %v7440_v29  ;;  %v7489_v29 = vld [vmem:[#allocation16 + $0x380] ss:$28 sps:$4 sm:$0xff]  }
 0x36e   :  { %5614 = vmatpush1.bf16.msra.mxu1 %v7435_v30  ;;  %v7492_v30 = vld [vmem:[#allocation16 + $0x388] ss:$28 sps:$4 sm:$0xff]  }
 0x36f   :  { %5778 = vmatpush1.bf16.msra.mxu0 %v7438_v31  ;;  %5615 = vmatprep.subr.bf16.mxu1 %v7443_v32  ;;  %v7497_v32 = vld [vmem:[#allocation16 + $0x3bc] ss:$28 sps:$4 sm:$0xff]  }
 0x370   :  { %5779 = vmatprep.subr.bf16.mxu0 %v7446_v33  ;;  %v7500_v33 = vld [vmem:[#allocation16 + $0x3c4] ss:$28 sps:$4 sm:$0xff]  }
 0x372   :  { %5616 = vmatpush1.bf16.msra.mxu1 %v7441_v19 }
 0x373   :  { %5780 = vmatpush1.bf16.msra.mxu0 %v7444_v20  ;;  %5617 = vmatprep.subr.bf16.mxu1 %v7449_v21  ;;  %v7495_v20 = vld [vmem:[#allocation16 + $0x3b8] ss:$28 sps:$4 sm:$0xff]   ;;  %v7498_v21 = vld [vmem:[#allocation16 + $0x3c0] ss:$28 sps:$4 sm:$0xff]  }
 0x374   :  { %5781 = vmatprep.subr.bf16.mxu0 %v7452_v23  ;;  %v7503_v23 = vld [vmem:[#allocation16 + $0x3f4] ss:$28 sps:$4 sm:$0xff]  }
 0x376   :  { %5618 = vmatpush1.bf16.msra.mxu1 %v7447_v25  ;;  %v7506_v25 = vld [vmem:[#allocation16 + $0x3fc] ss:$28 sps:$4 sm:$0xff]  }
 0x377   :  { %5782 = vmatpush1.bf16.msra.mxu0 %v7450_v26  ;;  %5619 = vmatprep.subr.bf16.mxu1 %v7455_v34  ;;  %v7501_v26 = vld [vmem:[#allocation16 + $0x3f0] ss:$28 sps:$4 sm:$0xff]   ;;  %v7504_v34 = vld [vmem:[#allocation16 + $0x3f8] ss:$28 sps:$4 sm:$0xff]  }
 0x378   :  { %5783 = vmatprep.subr.bf16.mxu0 %v7458_v37  ;;  %v7509_v37 = vld [vmem:[#allocation16 + $0x42c] ss:$28 sps:$4 sm:$0xff]  }
 0x37a   :  { %5620 = vmatpush1.bf16.msra.mxu1 %v7453_v39  ;;  %v7512_v39 = vld [vmem:[#allocation16 + $0x434] ss:$28 sps:$4 sm:$0xff]  }
 0x37b   :  { %5784 = vmatpush1.bf16.msra.mxu0 %v7456_v40  ;;  %5621 = vmatprep.subr.bf16.mxu1 %v7461_v41  ;;  %v7507_v40 = vld [vmem:[#allocation16 + $0x428] ss:$28 sps:$4 sm:$0xff]   ;;  %v7510_v41 = vld [vmem:[#allocation16 + $0x430] ss:$28 sps:$4 sm:$0xff]  }
 0x37c   :  { %5785 = vmatprep.subr.bf16.mxu0 %v7464_v43  ;;  %v7515_v43 = vld [vmem:[#allocation16 + $0x464] ss:$28 sps:$4 sm:$0xff]  }
 0x37e   :  { %5622 = vmatpush1.bf16.msra.mxu1 %v7459_v45  ;;  %v7518_v45 = vld [vmem:[#allocation16 + $0x46c] ss:$28 sps:$4 sm:$0xff]  }
 0x37f   :  { %5786 = vmatpush1.bf16.msra.mxu0 %v7462_v46  ;;  %5623 = vmatprep.subr.bf16.mxu1 %v7467_v47  ;;  %v7513_v46 = vld [vmem:[#allocation16 + $0x460] ss:$28 sps:$4 sm:$0xff]   ;;  %v7516_v47 = vld [vmem:[#allocation16 + $0x468] ss:$28 sps:$4 sm:$0xff]  }
 0x380   :  { %5787 = vmatprep.subr.bf16.mxu0 %v7470_v48  ;;  %v7521_v48 = vld [vmem:[#allocation16 + $0x49c] ss:$28 sps:$4 sm:$0xff]  }
 0x382   :  { %5624 = vmatpush1.bf16.msra.mxu1 %v7465_v49  ;;  %v7524_v49 = vld [vmem:[#allocation16 + $0x4a4] ss:$28 sps:$4 sm:$0xff]  }
 0x383   :  { %5788 = vmatpush1.bf16.msra.mxu0 %v7468_v50  ;;  %5625 = vmatprep.subr.bf16.mxu1 %v7473_v51  ;;  %v7519_v50 = vld [vmem:[#allocation16 + $0x498] ss:$28 sps:$4 sm:$0xff]   ;;  %v7522_v51 = vld [vmem:[#allocation16 + $0x4a0] ss:$28 sps:$4 sm:$0xff]  }
 0x384   :  { %5789 = vmatprep.subr.bf16.mxu0 %v7476_v52  ;;  %v7527_v52 = vld [vmem:[#allocation16 + $0x4d4] ss:$28 sps:$4 sm:$0xff]  }
 0x386   :  { %5626 = vmatpush1.bf16.msra.mxu1 %v7471_v53  ;;  %v7530_v53 = vld [vmem:[#allocation16 + $0x4dc] ss:$28 sps:$4 sm:$0xff]  }
 0x387   :  { %5790 = vmatpush1.bf16.msra.mxu0 %v7474_v54  ;;  %5627 = vmatprep.subr.bf16.mxu1 %v7479_v56  ;;  %v7525_v54 = vld [vmem:[#allocation16 + $0x4d0] ss:$28 sps:$4 sm:$0xff]   ;;  %v7528_v56 = vld [vmem:[#allocation16 + $0x4d8] ss:$28 sps:$4 sm:$0xff]  }
 0x388   :  { %5791 = vmatprep.subr.bf16.mxu0 %v7482_v59  ;;  %v7533_v59 = vld [vmem:[#allocation16 + $0x50c] ss:$28 sps:$4 sm:$0xff]  }
 0x38a   :  { %5628 = vmatpush1.bf16.msra.mxu1 %v7477_v60  ;;  %v7536_v60 = vld [vmem:[#allocation16 + $0x514] ss:$28 sps:$4 sm:$0xff]  }
 0x38b   :  { %5792 = vmatpush1.bf16.msra.mxu0 %v7480_v61  ;;  %5629 = vmatprep.subr.bf16.mxu1 %v7485_v62  ;;  %v7531_v61 = vld [vmem:[#allocation16 + $0x508] ss:$28 sps:$4 sm:$0xff]   ;;  %v7534_v62 = vld [vmem:[#allocation16 + $0x510] ss:$28 sps:$4 sm:$0xff]  }
 0x38c   :  { %5793 = vmatprep.subr.bf16.mxu0 %v7488_v63  ;;  %v7539_v63 = vld [vmem:[#allocation16 + $0x544] ss:$28 sps:$4 sm:$0xff]  }
 0x38e   :  { %5630 = vmatpush1.bf16.msra.mxu1 %v7483_v0  ;;  %v7542_v0 = vld [vmem:[#allocation16 + $0x54c] ss:$28 sps:$4 sm:$0xff]  }
 0x38f   :  { %5794 = vmatpush1.bf16.msra.mxu0 %v7486_v10  ;;  %5640 = vmatprep.subr.bf16.mxu1 %v7491_v1  ;;  %v7537_v10 = vld [vmem:[#allocation16 + $0x540] ss:$28 sps:$4 sm:$0xff]   ;;  %v7540_v1 = vld [vmem:[#allocation16 + $0x548] ss:$28 sps:$4 sm:$0xff]  }
 0x390   :  { %5804 = vmatprep.subr.bf16.mxu0 %v7494_v2  ;;  %v7545_v2 = vld [vmem:[#allocation16 + $0x57c] ss:$28 sps:$4 sm:$0xff]  }
 0x3a4   :  { %v2469_v7 = vpop.f32.mrb[0].mxu1  ;;  %v8589_v8 = vpop.f32.mrb[12].mxu0 }
 0x3a5   :  { %v7191_v9 = vadd.f32 %v2469_v7, %v1077_v4  ;;  %v2471_v12 = vpop.f32.mrb[1].mxu1  ;;  %v2553_v38 = vpop.f32.mrb[13].mxu0  ;;  %v7548_v4 = vld [vmem:[#allocation16 + $0x584] ss:$28 sps:$4 sm:$0xff]   ;;  %v7551_v7 = vld [vmem:[#allocation16 + $0x5b4] ss:$28 sps:$4 sm:$0xff]  }
 0x3a6   :  { %v7192_v11 = vadd.f32 %v2471_v12, %v1081_v5  ;;  %v7194_v13 = vadd.f32 %v2553_v38, %v1089_v6  ;;  %v2473_v14 = vpop.f32.mrb[2].mxu1  ;;  %v2555_v15 = vpop.f32.mrb[14].mxu0  ;;  %v7543_v5 = vld [vmem:[#allocation16 + $0x578] ss:$28 sps:$4 sm:$0xff]   ;;  %v7546_v6 = vld [vmem:[#allocation16 + $0x580] ss:$28 sps:$4 sm:$0xff]  }
 0x3a7   :  { %v2722_v16 = vmul.f32 0.2, %v7191_v9  ;;  %v2474_v17 = vpop.f32.mrb[3].mxu1  ;;  %v2556_v18 = vpop.f32.mrb[15].mxu0  ;;  %v7549_v12 = vld [vmem:[#allocation16 + $0x5b0] ss:$28 sps:$4 sm:$0xff]  }
 0x3a8   :  { %v2723_v36 = vmul.f32 0.2, %v7192_v11  ;;  %v2725_v22 = vmul.f32 0.2, %v7194_v13  ;;  %v7552_v38 = vld [vmem:[#allocation16 + $0x5b8] ss:$28 sps:$4 sm:$0xff]  }
 0x3a9   :  { %v2730_v24 = vmax.f32 %v7191_v9, %v2722_v16  ;;  %v7554_v9 = vld [vmem:[#allocation16 + $0x5bc] ss:$28 sps:$4 sm:$0xff]   ;;  %v7555_v14 = vld [vmem:[#allocation16 + $0x5e8] ss:$28 sps:$4 sm:$0xff]   ;;  %v7558_v15 = vld [vmem:[#allocation16 + $0x5f0] ss:$28 sps:$4 sm:$0xff]  }
 0x3aa   :  { %v2731_v27 = vmax.f32 %v7192_v11, %v2723_v36  ;;  %v2733_v57 = vmax.f32 %v7194_v13, %v2725_v22  ;;  %v7557_v11 = vld [vmem:[#allocation16 + $0x5ec] ss:$28 sps:$4 sm:$0xff]   ;;  %v7560_v13 = vld [vmem:[#allocation16 + $0x5f4] ss:$28 sps:$4 sm:$0xff]   ;;  %v7563_v16 = vld [vmem:[#allocation16 + $0x624] ss:$28 sps:$4 sm:$0xff]   ;;  %v1085_v22 = vrot.slane %v8581_v3, %v8556_v55 }
 0x3ab   :  { %v8593_v31 = vpack.c.bf16 %v2730_v24, %v2730_v24  ;;  %v7566_v17 = vld [vmem:[#allocation16 + $0x62c] ss:$28 sps:$4 sm:$0xff]   ;;  %v7561_v18 = vld [vmem:[#allocation16 + $0x620] ss:$28 sps:$4 sm:$0xff]  }
 0x3ac   :  { %v8591_v28 = vpack.c.bf16 %v2731_v27, %v2731_v27  ;;  %v8597_v19 = vpack.c.bf16 %v2733_v57, %v2733_v57  ;;  %v7564_v36 = vld [vmem:[#allocation16 + $0x628] ss:$28 sps:$4 sm:$0xff]   ;;  %v7569_v24 = vld [vmem:[#allocation16 + $0x65c] ss:$28 sps:$4 sm:$0xff]  }
 0x3ad   :  { %v7572_v27 = vld [vmem:[#allocation16 + $0x664] ss:$28 sps:$4 sm:$0xff]   ;;  %v7567_v57 = vld [vmem:[#allocation16 + $0x658] ss:$28 sps:$4 sm:$0xff]  }
 0x3ae   :  { %5631 = vmatprep.mubr.bf16.mxu1 %v8591_v28  ;;  %5795 = vmatprep.mubr.bf16.mxu0 %v8591_v28 }
 0x3af   :  { %5632 = vmatmul.mubr.bf16.vlgmr.msra.gmra.mrb[8].mxu1 %v8593_v31  ;;  %5796 = vmatmul.mubr.bf16.vlgmr.msra.gmra.mrb[20].mxu0 %v8593_v31 }
 0x3b0   :  { %5641 = vmatpush1.bf16.msra.mxu1 %v7489_v29  ;;  %5805 = vmatpush1.bf16.msra.mxu0 %v7492_v30  ;;  %v7570_v29 = vld [vmem:[#allocation16 + $0x660] ss:$28 sps:$4 sm:$0xff]   ;;  %v7193_v30 = vadd.f32 %v8589_v8, %v1085_v22  ;;  %v7639_v22 = vld [vmem:[#allocation16 + $0x8f8] ss:$28 sps:$4 sm:$0xff]  }
 0x3b1   :  { %5672 = vmatprep.mubr.bf16.mxu1 %v8597_v19  ;;  %5836 = vmatprep.mubr.bf16.mxu0 %v8597_v19  ;;  %v7587_v8 = vld [vmem:[#allocation16 + $0x704] ss:$28 sps:$4 sm:$0xff]  }
 0x3b2   :  { %5642 = vmatprep.subr.bf16.mxu1 %v7497_v32  ;;  %5806 = vmatprep.subr.bf16.mxu0 %v7500_v33  ;;  %v7575_v32 = vld [vmem:[#allocation16 + $0x694] ss:$28 sps:$4 sm:$0xff]   ;;  %v7578_v33 = vld [vmem:[#allocation16 + $0x69c] ss:$28 sps:$4 sm:$0xff]  }
 0x3b4   :  { %5643 = vmatpush1.bf16.msra.mxu1 %v7495_v20  ;;  %5807 = vmatpush1.bf16.msra.mxu0 %v7498_v21  ;;  %v7573_v20 = vld [vmem:[#allocation16 + $0x690] ss:$28 sps:$4 sm:$0xff]   ;;  %v7576_v21 = vld [vmem:[#allocation16 + $0x698] ss:$28 sps:$4 sm:$0xff]  }
 0x3b5   :  { %5644 = vmatprep.subr.bf16.mxu1 %v7503_v23  ;;  %5808 = vmatprep.subr.bf16.mxu0 %v7506_v25  ;;  %v2724_v23 = vmul.f32 0.2, %v7193_v30  ;;  %v7581_v25 = vld [vmem:[#allocation16 + $0x6cc] ss:$28 sps:$4 sm:$0xff]  }
 0x3b8   :  { %5645 = vmatpush1.bf16.msra.mxu1 %v7501_v26  ;;  %5809 = vmatpush1.bf16.msra.mxu0 %v7504_v34  ;;  %v7584_v26 = vld [vmem:[#allocation16 + $0x6d4] ss:$28 sps:$4 sm:$0xff]   ;;  %v7579_v34 = vld [vmem:[#allocation16 + $0x6c8] ss:$28 sps:$4 sm:$0xff]  }
 0x3b9   :  { %5646 = vmatprep.subr.bf16.mxu1 %v7509_v37  ;;  %5810 = vmatprep.subr.bf16.mxu0 %v7512_v39  ;;  %v7582_v37 = vld [vmem:[#allocation16 + $0x6d0] ss:$28 sps:$4 sm:$0xff]   ;;  %v2732_v39 = vmax.f32 %v7193_v30, %v2724_v23  ;;  %v7648_v30 = vld [vmem:[#allocation16 + $0x938] ss:$28 sps:$4 sm:$0xff]   ;;  %v7659_v23 = vld [vmem:[#allocation16 + $0x9a4] ss:$28 sps:$4 sm:$0xff]  }
 0x3bc   :  { %5647 = vmatpush1.bf16.msra.mxu1 %v7507_v40  ;;  %5811 = vmatpush1.bf16.msra.mxu0 %v7510_v41  ;;  %v7590_v40 = vld [vmem:[#allocation16 + $0x70c] ss:$28 sps:$4 sm:$0xff]   ;;  %v7585_v41 = vld [vmem:[#allocation16 + $0x700] ss:$28 sps:$4 sm:$0xff]  }
 0x3bd   :  { %5648 = vmatprep.subr.bf16.mxu1 %v7515_v43  ;;  %5812 = vmatprep.subr.bf16.mxu0 %v7518_v45  ;;  %v7588_v43 = vld [vmem:[#allocation16 + $0x708] ss:$28 sps:$4 sm:$0xff]   ;;  %v8606_v45 = vpack.c.bf16 %v2732_v39, %v2732_v39 }
 0x3be   :  { %v7668_v39 = vld [vmem:[#allocation16 + $0x9e4] ss:$28 sps:$4 sm:$0xff]  }
 0x3c0   :  { %5649 = vmatpush1.bf16.msra.mxu1 %v7513_v46  ;;  %5813 = vmatpush1.bf16.msra.mxu0 %v7516_v47  ;;  %v7593_v46 = vld [vmem:[#allocation16 + $0x73c] ss:$28 sps:$4 sm:$0xff]   ;;  %v7596_v47 = vld [vmem:[#allocation16 + $0x744] ss:$28 sps:$4 sm:$0xff]  }
 0x3c1   :  { %5650 = vmatprep.subr.bf16.mxu1 %v7521_v48  ;;  %5814 = vmatprep.subr.bf16.mxu0 %v7524_v49  ;;  %v7591_v48 = vld [vmem:[#allocation16 + $0x738] ss:$28 sps:$4 sm:$0xff]   ;;  %v7594_v49 = vld [vmem:[#allocation16 + $0x740] ss:$28 sps:$4 sm:$0xff]  }
 0x3c4   :  { %5651 = vmatpush1.bf16.msra.mxu1 %v7519_v50  ;;  %5815 = vmatpush1.bf16.msra.mxu0 %v7522_v51  ;;  %v7599_v50 = vld [vmem:[#allocation16 + $0x774] ss:$28 sps:$4 sm:$0xff]   ;;  %v7602_v51 = vld [vmem:[#allocation16 + $0x77c] ss:$28 sps:$4 sm:$0xff]  }
 0x3c5   :  { %5652 = vmatprep.subr.bf16.mxu1 %v7527_v52  ;;  %5816 = vmatprep.subr.bf16.mxu0 %v7530_v53  ;;  %v7597_v52 = vld [vmem:[#allocation16 + $0x770] ss:$28 sps:$4 sm:$0xff]   ;;  %v7600_v53 = vld [vmem:[#allocation16 + $0x778] ss:$28 sps:$4 sm:$0xff]  }
 0x3c8   :  { %5653 = vmatpush1.bf16.msra.mxu1 %v7525_v54  ;;  %5817 = vmatpush1.bf16.msra.mxu0 %v7528_v56  ;;  %v7605_v54 = vld [vmem:[#allocation16 + $0x7ac] ss:$28 sps:$4 sm:$0xff]   ;;  %v7608_v56 = vld [vmem:[#allocation16 + $0x7b4] ss:$28 sps:$4 sm:$0xff]  }
 0x3c9   :  { %5654 = vmatprep.subr.bf16.mxu1 %v7533_v59  ;;  %5818 = vmatprep.subr.bf16.mxu0 %v7536_v60  ;;  %v7603_v59 = vld [vmem:[#allocation16 + $0x7a8] ss:$28 sps:$4 sm:$0xff]   ;;  %v7606_v60 = vld [vmem:[#allocation16 + $0x7b0] ss:$28 sps:$4 sm:$0xff]  }
 0x3cc   :  { %5655 = vmatpush1.bf16.msra.mxu1 %v7531_v61  ;;  %5819 = vmatpush1.bf16.msra.mxu0 %v7534_v62  ;;  %v7611_v61 = vld [vmem:[#allocation16 + $0x7e4] ss:$28 sps:$4 sm:$0xff]   ;;  %v7614_v62 = vld [vmem:[#allocation16 + $0x7ec] ss:$28 sps:$4 sm:$0xff]  }
 0x3cd   :  { %5656 = vmatprep.subr.bf16.mxu1 %v7539_v63  ;;  %5820 = vmatprep.subr.bf16.mxu0 %v7542_v0  ;;  %v7609_v63 = vld [vmem:[#allocation16 + $0x7e0] ss:$28 sps:$4 sm:$0xff]   ;;  %v7612_v0 = vld [vmem:[#allocation16 + $0x7e8] ss:$28 sps:$4 sm:$0xff]  }
 0x3d0   :  { %5657 = vmatpush1.bf16.msra.mxu1 %v7537_v10  ;;  %5821 = vmatpush1.bf16.msra.mxu0 %v7540_v1  ;;  %v7617_v10 = vld [vmem:[#allocation16 + $0x81c] ss:$28 sps:$4 sm:$0xff]   ;;  %v7620_v1 = vld [vmem:[#allocation16 + $0x824] ss:$28 sps:$4 sm:$0xff]  }
 0x3d1   :  { %5658 = vmatprep.subr.bf16.mxu1 %v7545_v2  ;;  %5822 = vmatprep.subr.bf16.mxu0 %v7548_v4  ;;  %v7615_v2 = vld [vmem:[#allocation16 + $0x818] ss:$28 sps:$4 sm:$0xff]   ;;  %v7618_v4 = vld [vmem:[#allocation16 + $0x820] ss:$28 sps:$4 sm:$0xff]  }
 0x3d4   :  { %5659 = vmatpush1.bf16.msra.mxu1 %v7543_v5  ;;  %5823 = vmatpush1.bf16.msra.mxu0 %v7546_v6  ;;  %v7623_v5 = vld [vmem:[#allocation16 + $0x854] ss:$28 sps:$4 sm:$0xff]   ;;  %v7626_v6 = vld [vmem:[#allocation16 + $0x85c] ss:$28 sps:$4 sm:$0xff]  }
 0x3d5   :  { %5660 = vmatprep.subr.bf16.mxu1 %v7551_v7  ;;  %5824 = vmatprep.subr.bf16.mxu0 %v7554_v9  ;;  %v7621_v7 = vld [vmem:[#allocation16 + $0x850] ss:$28 sps:$4 sm:$0xff]   ;;  %v7624_v9 = vld [vmem:[#allocation16 + $0x858] ss:$28 sps:$4 sm:$0xff]  }
 0x3d8   :  { %5661 = vmatpush1.bf16.msra.mxu1 %v7549_v12  ;;  %5825 = vmatpush1.bf16.msra.mxu0 %v7552_v38  ;;  %v7629_v12 = vld [vmem:[#allocation16 + $0x88c] ss:$28 sps:$4 sm:$0xff]   ;;  %v7632_v38 = vld [vmem:[#allocation16 + $0x894] ss:$28 sps:$4 sm:$0xff]  }
 0x3d9   :  { %5662 = vmatprep.subr.bf16.mxu1 %v7557_v11  ;;  %5826 = vmatprep.subr.bf16.mxu0 %v7560_v13  ;;  %v7627_v11 = vld [vmem:[#allocation16 + $0x888] ss:$28 sps:$4 sm:$0xff]   ;;  %v7630_v13 = vld [vmem:[#allocation16 + $0x890] ss:$28 sps:$4 sm:$0xff]  }
 0x3dc   :  { %5663 = vmatpush1.bf16.msra.mxu1 %v7555_v14  ;;  %5827 = vmatpush1.bf16.msra.mxu0 %v7558_v15  ;;  %v7635_v14 = vld [vmem:[#allocation16 + $0x8c4] ss:$28 sps:$4 sm:$0xff]   ;;  %v7638_v15 = vld [vmem:[#allocation16 + $0x8cc] ss:$28 sps:$4 sm:$0xff]  }
 0x3dd   :  { %5664 = vmatprep.subr.bf16.mxu1 %v7563_v16  ;;  %5828 = vmatprep.subr.bf16.mxu0 %v7566_v17  ;;  %v7633_v16 = vld [vmem:[#allocation16 + $0x8c0] ss:$28 sps:$4 sm:$0xff]   ;;  %v7636_v17 = vld [vmem:[#allocation16 + $0x8c8] ss:$28 sps:$4 sm:$0xff]  }
 0x3e0   :  { %5665 = vmatpush1.bf16.msra.mxu1 %v7561_v18  ;;  %5829 = vmatpush1.bf16.msra.mxu0 %v7564_v36  ;;  %v7641_v18 = vld [vmem:[#allocation16 + $0x8fc] ss:$28 sps:$4 sm:$0xff]   ;;  %v7644_v36 = vld [vmem:[#allocation16 + $0x904] ss:$28 sps:$4 sm:$0xff]  }
 0x3e1   :  { %5666 = vmatprep.subr.bf16.mxu1 %v7569_v24  ;;  %5830 = vmatprep.subr.bf16.mxu0 %v7572_v27  ;;  %v7642_v24 = vld [vmem:[#allocation16 + $0x900] ss:$28 sps:$4 sm:$0xff]   ;;  %v7647_v27 = vld [vmem:[#allocation16 + $0x934] ss:$28 sps:$4 sm:$0xff]  }
 0x3e4   :  { %5667 = vmatpush1.bf16.msra.mxu1 %v7567_v57  ;;  %5831 = vmatpush1.bf16.msra.mxu0 %v7570_v29  ;;  %v7650_v57 = vld [vmem:[#allocation16 + $0x93c] ss:$28 sps:$4 sm:$0xff]   ;;  %v7645_v29 = vld [vmem:[#allocation16 + $0x930] ss:$28 sps:$4 sm:$0xff]  }
 0x3e5   :  { %5668 = vmatprep.subr.bf16.mxu1 %v7575_v32  ;;  %5832 = vmatprep.subr.bf16.mxu0 %v7578_v33  ;;  %v7653_v32 = vld [vmem:[#allocation16 + $0x96c] ss:$28 sps:$4 sm:$0xff]   ;;  %v7656_v33 = vld [vmem:[#allocation16 + $0x974] ss:$28 sps:$4 sm:$0xff]  }
 0x3e8   :  { %5669 = vmatpush1.bf16.msra.mxu1 %v7573_v20  ;;  %5833 = vmatpush1.bf16.msra.mxu0 %v7576_v21  ;;  %v7651_v20 = vld [vmem:[#allocation16 + $0x968] ss:$28 sps:$4 sm:$0xff]   ;;  %v7654_v21 = vld [vmem:[#allocation16 + $0x970] ss:$28 sps:$4 sm:$0xff]  }
 0x3e9   :  { %5670 = vmatprep.subr.bf16.mxu1 %v7581_v25  ;;  %5834 = vmatprep.subr.bf16.mxu0 %v7584_v26  ;;  %v7662_v25 = vld [vmem:[#allocation16 + $0x9ac] ss:$28 sps:$4 sm:$0xff]   ;;  %v7657_v26 = vld [vmem:[#allocation16 + $0x9a0] ss:$28 sps:$4 sm:$0xff]  }
 0x3ec   :  { %5671 = vmatpush1.bf16.msra.mxu1 %v7579_v34  ;;  %5835 = vmatpush1.bf16.msra.mxu0 %v7582_v37  ;;  %v7660_v34 = vld [vmem:[#allocation16 + $0x9a8] ss:$28 sps:$4 sm:$0xff]   ;;  %v7665_v37 = vld [vmem:[#allocation16 + $0x9dc] ss:$28 sps:$4 sm:$0xff]  }
 0x3ed   :  { %5681 = vmatprep.subr.bf16.mxu1 %v7587_v8  ;;  %5845 = vmatprep.subr.bf16.mxu0 %v7590_v40  ;;  %v1092_v8 = vsub.s32 4, %v8505_v35  ;;  %v1096_v40 = vsub.s32 5, %v8505_v35 }
 0x3ef   :  { %5673 = vmatmul.mubr.bf16.vlgmr.msra.gmra.mrb[8].mxu1 %v8606_v45  ;;  %5837 = vmatmul.mubr.bf16.vlgmr.msra.gmra.mrb[20].mxu0 %v8606_v45 }
 0x3f0   :  { %5682 = vmatpush1.bf16.msra.mxu1 %v7585_v41  ;;  %5846 = vmatpush1.bf16.msra.mxu0 %v7588_v43  ;;  %v1104_v41 = vsub.s32 7, %v8505_v35  ;;  %v7663_v43 = vld [vmem:[#allocation16 + $0x9d8] ss:$28 sps:$4 sm:$0xff]  }
 0x3f1   :  { %5683 = vmatprep.subr.bf16.mxu1 %v7593_v46  ;;  %5847 = vmatprep.subr.bf16.mxu0 %v7596_v47  ;;  %v7666_v46 = vld [vmem:[#allocation16 + $0x9e0] ss:$28 sps:$4 sm:$0xff]   ;;  %v1093_v47 = vrot.slane %v8581_v3, %v1092_v8 }
 0x3f4   :  { %5684 = vmatpush1.bf16.msra.mxu1 %v7591_v48  ;;  %5848 = vmatpush1.bf16.msra.mxu0 %v7594_v49  ;;  %v7671_v48 = vld [vmem:[#allocation16 + $0xa14] ss:$28 sps:$4 sm:$0xff]   ;;  %v7674_v49 = vld [vmem:[#allocation16 + $0xa1c] ss:$28 sps:$4 sm:$0xff]  }
 0x3f5   :  { %5685 = vmatprep.subr.bf16.mxu1 %v7599_v50  ;;  %5849 = vmatprep.subr.bf16.mxu0 %v7602_v51  ;;  %v1097_v50 = vrot.slane %v8581_v3, %v1096_v40  ;;  %v1105_v51 = vrot.slane %v8581_v3, %v1104_v41  ;;  %v7705_v41 = vld [vmem:[#allocation16 + $0xb60] ss:$28 sps:$4 sm:$0xff]  }
 0x3f8   :  { %5686 = vmatpush1.bf16.msra.mxu1 %v7597_v52  ;;  %5850 = vmatpush1.bf16.msra.mxu0 %v7600_v53  ;;  %v7669_v53 = vld [vmem:[#allocation16 + $0xa10] ss:$28 sps:$4 sm:$0xff]  }
 0x3f9   :  { %5687 = vmatprep.subr.bf16.mxu1 %v7605_v54  ;;  %5851 = vmatprep.subr.bf16.mxu0 %v7608_v56  ;;  %v7672_v54 = vld [vmem:[#allocation16 + $0xa18] ss:$28 sps:$4 sm:$0xff]  }
 0x3fc   :  { %5688 = vmatpush1.bf16.msra.mxu1 %v7603_v59  ;;  %5852 = vmatpush1.bf16.msra.mxu0 %v7606_v60 }
 0x3fd   :  { %5689 = vmatprep.subr.bf16.mxu1 %v7611_v61  ;;  %5853 = vmatprep.subr.bf16.mxu0 %v7614_v62  ;;  %v7677_v61 = vld [vmem:[#allocation16 + $0xa4c] ss:$28 sps:$4 sm:$0xff]   ;;  %v7680_v62 = vld [vmem:[#allocation16 + $0xa54] ss:$28 sps:$4 sm:$0xff]  }
 0x400   :  { %5690 = vmatpush1.bf16.msra.mxu1 %v7609_v63  ;;  %5854 = vmatpush1.bf16.msra.mxu0 %v7612_v0 }
 0x401   :  { %5691 = vmatprep.subr.bf16.mxu1 %v7617_v10  ;;  %5855 = vmatprep.subr.bf16.mxu0 %v7620_v1 }
 0x404   :  { %5692 = vmatpush1.bf16.msra.mxu1 %v7615_v2  ;;  %5856 = vmatpush1.bf16.msra.mxu0 %v7618_v4 }
 0x405   :  { %5693 = vmatprep.subr.bf16.mxu1 %v7623_v5  ;;  %5857 = vmatprep.subr.bf16.mxu0 %v7626_v6  ;;  %v7675_v6 = vld [vmem:[#allocation16 + $0xa48] ss:$28 sps:$4 sm:$0xff]  }
 0x408   :  { %5694 = vmatpush1.bf16.msra.mxu1 %v7621_v7  ;;  %5858 = vmatpush1.bf16.msra.mxu0 %v7624_v9 }
 0x409   :  { %5695 = vmatprep.subr.bf16.mxu1 %v7629_v12  ;;  %5859 = vmatprep.subr.bf16.mxu0 %v7632_v38  ;;  %v7678_v12 = vld [vmem:[#allocation16 + $0xa50] ss:$28 sps:$4 sm:$0xff]  }
 0x40c   :  { %5696 = vmatpush1.bf16.msra.mxu1 %v7627_v11  ;;  %5860 = vmatpush1.bf16.msra.mxu0 %v7630_v13  ;;  %v7683_v13 = vld [vmem:[#allocation16 + $0xa84] ss:$28 sps:$4 sm:$0xff]  }
 0x40d   :  { %5697 = vmatprep.subr.bf16.mxu1 %v7635_v14  ;;  %5861 = vmatprep.subr.bf16.mxu0 %v7638_v15  ;;  %v7686_v14 = vld [vmem:[#allocation16 + $0xa8c] ss:$28 sps:$4 sm:$0xff]  }
 0x410   :  { %5698 = vmatpush1.bf16.msra.mxu1 %v7633_v16  ;;  %5862 = vmatpush1.bf16.msra.mxu0 %v7636_v17 }
 0x411   :  { %5699 = vmatprep.subr.bf16.mxu1 %v7641_v18  ;;  %5863 = vmatprep.subr.bf16.mxu0 %v7644_v36  ;;  %v7681_v18 = vld [vmem:[#allocation16 + $0xa80] ss:$28 sps:$4 sm:$0xff]   ;;  %v7684_v36 = vld [vmem:[#allocation16 + $0xa88] ss:$28 sps:$4 sm:$0xff]  }
 0x414   :  { %5700 = vmatpush1.bf16.msra.mxu1 %v7639_v22  ;;  %5864 = vmatpush1.bf16.msra.mxu0 %v7642_v24  ;;  %v7689_v24 = vld [vmem:[#allocation16 + $0xabc] ss:$28 sps:$4 sm:$0xff]  }
 0x415   :  { %5701 = vmatprep.subr.bf16.mxu1 %v7647_v27  ;;  %5865 = vmatprep.subr.bf16.mxu0 %v7650_v57  ;;  %v7692_v27 = vld [vmem:[#allocation16 + $0xac4] ss:$28 sps:$4 sm:$0xff]  }
 0x418   :  { %5702 = vmatpush1.bf16.msra.mxu1 %v7645_v29  ;;  %5866 = vmatpush1.bf16.msra.mxu0 %v7648_v30  ;;  %v7687_v29 = vld [vmem:[#allocation16 + $0xab8] ss:$28 sps:$4 sm:$0xff]   ;;  %v7690_v30 = vld [vmem:[#allocation16 + $0xac0] ss:$28 sps:$4 sm:$0xff]  }
 0x419   :  { %5703 = vmatprep.subr.bf16.mxu1 %v7653_v32  ;;  %5867 = vmatprep.subr.bf16.mxu0 %v7656_v33  ;;  %v7695_v32 = vld [vmem:[#allocation16 + $0xaf4] ss:$28 sps:$4 sm:$0xff]   ;;  %v7698_v33 = vld [vmem:[#allocation16 + $0xafc] ss:$28 sps:$4 sm:$0xff]  }
 0x41c   :  { %5704 = vmatpush1.bf16.msra.mxu1 %v7651_v20  ;;  %5868 = vmatpush1.bf16.msra.mxu0 %v7654_v21  ;;  %v7693_v20 = vld [vmem:[#allocation16 + $0xaf0] ss:$28 sps:$4 sm:$0xff]   ;;  %v7696_v21 = vld [vmem:[#allocation16 + $0xaf8] ss:$28 sps:$4 sm:$0xff]  }
 0x41d   :  { %5705 = vmatprep.subr.bf16.mxu1 %v7659_v23  ;;  %5869 = vmatprep.subr.bf16.mxu0 %v7662_v25  ;;  %v7701_v23 = vld [vmem:[#allocation16 + $0xb2c] ss:$28 sps:$4 sm:$0xff]   ;;  %v7704_v25 = vld [vmem:[#allocation16 + $0xb34] ss:$28 sps:$4 sm:$0xff]  }
 0x420   :  { %5706 = vmatpush1.bf16.msra.mxu1 %v7657_v26  ;;  %5870 = vmatpush1.bf16.msra.mxu0 %v7660_v34  ;;  %v7699_v26 = vld [vmem:[#allocation16 + $0xb28] ss:$28 sps:$4 sm:$0xff]   ;;  %v7702_v34 = vld [vmem:[#allocation16 + $0xb30] ss:$28 sps:$4 sm:$0xff]  }
 0x421   :  { %5707 = vmatprep.subr.bf16.mxu1 %v7665_v37  ;;  %5871 = vmatprep.subr.bf16.mxu0 %v7668_v39  ;;  %v7707_v37 = vld [vmem:[#allocation16 + $0xb64] ss:$28 sps:$4 sm:$0xff]   ;;  %v7710_v39 = vld [vmem:[#allocation16 + $0xb6c] ss:$28 sps:$4 sm:$0xff]  }
 0x424   :  { %5708 = vmatpush1.bf16.msra.mxu1 %v7663_v43  ;;  %5872 = vmatpush1.bf16.msra.mxu0 %v7666_v46  ;;  %v2633_v52 = vpop.f32.mrb[4].mxu1  ;;  %v7708_v43 = vld [vmem:[#allocation16 + $0xb68] ss:$28 sps:$4 sm:$0xff]   ;;  %v7713_v46 = vld [vmem:[#allocation16 + $0xb9c] ss:$28 sps:$4 sm:$0xff]  }
 0x425   :  { %v7195_v56 = vadd.f32 %v2633_v52, %v1093_v47  ;;  %v8620_v59 = vpop.f32.mrb[16].mxu0  ;;  %v2635_v60 = vpop.f32.mrb[5].mxu1  ;;  %5709 = vmatprep.subr.bf16.mxu1 %v7671_v48  ;;  %5873 = vmatprep.subr.bf16.mxu0 %v7674_v49  ;;  %v7716_v47 = vld [vmem:[#allocation16 + $0xba4] ss:$28 sps:$4 sm:$0xff]   ;;  %v7711_v48 = vld [vmem:[#allocation16 + $0xb98] ss:$28 sps:$4 sm:$0xff]  }
 0x426   :  { %v7196_v63 = vadd.f32 %v2635_v60, %v1097_v50  ;;  %v2717_v0 = vpop.f32.mrb[17].mxu0  ;;  %v2637_v10 = vpop.f32.mrb[6].mxu1  ;;  %v7714_v49 = vld [vmem:[#allocation16 + $0xba0] ss:$28 sps:$4 sm:$0xff]   ;;  %v7719_v50 = vld [vmem:[#allocation16 + $0xbd4] ss:$28 sps:$4 sm:$0xff]  }
 0x427   :  { %v2726_v1 = vmul.f32 0.2, %v7195_v56  ;;  %v7198_v2 = vadd.f32 %v2717_v0, %v1105_v51  ;;  %v2719_v4 = vpop.f32.mrb[18].mxu0  ;;  %v2638_v5 = vpop.f32.mrb[7].mxu1  ;;  %v7722_v51 = vld [vmem:[#allocation16 + $0xbdc] ss:$28 sps:$4 sm:$0xff]  }
 0x428   :  { %v2727_v7 = vmul.f32 0.2, %v7196_v63  ;;  %v2720_v9 = vpop.f32.mrb[19].mxu0  ;;  %5710 = vmatpush1.bf16.msra.mxu1 %v7669_v53  ;;  %5874 = vmatpush1.bf16.msra.mxu0 %v7672_v54  ;;  %v7717_v52 = vld [vmem:[#allocation16 + $0xbd0] ss:$28 sps:$4 sm:$0xff]  }
 0x429   :  { %v2734_v38 = vmax.f32 %v7195_v56, %v2726_v1  ;;  %v2729_v11 = vmul.f32 0.2, %v7198_v2  ;;  %5711 = vmatprep.subr.bf16.mxu1 %v7677_v61  ;;  %5875 = vmatprep.subr.bf16.mxu0 %v7680_v62  ;;  %v7720_v53 = vld [vmem:[#allocation16 + $0xbd8] ss:$28 sps:$4 sm:$0xff]   ;;  %v7725_v54 = vld [vmem:[#allocation16 + $0xc0c] ss:$28 sps:$4 sm:$0xff]  }
 0x42a   :  { %v2735_v15 = vmax.f32 %v7196_v63, %v2727_v7  ;;  %v7728_v56 = vld [vmem:[#allocation16 + $0xc14] ss:$28 sps:$4 sm:$0xff]   ;;  %v7723_v60 = vld [vmem:[#allocation16 + $0xc08] ss:$28 sps:$4 sm:$0xff]   ;;  %v7729_v0 = vld [vmem:[#allocation16 + $0xc40] ss:$28 sps:$4 sm:$0xff]  }
 0x42b   :  { %v2737_v16 = vmax.f32 %v7198_v2, %v2729_v11  ;;  %v8624_v22 = vpack.c.bf16 %v2734_v38, %v2734_v38  ;;  %v7726_v61 = vld [vmem:[#allocation16 + $0xc10] ss:$28 sps:$4 sm:$0xff]   ;;  %v7731_v62 = vld [vmem:[#allocation16 + $0xc44] ss:$28 sps:$4 sm:$0xff]   ;;  %v7737_v1 = vld [vmem:[#allocation16 + $0xc7c] ss:$28 sps:$4 sm:$0xff]  }
 0x42c   :  { %v8622_v17 = vpack.c.bf16 %v2735_v15, %v2735_v15  ;;  %5712 = vmatpush1.bf16.msra.mxu1 %v7675_v6  ;;  %5876 = vmatpush1.bf16.msra.mxu0 %v7678_v12  ;;  %v7734_v63 = vld [vmem:[#allocation16 + $0xc4c] ss:$28 sps:$4 sm:$0xff]   ;;  %v7740_v2 = vld [vmem:[#allocation16 + $0xc84] ss:$28 sps:$4 sm:$0xff]   ;;  %v7735_v4 = vld [vmem:[#allocation16 + $0xc78] ss:$28 sps:$4 sm:$0xff]  }
 0x42d   :  { %5722 = vmatprep.subr.bf16.mxu1 %v7683_v13  ;;  %5886 = vmatprep.subr.bf16.mxu0 %v7686_v14  ;;  %v8628_v57 = vpack.c.bf16 %v2737_v16, %v2737_v16  ;;  %v7732_v10 = vld [vmem:[#allocation16 + $0xc48] ss:$28 sps:$4 sm:$0xff]   ;;  %v7738_v5 = vld [vmem:[#allocation16 + $0xc80] ss:$28 sps:$4 sm:$0xff]   ;;  %v7743_v6 = vld [vmem:[#allocation16 + $0xcb4] ss:$28 sps:$4 sm:$0xff]  }
 0x42e   :  { %5713 = vmatprep.mubr.bf16.mxu1 %v8622_v17  ;;  %5877 = vmatprep.mubr.bf16.mxu0 %v8622_v17  ;;  %v7746_v7 = vld [vmem:[#allocation16 + $0xcbc] ss:$28 sps:$4 sm:$0xff]   ;;  %v7741_v9 = vld [vmem:[#allocation16 + $0xcb0] ss:$28 sps:$4 sm:$0xff]   ;;  %v7747_v13 = vld [vmem:[#allocation16 + $0xce8] ss:$28 sps:$4 sm:$0xff]  }
 0x42f   :  { %5714 = vmatmul.mubr.bf16.vlgmr.msra.gmra.mrb[8].mxu1 %v8624_v22  ;;  %5878 = vmatmul.mubr.bf16.vlgmr.msra.gmra.mrb[20].mxu0 %v8624_v22  ;;  %v7744_v12 = vld [vmem:[#allocation16 + $0xcb8] ss:$28 sps:$4 sm:$0xff]   ;;  %v7749_v38 = vld [vmem:[#allocation16 + $0xcec] ss:$28 sps:$4 sm:$0xff]   ;;  %v1100_v15 = vsub.s32 6, %v8505_v35 }
 0x430   :  { %5723 = vmatpush1.bf16.msra.mxu1 %v7681_v18  ;;  %5887 = vmatpush1.bf16.msra.mxu0 %v7684_v36  ;;  %v7752_v11 = vld [vmem:[#allocation16 + $0xcf4] ss:$28 sps:$4 sm:$0xff]   ;;  %v7755_v16 = vld [vmem:[#allocation16 + $0xd24] ss:$28 sps:$4 sm:$0xff]   ;;  %v7758_v18 = vld [vmem:[#allocation16 + $0xd2c] ss:$28 sps:$4 sm:$0xff]  }
 0x431   :  { %5754 = vmatprep.mubr.bf16.mxu1 %v8628_v57  ;;  %5918 = vmatprep.mubr.bf16.mxu0 %v8628_v57  ;;  %v7750_v14 = vld [vmem:[#allocation16 + $0xcf0] ss:$28 sps:$4 sm:$0xff]   ;;  %v7753_v36 = vld [vmem:[#allocation16 + $0xd20] ss:$28 sps:$4 sm:$0xff]  }
 0x432   :  { %5724 = vmatprep.subr.bf16.mxu1 %v7689_v24  ;;  %5888 = vmatprep.subr.bf16.mxu0 %v7692_v27  ;;  %v7756_v24 = vld [vmem:[#allocation16 + $0xd28] ss:$28 sps:$4 sm:$0xff]   ;;  %v1101_v27 = vrot.slane %v8581_v3, %v1100_v15 }
 0x433   :  { %v7773_v3 = vld [vmem:[#allocation16 + $0xdcc] ss:$28 sps:$4 sm:$0xff]  }
 0x434   :  { %5725 = vmatpush1.bf16.msra.mxu1 %v7687_v29  ;;  %5889 = vmatpush1.bf16.msra.mxu0 %v7690_v30  ;;  %v7761_v29 = vld [vmem:[#allocation16 + $0xd5c] ss:$28 sps:$4 sm:$0xff]   ;;  %v7764_v30 = vld [vmem:[#allocation16 + $0xd64] ss:$28 sps:$4 sm:$0xff]  }
 0x435   :  { %5726 = vmatprep.subr.bf16.mxu1 %v7695_v32  ;;  %5890 = vmatprep.subr.bf16.mxu0 %v7698_v33  ;;  %v7759_v32 = vld [vmem:[#allocation16 + $0xd58] ss:$28 sps:$4 sm:$0xff]   ;;  %v7762_v33 = vld [vmem:[#allocation16 + $0xd60] ss:$28 sps:$4 sm:$0xff]  }
 0x438   :  { %5727 = vmatpush1.bf16.msra.mxu1 %v7693_v20  ;;  %5891 = vmatpush1.bf16.msra.mxu0 %v7696_v21  ;;  %v7197_v20 = vadd.f32 %v8620_v59, %v1101_v27  ;;  %v7767_v21 = vld [vmem:[#allocation16 + $0xd94] ss:$28 sps:$4 sm:$0xff]  }
 0x439   :  { %5728 = vmatprep.subr.bf16.mxu1 %v7701_v23  ;;  %5892 = vmatprep.subr.bf16.mxu0 %v7704_v25  ;;  %v7770_v23 = vld [vmem:[#allocation16 + $0xd9c] ss:$28 sps:$4 sm:$0xff]   ;;  %v7765_v25 = vld [vmem:[#allocation16 + $0xd90] ss:$28 sps:$4 sm:$0xff]  }
 0x43a   :  { %v7779_v59 = vld [vmem:[#allocation16 + $0x14] ss:$28 sps:$4 sm:$0xff]  }
 0x43b   :  { %v7820_v27 = vld [vmem:[#allocation16 + $0x558] ss:$28 sps:$4 sm:$0xff]  }
 0x43c   :  { %5729 = vmatpush1.bf16.msra.mxu1 %v7699_v26  ;;  %5893 = vmatpush1.bf16.msra.mxu0 %v7702_v34  ;;  %v7768_v26 = vld [vmem:[#allocation16 + $0xd98] ss:$28 sps:$4 sm:$0xff]   ;;  %v2728_v34 = vmul.f32 0.2, %v7197_v20 }
 0x43d   :  { %5730 = vmatprep.subr.bf16.mxu1 %v7707_v37  ;;  %5894 = vmatprep.subr.bf16.mxu0 %v7710_v39  ;;  %v7776_v37 = vld [vmem:[#allocation16 + $0xdd4] ss:$28 sps:$4 sm:$0xff]   ;;  %v7771_v39 = vld [vmem:[#allocation16 + $0xdc8] ss:$28 sps:$4 sm:$0xff]  }
 0x440   :  { %5731 = vmatpush1.bf16.msra.mxu1 %v7705_v41  ;;  %5895 = vmatpush1.bf16.msra.mxu0 %v7708_v43  ;;  %v7774_v41 = vld [vmem:[#allocation16 + $0xdd0] ss:$28 sps:$4 sm:$0xff]   ;;  %v2736_v43 = vmax.f32 %v7197_v20, %v2728_v34  ;;  %v7822_v20 = vld [vmem:[#allocation16 + $0x208] ss:$28 sps:$4 sm:$0xff]  }
 0x441   :  { %5732 = vmatprep.subr.bf16.mxu1 %v7713_v46  ;;  %5896 = vmatprep.subr.bf16.mxu0 %v7716_v47  ;;  %v7780_v46 = vld [vmem:[#allocation16 + $0x1d8] ss:$28 sps:$4 sm:$0xff]   ;;  %v7777_v47 = vld [vmem:[#allocation16 + $0x10] ss:$28 sps:$4 sm:$0xff]   ;;  %v7831_v34 = vld [vmem:[#allocation16 + $0x408] ss:$28 sps:$4 sm:$0xff]  }
 0x444   :  { %5733 = vmatpush1.bf16.msra.mxu1 %v7711_v48  ;;  %5897 = vmatpush1.bf16.msra.mxu0 %v7714_v49  ;;  %v8639_v48 = vpack.c.bf16 %v2736_v43, %v2736_v43  ;;  %v7781_v49 = vld [vmem:[#allocation16 + $0x18] ss:$28 sps:$4 sm:$0xff]  }
 0x445   :  { %5734 = vmatprep.subr.bf16.mxu1 %v7719_v50  ;;  %5898 = vmatprep.subr.bf16.mxu0 %v7722_v51  ;;  %v7784_v50 = vld [vmem:[#allocation16 + $0x4c] ss:$28 sps:$4 sm:$0xff]   ;;  %v7839_v43 = vld [vmem:[#allocation16 + $0x2b4] ss:$28 sps:$4 sm:$0xff]  }
 0x446   :  { %v7785_v51 = vld [vmem:[#allocation16 + $0x210] ss:$28 sps:$4 sm:$0xff]  }
 0x448   :  { %5735 = vmatpush1.bf16.msra.mxu1 %v7717_v52  ;;  %5899 = vmatpush1.bf16.msra.mxu0 %v7720_v53  ;;  %v7782_v52 = vld [vmem:[#allocation16 + $0x48] ss:$28 sps:$4 sm:$0xff]   ;;  %v7786_v53 = vld [vmem:[#allocation16 + $0x50] ss:$28 sps:$4 sm:$0xff]  }
 0x449   :  { %5736 = vmatprep.subr.bf16.mxu1 %v7725_v54  ;;  %5900 = vmatprep.subr.bf16.mxu0 %v7728_v56  ;;  %v7789_v54 = vld [vmem:[#allocation16 + $0x84] ss:$28 sps:$4 sm:$0xff]  }
 0x44a   :  { %v7790_v56 = vld [vmem:[#allocation16 + $0x248] ss:$28 sps:$4 sm:$0xff]  }
 0x44c   :  { %5737 = vmatpush1.bf16.msra.mxu1 %v7723_v60  ;;  %5901 = vmatpush1.bf16.msra.mxu0 %v7726_v61  ;;  %v7787_v60 = vld [vmem:[#allocation16 + $0x80] ss:$28 sps:$4 sm:$0xff]   ;;  %v7791_v61 = vld [vmem:[#allocation16 + $0x88] ss:$28 sps:$4 sm:$0xff]  }
 0x44d   :  { %5738 = vmatprep.subr.bf16.mxu1 %v7731_v62  ;;  %5902 = vmatprep.subr.bf16.mxu0 %v7734_v63  ;;  %v7794_v62 = vld [vmem:[#allocation16 + $0xbc] ss:$28 sps:$4 sm:$0xff]  }
 0x44e   :  { %v7795_v63 = vld [vmem:[#allocation16 + $0x280] ss:$28 sps:$4 sm:$0xff]  }
 0x450   :  { %5739 = vmatpush1.bf16.msra.mxu1 %v7729_v0  ;;  %5903 = vmatpush1.bf16.msra.mxu0 %v7732_v10  ;;  %v7792_v0 = vld [vmem:[#allocation16 + $0xb8] ss:$28 sps:$4 sm:$0xff]   ;;  %v7796_v10 = vld [vmem:[#allocation16 + $0xc0] ss:$28 sps:$4 sm:$0xff]  }
 0x451   :  { %5740 = vmatprep.subr.bf16.mxu1 %v7737_v1  ;;  %5904 = vmatprep.subr.bf16.mxu0 %v7740_v2  ;;  %v7799_v1 = vld [vmem:[#allocation16 + $0xf4] ss:$28 sps:$4 sm:$0xff]  }
 0x452   :  { %v7797_v2 = vld [vmem:[#allocation16 + $0xf0] ss:$28 sps:$4 sm:$0xff]  }
 0x454   :  { %5741 = vmatpush1.bf16.msra.mxu1 %v7735_v4  ;;  %5905 = vmatpush1.bf16.msra.mxu0 %v7738_v5  ;;  %v7801_v4 = vld [vmem:[#allocation16 + $0xf8] ss:$28 sps:$4 sm:$0xff]   ;;  %v7804_v5 = vld [vmem:[#allocation16 + $0x12c] ss:$28 sps:$4 sm:$0xff]  }
 0x455   :  { %5742 = vmatprep.subr.bf16.mxu1 %v7743_v6  ;;  %5906 = vmatprep.subr.bf16.mxu0 %v7746_v7  ;;  %v7805_v6 = vld [vmem:[#allocation16 + $0x2f0] ss:$28 sps:$4 sm:$0xff]   ;;  %v7802_v7 = vld [vmem:[#allocation16 + $0x128] ss:$28 sps:$4 sm:$0xff]  }
 0x458   :  { %5743 = vmatpush1.bf16.msra.mxu1 %v7741_v9  ;;  %5907 = vmatpush1.bf16.msra.mxu0 %v7744_v12  ;;  %v7806_v9 = vld [vmem:[#allocation16 + $0x130] ss:$28 sps:$4 sm:$0xff]   ;;  %v7809_v12 = vld [vmem:[#allocation16 + $0x164] ss:$28 sps:$4 sm:$0xff]  }
 0x459   :  { %5744 = vmatprep.subr.bf16.mxu1 %v7749_v38  ;;  %5908 = vmatprep.subr.bf16.mxu0 %v7752_v11  ;;  %v7810_v38 = vld [vmem:[#allocation16 + $0x328] ss:$28 sps:$4 sm:$0xff]   ;;  %v7807_v11 = vld [vmem:[#allocation16 + $0x160] ss:$28 sps:$4 sm:$0xff]  }
 0x45c   :  { %5745 = vmatpush1.bf16.msra.mxu1 %v7747_v13  ;;  %5909 = vmatpush1.bf16.msra.mxu0 %v7750_v14  ;;  %v7811_v13 = vld [vmem:[#allocation16 + $0x168] ss:$28 sps:$4 sm:$0xff]   ;;  %v7814_v14 = vld [vmem:[#allocation16 + $0x19c] ss:$28 sps:$4 sm:$0xff]  }
 0x45d   :  { %5746 = vmatprep.subr.bf16.mxu1 %v7755_v16  ;;  %5910 = vmatprep.subr.bf16.mxu0 %v7758_v18  ;;  %v7815_v16 = vld [vmem:[#allocation16 + $0x360] ss:$28 sps:$4 sm:$0xff]   ;;  %v7812_v18 = vld [vmem:[#allocation16 + $0x198] ss:$28 sps:$4 sm:$0xff]  }
 0x460   :  { %5747 = vmatpush1.bf16.msra.mxu1 %v7753_v36  ;;  %5911 = vmatpush1.bf16.msra.mxu0 %v7756_v24  ;;  %v7816_v36 = vld [vmem:[#allocation16 + $0x1a0] ss:$28 sps:$4 sm:$0xff]   ;;  %v7819_v24 = vld [vmem:[#allocation16 + $0x1d4] ss:$28 sps:$4 sm:$0xff]  }
 0x461   :  { %5748 = vmatprep.subr.bf16.mxu1 %v7761_v29  ;;  %5912 = vmatprep.subr.bf16.mxu0 %v7764_v30  ;;  %v7817_v29 = vld [vmem:[#allocation16 + $0x1d0] ss:$28 sps:$4 sm:$0xff]   ;;  %v7821_v30 = vld [vmem:[#allocation16 + $0x398] ss:$28 sps:$4 sm:$0xff]  }
 0x464   :  { %5749 = vmatpush1.bf16.msra.mxu1 %v7759_v32  ;;  %5913 = vmatpush1.bf16.msra.mxu0 %v7762_v33  ;;  %v7824_v32 = vld [vmem:[#allocation16 + $0x20c] ss:$28 sps:$4 sm:$0xff]  }
 0x465   :  { %5750 = vmatprep.subr.bf16.mxu1 %v7767_v21  ;;  %5914 = vmatprep.subr.bf16.mxu0 %v7770_v23  ;;  %v7825_v33 = vld [vmem:[#allocation16 + $0x590] ss:$28 sps:$4 sm:$0xff]   ;;  %v7829_v23 = vld [vmem:[#allocation16 + $0x244] ss:$28 sps:$4 sm:$0xff]  }
 0x466   :  { %v7826_v21 = vld [vmem:[#allocation16 + $0x3d0] ss:$28 sps:$4 sm:$0xff]  }
 0x468   :  { %5751 = vmatpush1.bf16.msra.mxu1 %v7765_v25  ;;  %5915 = vmatpush1.bf16.msra.mxu0 %v7768_v26  ;;  %v7830_v25 = vld [vmem:[#allocation16 + $0x5c8] ss:$28 sps:$4 sm:$0xff]   ;;  %v7827_v26 = vld [vmem:[#allocation16 + $0x240] ss:$28 sps:$4 sm:$0xff]  }
 0x469   :  { %5752 = vmatprep.subr.bf16.mxu1 %v7773_v3  ;;  %5916 = vmatprep.subr.bf16.mxu0 %v7776_v37  ;;  %v7834_v3 = vld [vmem:[#allocation16 + $0x27c] ss:$28 sps:$4 sm:$0xff]  }
 0x46a   :  { %v7835_v37 = vld [vmem:[#allocation16 + $0x600] ss:$28 sps:$4 sm:$0xff]  }
 0x46c   :  { %5753 = vmatpush1.bf16.msra.mxu1 %v7771_v39  ;;  %5917 = vmatpush1.bf16.msra.mxu0 %v7774_v41  ;;  %v7832_v39 = vld [vmem:[#allocation16 + $0x278] ss:$28 sps:$4 sm:$0xff]   ;;  %v7836_v41 = vld [vmem:[#allocation16 + $0x440] ss:$28 sps:$4 sm:$0xff]  }
 0x46d   :  { %5927 = vmatprep.subr.bf16.mxu1 %v7779_v59  ;;  %7103 = vmatprep.subr.bf16.mxu0 %v7780_v46  ;;  %v7840_v59 = vld [vmem:[#allocation16 + $0x638] ss:$28 sps:$4 sm:$0xff]   ;;  %v7837_v46 = vld [vmem:[#allocation16 + $0x2b0] ss:$28 sps:$4 sm:$0xff]  }
 0x46f   :  { %5755 = vmatmul.mubr.bf16.vlgmr.msra.gmra.mrb[8].mxu1 %v8639_v48  ;;  %5919 = vmatmul.mubr.bf16.vlgmr.msra.gmra.mrb[20].mxu0 %v8639_v48 }
 0x470   :  { %5928 = vmatpush1.bf16.msra.mxu1 %v7777_v47  ;;  %5959 = vmatprep.mubr.bf16.mxu1 %v8591_v28  ;;  %v7841_v47 = vld [vmem:[#allocation16 + $0x478] ss:$28 sps:$4 sm:$0xff]  }
 0x471   :  { %7104 = vmatpush3.bf16.msra.mxu0 %v7781_v49  ;;  %6123 = vmatprep.mubr.bf16.mxu0 %v8591_v28  ;;  %v7800_v28 = vld [vmem:[#allocation16 + $0x2b8] ss:$28 sps:$4 sm:$0xff]   ;;  %v7844_v49 = vld [vmem:[#allocation16 + $0x2ec] ss:$28 sps:$4 sm:$0xff]  }
 0x472   :  { %5929 = vmatprep.subr.bf16.mxu1 %v7784_v50  ;;  %7105 = vmatprep.subr.bf16.mxu0 %v7785_v51  ;;  %v7845_v50 = vld [vmem:[#allocation16 + $0x670] ss:$28 sps:$4 sm:$0xff]   ;;  %v7842_v51 = vld [vmem:[#allocation16 + $0x2e8] ss:$28 sps:$4 sm:$0xff]  }
 0x474   :  { %5930 = vmatpush1.bf16.msra.mxu1 %v7782_v52  ;;  %v7846_v52 = vld [vmem:[#allocation16 + $0x4b0] ss:$28 sps:$4 sm:$0xff]  }
 0x475   :  { %7106 = vmatpush3.bf16.msra.mxu0 %v7786_v53  ;;  %5931 = vmatprep.subr.bf16.mxu1 %v7789_v54  ;;  %v7849_v53 = vld [vmem:[#allocation16 + $0x324] ss:$28 sps:$4 sm:$0xff]  }
 0x476   :  { %7107 = vmatprep.subr.bf16.mxu0 %v7790_v56  ;;  %v7850_v54 = vld [vmem:[#allocation16 + $0x6a8] ss:$28 sps:$4 sm:$0xff]   ;;  %v7847_v56 = vld [vmem:[#allocation16 + $0x320] ss:$28 sps:$4 sm:$0xff]  }
 0x478   :  { %5932 = vmatpush1.bf16.msra.mxu1 %v7787_v60  ;;  %v7851_v60 = vld [vmem:[#allocation16 + $0x4e8] ss:$28 sps:$4 sm:$0xff]  }
 0x479   :  { %7108 = vmatpush3.bf16.msra.mxu0 %v7791_v61  ;;  %5933 = vmatprep.subr.bf16.mxu1 %v7794_v62  ;;  %v7854_v61 = vld [vmem:[#allocation16 + $0x35c] ss:$28 sps:$4 sm:$0xff]  }
 0x47a   :  { %7109 = vmatprep.subr.bf16.mxu0 %v7795_v63  ;;  %v7855_v62 = vld [vmem:[#allocation16 + $0x6e0] ss:$28 sps:$4 sm:$0xff]   ;;  %v7852_v63 = vld [vmem:[#allocation16 + $0x358] ss:$28 sps:$4 sm:$0xff]  }
 0x47c   :  { %5934 = vmatpush1.bf16.msra.mxu1 %v7792_v0  ;;  %v7856_v0 = vld [vmem:[#allocation16 + $0x520] ss:$28 sps:$4 sm:$0xff]  }
 0x47d   :  { %7110 = vmatpush3.bf16.msra.mxu0 %v7796_v10  ;;  %5935 = vmatprep.subr.bf16.mxu1 %v7799_v1  ;;  %v7859_v10 = vld [vmem:[#allocation16 + $0x394] ss:$28 sps:$4 sm:$0xff]  }
 0x47e   :  { %7111 = vmatprep.subr.bf16.mxu0 %v7800_v28  ;;  %v7860_v1 = vld [vmem:[#allocation16 + $0x8d8] ss:$28 sps:$4 sm:$0xff]   ;;  %v7857_v28 = vld [vmem:[#allocation16 + $0x390] ss:$28 sps:$4 sm:$0xff]  }
 0x480   :  { %5936 = vmatpush1.bf16.msra.mxu1 %v7797_v2  ;;  %v7861_v2 = vld [vmem:[#allocation16 + $0x718] ss:$28 sps:$4 sm:$0xff]  }
 0x481   :  { %7112 = vmatpush3.bf16.msra.mxu0 %v7801_v4  ;;  %5937 = vmatprep.subr.bf16.mxu1 %v7804_v5  ;;  %v7864_v4 = vld [vmem:[#allocation16 + $0x3cc] ss:$28 sps:$4 sm:$0xff]  }
 0x482   :  { %7113 = vmatprep.subr.bf16.mxu0 %v7805_v6  ;;  %v7865_v5 = vld [vmem:[#allocation16 + $0x910] ss:$28 sps:$4 sm:$0xff]   ;;  %v7862_v6 = vld [vmem:[#allocation16 + $0x3c8] ss:$28 sps:$4 sm:$0xff]  }
 0x484   :  { %5938 = vmatpush1.bf16.msra.mxu1 %v7802_v7  ;;  %v7866_v7 = vld [vmem:[#allocation16 + $0x750] ss:$28 sps:$4 sm:$0xff]  }
 0x485   :  { %7114 = vmatpush3.bf16.msra.mxu0 %v7806_v9  ;;  %5939 = vmatprep.subr.bf16.mxu1 %v7809_v12  ;;  %v7869_v9 = vld [vmem:[#allocation16 + $0x404] ss:$28 sps:$4 sm:$0xff]  }
 0x486   :  { %7115 = vmatprep.subr.bf16.mxu0 %v7810_v38  ;;  %v7870_v12 = vld [vmem:[#allocation16 + $0x948] ss:$28 sps:$4 sm:$0xff]   ;;  %v7867_v38 = vld [vmem:[#allocation16 + $0x400] ss:$28 sps:$4 sm:$0xff]  }
 0x488   :  { %5940 = vmatpush1.bf16.msra.mxu1 %v7807_v11  ;;  %v7874_v11 = vld [vmem:[#allocation16 + $0x43c] ss:$28 sps:$4 sm:$0xff]  }
 0x489   :  { %7116 = vmatpush3.bf16.msra.mxu0 %v7811_v13  ;;  %5941 = vmatprep.subr.bf16.mxu1 %v7814_v14  ;;  %v7875_v13 = vld [vmem:[#allocation16 + $0x980] ss:$28 sps:$4 sm:$0xff]   ;;  %v7872_v14 = vld [vmem:[#allocation16 + $0x438] ss:$28 sps:$4 sm:$0xff]  }
 0x48a   :  { %7117 = vmatprep.subr.bf16.mxu0 %v7815_v16  ;;  %v7879_v16 = vld [vmem:[#allocation16 + $0x474] ss:$28 sps:$4 sm:$0xff]  }
 0x48c   :  { %5942 = vmatpush1.bf16.msra.mxu1 %v7812_v18  ;;  %v7880_v18 = vld [vmem:[#allocation16 + $0x9b8] ss:$28 sps:$4 sm:$0xff]  }
 0x48d   :  { %7118 = vmatpush3.bf16.msra.mxu0 %v7816_v36  ;;  %5943 = vmatprep.subr.bf16.mxu1 %v7819_v24  ;;  %v7877_v36 = vld [vmem:[#allocation16 + $0x470] ss:$28 sps:$4 sm:$0xff]   ;;  %v7881_v24 = vld [vmem:[#allocation16 + $0x7f8] ss:$28 sps:$4 sm:$0xff]  }
 0x48e   :  { %7125 = vmatprep.subr.bf16.mxu0 %v7820_v27  ;;  %v7884_v27 = vld [vmem:[#allocation16 + $0x4ac] ss:$28 sps:$4 sm:$0xff]  }
 0x490   :  { %6124 = vmatmul.mubr.bf16.vlgmr.msra.gmra.mrb[24].mxu0 %v8593_v31  ;;  %5944 = vmatpush1.bf16.msra.mxu1 %v7817_v29  ;;  %v7885_v29 = vld [vmem:[#allocation16 + $0x9f0] ss:$28 sps:$4 sm:$0xff]  }
 0x491   :  { %7126 = vmatpush3.bf16.msra.mxu0 %v7821_v30  ;;  %6163 = vmatprep.mubr.bf16.mxu0 %v8597_v19  ;;  %v7882_v30 = vld [vmem:[#allocation16 + $0x4a8] ss:$28 sps:$4 sm:$0xff]  }
 0x492   :  { %5945 = vmatprep.subr.bf16.mxu1 %v7824_v32  ;;  %7127 = vmatprep.subr.bf16.mxu0 %v7825_v33  ;;  %v7886_v32 = vld [vmem:[#allocation16 + $0x830] ss:$28 sps:$4 sm:$0xff]   ;;  %v7889_v33 = vld [vmem:[#allocation16 + $0x4e4] ss:$28 sps:$4 sm:$0xff]  }
 0x494   :  { %5946 = vmatpush1.bf16.msra.mxu1 %v7822_v20  ;;  %v7890_v20 = vld [vmem:[#allocation16 + $0xa28] ss:$28 sps:$4 sm:$0xff]  }
 0x495   :  { %7128 = vmatpush3.bf16.msra.mxu0 %v7826_v21  ;;  %5947 = vmatprep.subr.bf16.mxu1 %v7829_v23  ;;  %v7887_v21 = vld [vmem:[#allocation16 + $0x4e0] ss:$28 sps:$4 sm:$0xff]   ;;  %v7891_v23 = vld [vmem:[#allocation16 + $0x868] ss:$28 sps:$4 sm:$0xff]  }
 0x496   :  { %7129 = vmatprep.subr.bf16.mxu0 %v7830_v25  ;;  %v7894_v25 = vld [vmem:[#allocation16 + $0x51c] ss:$28 sps:$4 sm:$0xff]  }
 0x498   :  { %5948 = vmatpush1.bf16.msra.mxu1 %v7827_v26  ;;  %v7895_v26 = vld [vmem:[#allocation16 + $0xa60] ss:$28 sps:$4 sm:$0xff]  }
 0x499   :  { %7130 = vmatpush3.bf16.msra.mxu0 %v7831_v34  ;;  %5949 = vmatprep.subr.bf16.mxu1 %v7834_v3  ;;  %v7892_v34 = vld [vmem:[#allocation16 + $0x518] ss:$28 sps:$4 sm:$0xff]   ;;  %v7896_v3 = vld [vmem:[#allocation16 + $0x8a0] ss:$28 sps:$4 sm:$0xff]  }
 0x49a   :  { %7131 = vmatprep.subr.bf16.mxu0 %v7835_v37  ;;  %v7899_v37 = vld [vmem:[#allocation16 + $0x554] ss:$28 sps:$4 sm:$0xff]  }
 0x49c   :  { %5950 = vmatpush1.bf16.msra.mxu1 %v7832_v39  ;;  %v7900_v39 = vld [vmem:[#allocation16 + $0xc58] ss:$28 sps:$4 sm:$0xff]  }
 0x49d   :  { %7132 = vmatpush3.bf16.msra.mxu0 %v7836_v41  ;;  %5951 = vmatprep.subr.bf16.mxu1 %v7839_v43  ;;  %v7897_v41 = vld [vmem:[#allocation16 + $0x550] ss:$28 sps:$4 sm:$0xff]   ;;  %v7901_v43 = vld [vmem:[#allocation16 + $0xa98] ss:$28 sps:$4 sm:$0xff]  }
 0x49e   :  { %7133 = vmatprep.subr.bf16.mxu0 %v7840_v59  ;;  %v7904_v59 = vld [vmem:[#allocation16 + $0x58c] ss:$28 sps:$4 sm:$0xff]  }
 0x4a0   :  { %5952 = vmatpush1.bf16.msra.mxu1 %v7837_v46  ;;  %v7905_v46 = vld [vmem:[#allocation16 + $0xc90] ss:$28 sps:$4 sm:$0xff]  }
 0x4a1   :  { %7134 = vmatpush3.bf16.msra.mxu0 %v7841_v47  ;;  %5953 = vmatprep.subr.bf16.mxu1 %v7844_v49  ;;  %v7902_v47 = vld [vmem:[#allocation16 + $0x588] ss:$28 sps:$4 sm:$0xff]   ;;  %v7906_v49 = vld [vmem:[#allocation16 + $0xad0] ss:$28 sps:$4 sm:$0xff]  }
 0x4a2   :  { %7135 = vmatprep.subr.bf16.mxu0 %v7845_v50  ;;  %v7909_v50 = vld [vmem:[#allocation16 + $0x5c4] ss:$28 sps:$4 sm:$0xff]  }
 0x4a4   :  { %5954 = vmatpush1.bf16.msra.mxu1 %v7842_v51  ;;  %v7910_v51 = vld [vmem:[#allocation16 + $0xcc8] ss:$28 sps:$4 sm:$0xff]  }
 0x4a5   :  { %7136 = vmatpush3.bf16.msra.mxu0 %v7846_v52  ;;  %5955 = vmatprep.subr.bf16.mxu1 %v7849_v53  ;;  %v7907_v52 = vld [vmem:[#allocation16 + $0x5c0] ss:$28 sps:$4 sm:$0xff]   ;;  %v7911_v53 = vld [vmem:[#allocation16 + $0xb08] ss:$28 sps:$4 sm:$0xff]  }
 0x4a6   :  { %7137 = vmatprep.subr.bf16.mxu0 %v7850_v54  ;;  %v7914_v54 = vld [vmem:[#allocation16 + $0x5fc] ss:$28 sps:$4 sm:$0xff]  }
 0x4a8   :  { %5956 = vmatpush1.bf16.msra.mxu1 %v7847_v56  ;;  %v7915_v56 = vld [vmem:[#allocation16 + $0xd00] ss:$28 sps:$4 sm:$0xff]  }
 0x4a9   :  { %7138 = vmatpush3.bf16.msra.mxu0 %v7851_v60  ;;  %5957 = vmatprep.subr.bf16.mxu1 %v7854_v61  ;;  %v7912_v60 = vld [vmem:[#allocation16 + $0x5f8] ss:$28 sps:$4 sm:$0xff]   ;;  %v7916_v61 = vld [vmem:[#allocation16 + $0xb40] ss:$28 sps:$4 sm:$0xff]  }
 0x4aa   :  { %7139 = vmatprep.subr.bf16.mxu0 %v7855_v62  ;;  %v7919_v62 = vld [vmem:[#allocation16 + $0x634] ss:$28 sps:$4 sm:$0xff]  }
 0x4ac   :  { %5958 = vmatpush1.bf16.msra.mxu1 %v7852_v63  ;;  %v7920_v63 = vld [vmem:[#allocation16 + $0xd38] ss:$28 sps:$4 sm:$0xff]  }
 0x4ad   :  { %7140 = vmatpush3.bf16.msra.mxu0 %v7856_v0  ;;  %5968 = vmatprep.subr.bf16.mxu1 %v7859_v10  ;;  %v7917_v0 = vld [vmem:[#allocation16 + $0x630] ss:$28 sps:$4 sm:$0xff]   ;;  %v7921_v10 = vld [vmem:[#allocation16 + $0xb78] ss:$28 sps:$4 sm:$0xff]  }
 0x4ae   :  { %7147 = vmatprep.subr.bf16.mxu0 %v7860_v1  ;;  %v7924_v1 = vld [vmem:[#allocation16 + $0x66c] ss:$28 sps:$4 sm:$0xff]  }
 0x4af   :  { %5960 = vmatmul.mubr.bf16.vlgmr.msra.gmra.mrb[12].mxu1 %v8593_v31  ;;  %v7871_v31 = vld [vmem:[#allocation16 + $0x788] ss:$28 sps:$4 sm:$0xff]  }
 0x4b0   :  { %6164 = vmatmul.mubr.bf16.vlgmr.msra.gmra.mrb[28].mxu0 %v8606_v45  ;;  %5969 = vmatpush1.bf16.msra.mxu1 %v7857_v28  ;;  %v7925_v28 = vld [vmem:[#allocation16 + $0xd70] ss:$28 sps:$4 sm:$0xff]  }
 0x4b1   :  { %6000 = vmatprep.mubr.bf16.mxu1 %v8597_v19  ;;  %7148 = vmatpush3.bf16.msra.mxu0 %v7861_v2  ;;  %v7876_v19 = vld [vmem:[#allocation16 + $0x7c0] ss:$28 sps:$4 sm:$0xff]   ;;  %v7922_v2 = vld [vmem:[#allocation16 + $0x668] ss:$28 sps:$4 sm:$0xff]  }
 0x4b2   :  { %6203 = vmatprep.mubr.bf16.mxu0 %v8622_v17  ;;  %5970 = vmatprep.subr.bf16.mxu1 %v7864_v4  ;;  %v7926_v4 = vld [vmem:[#allocation16 + $0xbb0] ss:$28 sps:$4 sm:$0xff]  }
 0x4b3   :  { %7149 = vmatprep.subr.bf16.mxu0 %v7865_v5  ;;  %v7929_v5 = vld [vmem:[#allocation16 + $0x6a4] ss:$28 sps:$4 sm:$0xff]  }
 0x4b4   :  { %5971 = vmatpush1.bf16.msra.mxu1 %v7862_v6  ;;  %v7930_v6 = vld [vmem:[#allocation16 + $0xda8] ss:$28 sps:$4 sm:$0xff]  }
 0x4b5   :  { %7150 = vmatpush3.bf16.msra.mxu0 %v7866_v7  ;;  %5972 = vmatprep.subr.bf16.mxu1 %v7869_v9  ;;  %v7927_v7 = vld [vmem:[#allocation16 + $0x6a0] ss:$28 sps:$4 sm:$0xff]   ;;  %v7931_v9 = vld [vmem:[#allocation16 + $0xbe8] ss:$28 sps:$4 sm:$0xff]  }
 0x4b6   :  { %7151 = vmatprep.subr.bf16.mxu0 %v7870_v12  ;;  %v7934_v12 = vld [vmem:[#allocation16 + $0x6dc] ss:$28 sps:$4 sm:$0xff]  }
 0x4b8   :  { %5973 = vmatpush1.bf16.msra.mxu1 %v7867_v38  ;;  %v7935_v38 = vld [vmem:[#allocation16 + $0xde0] ss:$28 sps:$4 sm:$0xff]  }
 0x4b9   :  { %7152 = vmatpush3.bf16.msra.mxu0 %v7871_v31  ;;  %5974 = vmatprep.subr.bf16.mxu1 %v7874_v11  ;;  %v7932_v31 = vld [vmem:[#allocation16 + $0x6d8] ss:$28 sps:$4 sm:$0xff]   ;;  %v7936_v11 = vld [vmem:[#allocation16 + $0xc20] ss:$28 sps:$4 sm:$0xff]  }
 0x4ba   :  { %7153 = vmatprep.subr.bf16.mxu0 %v7875_v13  ;;  %v7939_v13 = vld [vmem:[#allocation16 + $0x714] ss:$28 sps:$4 sm:$0xff]  }
 0x4bc   :  { %5975 = vmatpush1.bf16.msra.mxu1 %v7872_v14  ;;  %v7937_v14 = vld [vmem:[#allocation16 + $0x710] ss:$28 sps:$4 sm:$0xff]  }
 0x4bd   :  { %7154 = vmatpush3.bf16.msra.mxu0 %v7876_v19  ;;  %5976 = vmatprep.subr.bf16.mxu1 %v7879_v16  ;;  %v7942_v19 = vld [vmem:[#allocation16 + $0x74c] ss:$28 sps:$4 sm:$0xff]  }
 0x4be   :  { %7155 = vmatprep.subr.bf16.mxu0 %v7880_v18  ;;  %v7940_v16 = vld [vmem:[#allocation16 + $0x748] ss:$28 sps:$4 sm:$0xff]  }
 0x4bf   :  { %v7945_v18 = vld [vmem:[#allocation16 + $0x784] ss:$28 sps:$4 sm:$0xff]  }
 0x4c0   :  { %5977 = vmatpush1.bf16.msra.mxu1 %v7877_v36  ;;  %v7943_v36 = vld [vmem:[#allocation16 + $0x780] ss:$28 sps:$4 sm:$0xff]  }
 0x4c1   :  { %7156 = vmatpush3.bf16.msra.mxu0 %v7881_v24  ;;  %5978 = vmatprep.subr.bf16.mxu1 %v7884_v27  ;;  %v7948_v24 = vld [vmem:[#allocation16 + $0x7bc] ss:$28 sps:$4 sm:$0xff]  }
 0x4c2   :  { %7157 = vmatprep.subr.bf16.mxu0 %v7885_v29  ;;  %v7946_v27 = vld [vmem:[#allocation16 + $0x7b8] ss:$28 sps:$4 sm:$0xff]  }
 0x4c3   :  { %v7951_v29 = vld [vmem:[#allocation16 + $0x7f4] ss:$28 sps:$4 sm:$0xff]  }
 0x4c4   :  { %5979 = vmatpush1.bf16.msra.mxu1 %v7882_v30  ;;  %v7949_v30 = vld [vmem:[#allocation16 + $0x7f0] ss:$28 sps:$4 sm:$0xff]  }
 0x4c5   :  { %7158 = vmatpush3.bf16.msra.mxu0 %v7886_v32  ;;  %5980 = vmatprep.subr.bf16.mxu1 %v7889_v33  ;;  %v7952_v32 = vld [vmem:[#allocation16 + $0x828] ss:$28 sps:$4 sm:$0xff]  }
 0x4c6   :  { %7159 = vmatprep.subr.bf16.mxu0 %v7890_v20  ;;  %v7957_v33 = vld [vmem:[#allocation16 + $0x864] ss:$28 sps:$4 sm:$0xff]   ;;  %v7960_v20 = vld [vmem:[#allocation16 + $0x89c] ss:$28 sps:$4 sm:$0xff]  }
 0x4c8   :  { %5981 = vmatpush1.bf16.msra.mxu1 %v7887_v21  ;;  %v7958_v21 = vld [vmem:[#allocation16 + $0x898] ss:$28 sps:$4 sm:$0xff]  }
 0x4c9   :  { %7160 = vmatpush3.bf16.msra.mxu0 %v7891_v23  ;;  %5982 = vmatprep.subr.bf16.mxu1 %v7894_v25  ;;  %v7963_v23 = vld [vmem:[#allocation16 + $0x8d4] ss:$28 sps:$4 sm:$0xff]  }
 0x4ca   :  { %7161 = vmatprep.subr.bf16.mxu0 %v7895_v26  ;;  %v7961_v25 = vld [vmem:[#allocation16 + $0x8d0] ss:$28 sps:$4 sm:$0xff]  }
 0x4cb   :  { %v7966_v26 = vld [vmem:[#allocation16 + $0x90c] ss:$28 sps:$4 sm:$0xff]  }
 0x4cc   :  { %5983 = vmatpush1.bf16.msra.mxu1 %v7892_v34  ;;  %v7964_v34 = vld [vmem:[#allocation16 + $0x908] ss:$28 sps:$4 sm:$0xff]  }
 0x4cd   :  { %7162 = vmatpush3.bf16.msra.mxu0 %v7896_v3  ;;  %5984 = vmatprep.subr.bf16.mxu1 %v7899_v37  ;;  %v7969_v3 = vld [vmem:[#allocation16 + $0x944] ss:$28 sps:$4 sm:$0xff]  }
 0x4ce   :  { %7169 = vmatprep.subr.bf16.mxu0 %v7900_v39  ;;  %v7967_v37 = vld [vmem:[#allocation16 + $0x940] ss:$28 sps:$4 sm:$0xff]  }
 0x4cf   :  { %v7972_v39 = vld [vmem:[#allocation16 + $0x97c] ss:$28 sps:$4 sm:$0xff]  }
 0x4d0   :  { %6204 = vmatmul.mubr.bf16.vlgmr.msra.gmra.mrb[32].mxu0 %v8624_v22  ;;  %5985 = vmatpush1.bf16.msra.mxu1 %v7897_v41  ;;  %v7970_v41 = vld [vmem:[#allocation16 + $0x978] ss:$28 sps:$4 sm:$0xff]  }
 0x4d1   :  { %7170 = vmatpush3.bf16.msra.mxu0 %v7901_v43  ;;  %6243 = vmatprep.mubr.bf16.mxu0 %v8628_v57  ;;  %v7975_v43 = vld [vmem:[#allocation16 + $0x9b4] ss:$28 sps:$4 sm:$0xff]  }
 0x4d2   :  { %5986 = vmatprep.subr.bf16.mxu1 %v7904_v59  ;;  %7171 = vmatprep.subr.bf16.mxu0 %v7905_v46  ;;  %v7973_v59 = vld [vmem:[#allocation16 + $0x9b0] ss:$28 sps:$4 sm:$0xff]  }
 0x4d3   :  { %v7978_v46 = vld [vmem:[#allocation16 + $0x9ec] ss:$28 sps:$4 sm:$0xff]  }
 0x4d4   :  { %5987 = vmatpush1.bf16.msra.mxu1 %v7902_v47  ;;  %v7976_v47 = vld [vmem:[#allocation16 + $0x9e8] ss:$28 sps:$4 sm:$0xff]  }
 0x4d5   :  { %7172 = vmatpush3.bf16.msra.mxu0 %v7906_v49  ;;  %5988 = vmatprep.subr.bf16.mxu1 %v7909_v50  ;;  %v7981_v49 = vld [vmem:[#allocation16 + $0xa24] ss:$28 sps:$4 sm:$0xff]  }
 0x4d6   :  { %7173 = vmatprep.subr.bf16.mxu0 %v7910_v51  ;;  %v7979_v50 = vld [vmem:[#allocation16 + $0xa20] ss:$28 sps:$4 sm:$0xff]  }
 0x4d7   :  { %v7984_v51 = vld [vmem:[#allocation16 + $0xa5c] ss:$28 sps:$4 sm:$0xff]  }
 0x4d8   :  { %5989 = vmatpush1.bf16.msra.mxu1 %v7907_v52  ;;  %v7982_v52 = vld [vmem:[#allocation16 + $0xa58] ss:$28 sps:$4 sm:$0xff]  }
 0x4d9   :  { %7174 = vmatpush3.bf16.msra.mxu0 %v7911_v53  ;;  %5990 = vmatprep.subr.bf16.mxu1 %v7914_v54  ;;  %v7987_v53 = vld [vmem:[#allocation16 + $0xa94] ss:$28 sps:$4 sm:$0xff]  }
 0x4da   :  { %7175 = vmatprep.subr.bf16.mxu0 %v7915_v56  ;;  %v7985_v54 = vld [vmem:[#allocation16 + $0xa90] ss:$28 sps:$4 sm:$0xff]  }
 0x4db   :  { %v7990_v56 = vld [vmem:[#allocation16 + $0xacc] ss:$28 sps:$4 sm:$0xff]  }
 0x4dc   :  { %5991 = vmatpush1.bf16.msra.mxu1 %v7912_v60  ;;  %v7988_v60 = vld [vmem:[#allocation16 + $0xac8] ss:$28 sps:$4 sm:$0xff]  }
 0x4dd   :  { %7176 = vmatpush3.bf16.msra.mxu0 %v7916_v61  ;;  %5992 = vmatprep.subr.bf16.mxu1 %v7919_v62  ;;  %v7993_v61 = vld [vmem:[#allocation16 + $0xb04] ss:$28 sps:$4 sm:$0xff]  }
 0x4de   :  { %7177 = vmatprep.subr.bf16.mxu0 %v7920_v63  ;;  %v7991_v62 = vld [vmem:[#allocation16 + $0xb00] ss:$28 sps:$4 sm:$0xff]  }
 0x4df   :  { %v7996_v63 = vld [vmem:[#allocation16 + $0xb3c] ss:$28 sps:$4 sm:$0xff]  }
 0x4e0   :  { %5993 = vmatpush1.bf16.msra.mxu1 %v7917_v0  ;;  %v7994_v0 = vld [vmem:[#allocation16 + $0xb38] ss:$28 sps:$4 sm:$0xff]  }
 0x4e1   :  { %7178 = vmatpush3.bf16.msra.mxu0 %v7921_v10  ;;  %5994 = vmatprep.subr.bf16.mxu1 %v7924_v1  ;;  %v7999_v10 = vld [vmem:[#allocation16 + $0xb74] ss:$28 sps:$4 sm:$0xff]  }
 0x4e2   :  { %7179 = vmatprep.subr.bf16.mxu0 %v7925_v28  ;;  %v7997_v1 = vld [vmem:[#allocation16 + $0xb70] ss:$28 sps:$4 sm:$0xff]   ;;  %v8658_v28 = vld [vmem:[#allocation17] sm:$0xff] }
 0x4e4   :  { %5995 = vmatpush1.bf16.msra.mxu1 %v7922_v2  ;;  %v3271_v2 = vrot.slane %v8658_v28, %v8556_v55 }
 0x4e5   :  { %7180 = vmatpush3.bf16.msra.mxu0 %v7926_v4  ;;  %5996 = vmatprep.subr.bf16.mxu1 %v7929_v5  ;;  %v3267_v4 = vrot.slane %v8658_v28, %v8511_v44  ;;  %v3275_v5 = vrot.slane %v8658_v28, %v8559_v58  ;;  %v8008_v58 = vld [vmem:[#allocation16 + $0xc1c] ss:$28 sps:$4 sm:$0xff]  }
 0x4e6   :  { %7181 = vmatprep.subr.bf16.mxu0 %v7930_v6  ;;  %v8000_v6 = vld [vmem:[#allocation16 + $0xba8] ss:$28 sps:$4 sm:$0xff]  }
 0x4e8   :  { %5997 = vmatpush1.bf16.msra.mxu1 %v7927_v7  ;;  %v8005_v7 = vld [vmem:[#allocation16 + $0xbe4] ss:$28 sps:$4 sm:$0xff]  }
 0x4e9   :  { %7182 = vmatpush3.bf16.msra.mxu0 %v7931_v9  ;;  %5998 = vmatprep.subr.bf16.mxu1 %v7934_v12 }
 0x4ea   :  { %7183 = vmatprep.subr.bf16.mxu0 %v7935_v38 }
 0x4ec   :  { %5999 = vmatpush1.bf16.msra.mxu1 %v7932_v31 }
 0x4ed   :  { %7184 = vmatpush3.bf16.msra.mxu0 %v7936_v11  ;;  %6009 = vmatprep.subr.bf16.mxu1 %v7939_v13 }
 0x4ef   :  { %6001 = vmatmul.mubr.bf16.vlgmr.msra.gmra.mrb[12].mxu1 %v8606_v45  ;;  %v7954_v45 = vld [vmem:[#allocation16 + $0x82c] ss:$28 sps:$4 sm:$0xff]  }
 0x4f0   :  { %6244 = vmatmul.mubr.bf16.vlgmr.msra.gmra.mrb[36].mxu0 %v8639_v48  ;;  %6010 = vmatpush1.bf16.msra.mxu1 %v7937_v14 }
 0x4f1   :  { %6041 = vmatprep.mubr.bf16.mxu1 %v8622_v17  ;;  %6011 = vmatprep.subr.bf16.mxu1 %v7942_v19  ;;  %v7955_v17 = vld [vmem:[#allocation16 + $0x860] ss:$28 sps:$4 sm:$0xff]  }
 0x4f4   :  { %6012 = vmatpush1.bf16.msra.mxu1 %v7940_v16  ;;  %v8003_v16 = vld [vmem:[#allocation16 + $0xbe0] ss:$28 sps:$4 sm:$0xff]  }
 0x4f5   :  { %6013 = vmatprep.subr.bf16.mxu1 %v7945_v18 }
 0x4f8   :  { %6014 = vmatpush1.bf16.msra.mxu1 %v7943_v36  ;;  %v8006_v36 = vld [vmem:[#allocation16 + $0xc18] ss:$28 sps:$4 sm:$0xff]  }
 0x4f9   :  { %6015 = vmatprep.subr.bf16.mxu1 %v7948_v24  ;;  %v8011_v24 = vld [vmem:[#allocation16 + $0xc54] ss:$28 sps:$4 sm:$0xff]  }
 0x4fc   :  { %6016 = vmatpush1.bf16.msra.mxu1 %v7946_v27  ;;  %v8009_v27 = vld [vmem:[#allocation16 + $0xc50] ss:$28 sps:$4 sm:$0xff]  }
 0x4fd   :  { %6017 = vmatprep.subr.bf16.mxu1 %v7951_v29  ;;  %v8014_v29 = vld [vmem:[#allocation16 + $0xc8c] ss:$28 sps:$4 sm:$0xff]  }
 0x500   :  { %6018 = vmatpush1.bf16.msra.mxu1 %v7949_v30 }
 0x501   :  { %6019 = vmatprep.subr.bf16.mxu1 %v7954_v45 }
 0x504   :  { %6020 = vmatpush1.bf16.msra.mxu1 %v7952_v32  ;;  %v8012_v32 = vld [vmem:[#allocation16 + $0xc88] ss:$28 sps:$4 sm:$0xff]  }
 0x505   :  { %6021 = vmatprep.subr.bf16.mxu1 %v7957_v33 }
 0x508   :  { %6022 = vmatpush1.bf16.msra.mxu1 %v7955_v17  ;;  %v8017_v17 = vld [vmem:[#allocation16 + $0xcc4] ss:$28 sps:$4 sm:$0xff]  }
 0x509   :  { %6023 = vmatprep.subr.bf16.mxu1 %v7960_v20 }
 0x50c   :  { %6024 = vmatpush1.bf16.msra.mxu1 %v7958_v21 }
 0x50d   :  { %6025 = vmatprep.subr.bf16.mxu1 %v7963_v23 }
 0x510   :  { %6026 = vmatpush1.bf16.msra.mxu1 %v7961_v25  ;;  %v8015_v25 = vld [vmem:[#allocation16 + $0xcc0] ss:$28 sps:$4 sm:$0xff]  }
 0x511   :  { %6027 = vmatprep.subr.bf16.mxu1 %v7966_v26  ;;  %v8020_v26 = vld [vmem:[#allocation16 + $0xcfc] ss:$28 sps:$4 sm:$0xff]  }
 0x514   :  { %6028 = vmatpush1.bf16.msra.mxu1 %v7964_v34  ;;  %v8018_v34 = vld [vmem:[#allocation16 + $0xcf8] ss:$28 sps:$4 sm:$0xff]  }
 0x515   :  { %6029 = vmatprep.subr.bf16.mxu1 %v7969_v3  ;;  %v8023_v3 = vld [vmem:[#allocation16 + $0xd34] ss:$28 sps:$4 sm:$0xff]  }
 0x518   :  { %6030 = vmatpush1.bf16.msra.mxu1 %v7967_v37  ;;  %v8021_v37 = vld [vmem:[#allocation16 + $0xd30] ss:$28 sps:$4 sm:$0xff]  }
 0x519   :  { %6031 = vmatprep.subr.bf16.mxu1 %v7972_v39  ;;  %v8026_v39 = vld [vmem:[#allocation16 + $0xd6c] ss:$28 sps:$4 sm:$0xff]  }
 0x51c   :  { %6032 = vmatpush1.bf16.msra.mxu1 %v7970_v41  ;;  %v8024_v41 = vld [vmem:[#allocation16 + $0xd68] ss:$28 sps:$4 sm:$0xff]  }
 0x51d   :  { %6033 = vmatprep.subr.bf16.mxu1 %v7975_v43  ;;  %v8029_v43 = vld [vmem:[#allocation16 + $0xda4] ss:$28 sps:$4 sm:$0xff]  }
 0x520   :  { %6034 = vmatpush1.bf16.msra.mxu1 %v7973_v59 }
 0x521   :  { %6035 = vmatprep.subr.bf16.mxu1 %v7978_v46 }
 0x524   :  { %6036 = vmatpush1.bf16.msra.mxu1 %v7976_v47  ;;  %v8027_v47 = vld [vmem:[#allocation16 + $0xda0] ss:$28 sps:$4 sm:$0xff]  }
 0x525   :  { %6037 = vmatprep.subr.bf16.mxu1 %v7981_v49 }
 0x528   :  { %6038 = vmatpush1.bf16.msra.mxu1 %v7979_v50 }
 0x529   :  { %6039 = vmatprep.subr.bf16.mxu1 %v7984_v51  ;;  %v8032_v51 = vld [vmem:[#allocation16 + $0xddc] ss:$28 sps:$4 sm:$0xff]  }
 0x52c   :  { %6040 = vmatpush1.bf16.msra.mxu1 %v7982_v52 }
 0x52d   :  { %6050 = vmatprep.subr.bf16.mxu1 %v7987_v53  ;;  %v8030_v53 = vld [vmem:[#allocation16 + $0xdd8] ss:$28 sps:$4 sm:$0xff]  }
 0x52f   :  { %6042 = vmatmul.mubr.bf16.vlgmr.msra.gmra.mrb[12].mxu1 %v8624_v22  ;;  %v8002_v22 = vld [vmem:[#allocation16 + $0xbac] ss:$28 sps:$4 sm:$0xff]  }
 0x530   :  { %6051 = vmatpush1.bf16.msra.mxu1 %v7985_v54  ;;  %6082 = vmatprep.mubr.bf16.mxu1 %v8628_v57  ;;  %v3263_v57 = vrot.slane %v8658_v28, %v8508_v42  ;;  %v3287_v54 = vrot.slane %v8658_v28, %v1100_v15 }
 0x531   :  { %6052 = vmatprep.subr.bf16.mxu1 %v7990_v56 }
 0x534   :  { %6053 = vmatpush1.bf16.msra.mxu1 %v7988_v60 }
 0x535   :  { %6054 = vmatprep.subr.bf16.mxu1 %v7993_v61 }
 0x538   :  { %6055 = vmatpush1.bf16.msra.mxu1 %v7991_v62 }
 0x539   :  { %6056 = vmatprep.subr.bf16.mxu1 %v7996_v63 }
 0x53c   :  { %6057 = vmatpush1.bf16.msra.mxu1 %v7994_v0 }
 0x53d   :  { %6058 = vmatprep.subr.bf16.mxu1 %v7999_v10 }
 0x540   :  { %6059 = vmatpush1.bf16.msra.mxu1 %v7997_v1 }
 0x541   :  { %6060 = vmatprep.subr.bf16.mxu1 %v8002_v22 }
 0x542   :  { %v5756_v9 = vpop.f32.mrb[8].mxu1  ;;  %v5920_v12 = vpop.f32.mrb[20].mxu0 }
 0x543   :  { %v7199_v38 = vadd.f32 %v5756_v9, %v3263_v57  ;;  %v7201_v31 = vadd.f32 %v5920_v12, %v3271_v2  ;;  %v5758_v11 = vpop.f32.mrb[9].mxu1  ;;  %v5922_v13 = vpop.f32.mrb[21].mxu0 }
 0x544   :  { %v7200_v42 = vadd.f32 %v5758_v11, %v3267_v4  ;;  %v7202_v14 = vadd.f32 %v5922_v13, %v3275_v5  ;;  %v5760_v19 = vpop.f32.mrb[10].mxu1  ;;  %v5924_v55 = vpop.f32.mrb[22].mxu0  ;;  %6061 = vmatpush1.bf16.msra.mxu1 %v8000_v6  ;;  %v3279_v11 = vrot.slane %v8658_v28, %v1092_v8  ;;  %v3283_v13 = vrot.slane %v8658_v28, %v1096_v40 }
 0x545   :  { %8033 = vtanh.f32 %v7199_v38  ;;  %v5761_v44 = vpop.f32.mrb[11].mxu1  ;;  %v5925_v18 = vpop.f32.mrb[23].mxu0  ;;  %6062 = vmatprep.subr.bf16.mxu1 %v8005_v7 }
 0x546   :  { %8035 = vtanh.f32 %v7201_v31 }
 0x547   :  { %8037 = vtanh.f32 %v7200_v42 }
 0x548   :  { %8039 = vtanh.f32 %v7202_v14  ;;  %6063 = vmatpush1.bf16.msra.mxu1 %v8003_v16 }
 0x549   :  { %6064 = vmatprep.subr.bf16.mxu1 %v8008_v58 }
 0x54c   :  { %6065 = vmatpush1.bf16.msra.mxu1 %v8006_v36 }
 0x54d   :  { %6066 = vmatprep.subr.bf16.mxu1 %v8011_v24 }
 0x54f   :  { %v8034_v30 = vpop.eup %8033 }
 0x550   :  { %v8036_v45 = vpop.eup %8035  ;;  %6067 = vmatpush1.bf16.msra.mxu1 %v8009_v27 }
 0x551   :  { %v8038_v33 = vpop.eup %8037  ;;  %6068 = vmatprep.subr.bf16.mxu1 %v8014_v29 }
 0x552   :  { %v8040_v20 = vpop.eup %8039  ;;  %v7099_v21 = vpack.c.bf16 %v8038_v33, %v8034_v30 }
 0x553   :  { %v7100_v23 = vpack.c.bf16 %v8040_v20, %v8036_v45 }
 0x554   :  { %6069 = vmatpush1.bf16.msra.mxu1 %v8012_v32  ;;  %6287 = vst [vmem:[#allocation19] sm:$0xff] %v7099_v21 }
 0x555   :  { %6070 = vmatprep.subr.bf16.mxu1 %v8017_v17  ;;  %6288 = vst [vmem:[#allocation19 + $0x8] sm:$0xff] %v7100_v23 }
 0x558   :  { %6071 = vmatpush1.bf16.msra.mxu1 %v8015_v25 }
 0x559   :  { %6072 = vmatprep.subr.bf16.mxu1 %v8020_v26 }
 0x55c   :  { %6073 = vmatpush1.bf16.msra.mxu1 %v8018_v34 }
 0x55d   :  { %6074 = vmatprep.subr.bf16.mxu1 %v8023_v3 }
 0x560   :  { %6075 = vmatpush1.bf16.msra.mxu1 %v8021_v37 }
 0x561   :  { %6076 = vmatprep.subr.bf16.mxu1 %v8026_v39 }
 0x563   :  { %v7119_v59 = vpop.f32.mrb[24].mxu0 }
 0x564   :  { %v7120_v46 = vpop.f32.mrb[25].mxu0  ;;  %6077 = vmatpush1.bf16.msra.mxu1 %v8024_v41 }
 0x565   :  { %v7121_v49 = vadd.f32 %v7120_v46, %v7119_v59  ;;  %v7122_v50 = vpop.f32.mrb[26].mxu0  ;;  %6078 = vmatprep.subr.bf16.mxu1 %v8029_v43 }
 0x566   :  { %v7123_v52 = vpop.f32.mrb[27].mxu0 }
 0x567   :  { %v6126_v61 = vadd.f32 %v7121_v49, %v3287_v54 }
 0x568   :  { %6079 = vmatpush1.bf16.msra.mxu1 %v8027_v47 }
 0x569   :  { %6080 = vmatprep.subr.bf16.mxu1 %v8032_v51 }
 0x56c   :  { %6081 = vmatpush1.bf16.msra.mxu1 %v8030_v53 }
 0x56f   :  { %6083 = vmatmul.mubr.bf16.vlgmr.msra.gmra.mrb[12].mxu1 %v8639_v48 }
 0x583   :  { %v7141_v56 = vpop.f32.mrb[28].mxu0 }
 0x584   :  { %v7142_v60 = vpop.f32.mrb[29].mxu0 }
 0x585   :  { %v7143_v62 = vadd.f32 %v7142_v60, %v7141_v56  ;;  %v7144_v63 = vpop.f32.mrb[30].mxu0 }
 0x586   :  { %v7145_v0 = vpop.f32.mrb[31].mxu0 }
 0x587   :  { %v6166_v10 = vadd.f32 %v7143_v62, %v6126_v61 }
 0x5a3   :  { %v7163_v1 = vpop.f32.mrb[32].mxu0 }
 0x5a4   :  { %v7164_v22 = vpop.f32.mrb[33].mxu0 }
 0x5a5   :  { %v7165_v57 = vadd.f32 %v7164_v22, %v7163_v1  ;;  %v7166_v2 = vpop.f32.mrb[34].mxu0 }
 0x5a6   :  { %v7167_v4 = vpop.f32.mrb[35].mxu0 }
 0x5a7   :  { %v6206_v5 = vadd.f32 %v7165_v57, %v6166_v10 }
 0x5c3   :  { %v7185_v6 = vpop.f32.mrb[36].mxu0 }
 0x5c4   :  { %v7186_v7 = vpop.f32.mrb[37].mxu0 }
 0x5c5   :  { %v7187_v48 = vadd.f32 %v7186_v7, %v7185_v6  ;;  %v7188_v9 = vpop.f32.mrb[38].mxu0 }
 0x5c6   :  { %v7189_v12 = vpop.f32.mrb[39].mxu0 }
 0x5c7   :  { %v6246_v38 = vadd.f32 %v7187_v48, %v6206_v5 }
 0x5c9   :  { %8041 = vtanh.f32 %v6246_v38 }
 0x5d3   :  { %v8042_v15 = vpop.eup %8041 }
 0x5d4   :  { %v7102_v31 = vpack.c.bf16 %v8042_v15, %v8042_v15 }
 0x5d6   :  { %6290 = vst [vmem:[#allocation19 + $0x18] sm:$0xf] %v7102_v31 }
 0x642   :  { %v6084_v42 = vpop.f32.mrb[12].mxu1 }
 0x643   :  { %v7203_v14 = vadd.f32 %v6084_v42, %v3279_v11  ;;  %v6086_v19 = vpop.f32.mrb[13].mxu1 }
 0x644   :  { %v7204_v55 = vadd.f32 %v6086_v19, %v3283_v13  ;;  %v6088_v16 = vpop.f32.mrb[14].mxu1 }
 0x645   :  { %8043 = vtanh.f32 %v7203_v14  ;;  %v6089_v44 = vpop.f32.mrb[15].mxu1 }
 0x646   :  { %8045 = vtanh.f32 %v7204_v55 }
 0x64f   :  { %v8044_v18 = vpop.eup %8043 }
 0x650   :  { %v8046_v58 = vpop.eup %8045 }
 0x651   :  { %v7101_v36 = vpack.c.bf16 %v8046_v58, %v8044_v18 }
 0x653   :  { %6289 = vst [vmem:[#allocation19 + $0x10] sm:$0xff] %v7101_v36 }
 0x654   :  { %8278 = shalt.err (!%p8275_p0)
}
 0x655   :  { %s8279_s24 = scalar_lea.hbm %s8700_s10, 448 }
 0x656   :  { %p8280_p1 = scmp.ne.s32.totalorder %s8700_s10, %s8279_s24  ;;  %p8283_p2 = scmp.lt.u32.totalorder %s8279_s24, %s8700_s10 }
 0x658   :  { %p8285_p3 = pnand %p8283_p2, %p8280_p1 }
 0x65a   :  { %8288 = shalt.err (!%p8285_p3)
}
 0x65b   :  { %6300 = dma.vmem_to_hbm [thread:$0]  %s6298_s18, 448, %s8700_s10, [#allocation4]  }
 0x65c   :  { %8301 = dma.done.wait [#allocation4], 448  }
 0x65d   :  { %8302 = vsyncadd [#allocation4], 4294966848 }
 0x65e   :  { %6304 = vsyncpa [#allocation3], 1 }
 0x65f   :  { %6305 = vsyncpa [#allocation6], 1 }
 0x660   :  { %6306 = vsyncpa [#allocation9], 1 }
 0x661   :  { %6307 = vsyncpa [#allocation12], 1 }
 0x662   :  { %6308 = vsyncpa [#allocation15], 1 }
 0x663   :  { %6309 = vsyncpa [#allocation18], 1 }
 0x664   :  { %6310 = vsyncpa [#allocation4], 1 }

</bundles_post_ra>
